<compile_context>
chip_gen: v7x
topology: tpu7x:2x2x1
jax: 0.10.0
libtpu: 0.0.40
codegen_flags: <defaults>
</compile_context>

<pallas_src>
import functools

import jax
import jax.numpy as jnp
from jax import lax
from jax.experimental import pallas as pl
from jax.experimental.pallas import tpu as pltpu


def _pool_avg_max(ref, C, L):
    """Fused channel-mean / channel-max over a (1, C, L) VMEM ref in ONE traversal.

    Returns (avg, max) as (1, L) float32.  Chunked fori_loop over C bounds live
    ranges and halves the VMEM vld traffic vs separate sum and max reductions.
    """
    CH = 8  # sublane-aligned channel chunk
    nfull = C // CH
    acc_s = jnp.zeros((1, L), jnp.float32)
    acc_m = jnp.full((1, L), -jnp.inf, jnp.float32)

    def body(i, carry):
        s, m = carry
        start = pl.multiple_of(i * CH, CH)
        rows = ref[0, pl.ds(start, CH), :].astype(jnp.float32)        # (CH, L)
        s = s + jnp.sum(rows, axis=0, keepdims=True)
        m = jnp.maximum(m, jnp.max(rows, axis=0, keepdims=True))
        return s, m

    if nfull > 0:
        acc_s, acc_m = lax.fori_loop(0, nfull, body, (acc_s, acc_m))
    rem = C - nfull * CH
    if rem > 0:
        rows = ref[0, pl.ds(nfull * CH, rem), :].astype(jnp.float32)  # static tail
        acc_s = acc_s + jnp.sum(rows, axis=0, keepdims=True)
        acc_m = jnp.maximum(acc_m, jnp.max(rows, axis=0, keepdims=True))
    # sum * (1/C): within ~1 ulp of a true divide; fine for the stated tolerances.
    return acc_s * (1.0 / C), acc_m


def _spatial_attention_kernel(w_ref, col_ref, x_ref, *rest, W, K, P, L, PW, C,
                              halo_elems, with_halo):
    # w_ref:   SMEM (2*K*K,) f32     flattened conv1 weight, layout [in_ch, ky, kx]
    # col_ref: VMEM (1, L) i32       column index (i mod W) of each strip pixel
    # x_ref:   VMEM (1, C, L)        one strip of one image, native dtype (lane-dense)
    # xt/xb:   VMEM (1, C, halo_e)   halo windows just above / below the strip
    # o_ref:   VMEM (1, C, L)        output strip, native dtype
    if with_halo:
        xt_ref, xb_ref, o_ref = rest
    else:
        (o_ref,) = rest

    # ---- fused channel pooling over this strip (single pass over the slab) ----
    avg, mx = _pool_avg_max(x_ref, C, L)
    stacked = jnp.concatenate([avg, mx], axis=0)                      # (2, L)

    # ---- pooled P-row halos (re-reads only 2P rows of x per strip) ----
    if with_halo:
        s_idx = pl.program_id(1)
        t_avg, t_max = _pool_avg_max(xt_ref, C, halo_elems)
        b_avg, b_max = _pool_avg_max(xb_ref, C, halo_elems)
        top = jnp.concatenate([t_avg[:, halo_elems - PW:],
                               t_max[:, halo_elems - PW:]], axis=0)   # (2, PW)
        bot = jnp.concatenate([b_avg[:, :PW], b_max[:, :PW]], axis=0)  # (2, PW)
        # At the image boundary the conv zero-pads, so the halo rows become zeros
        # (the clamped-index halo blocks carry in-image data that must be ignored).
        top = jnp.where(s_idx == 0, jnp.zeros_like(top), top)
        bot = jnp.where(s_idx == pl.num_programs(1) - 1, jnp.zeros_like(bot), bot)
    else:
        top = jnp.zeros((2, PW), jnp.float32)
        bot = jnp.zeros((2, PW), jnp.float32)

    # Flat layout: [P zeros][P halo rows][strip rows][P halo rows][P zeros], so every
    # (ky, kx) tap is a single in-bounds slice at offset P + ky*W + dx.
    zpad = jnp.zeros((2, P), jnp.float32)
    fpad = jnp.concatenate([zpad, top, stacked, bot, zpad], axis=1)   # (2, L+2PW+2P)

    # ---- KxK conv grouped by dx: accumulate the K vertical taps unmasked, then one
    #      per-dx edge mask (2P selects instead of 2P*K). ----
    col = col_ref[...]                                                # (1, L) int32
    dx_terms = []
    for kx in range(K):
        dx = kx - P
        acc = None
        for ky in range(K):
            off = P + ky * W + dx
            win = lax.slice(fpad, (0, off), (2, off + L))             # (2, L)
            w_avg = w_ref[0 * K * K + ky * K + kx]
            w_max = w_ref[1 * K * K + ky * K + kx]
            t = w_avg * win[0:1, :] + w_max * win[1:2, :]
            acc = t if acc is None else acc + t
        if dx != 0:  # horizontally out-of-range taps read a neighbouring row -> mask
            inside = jnp.logical_and(col + dx >= 0, col + dx < W)
            acc = jnp.where(inside, acc, 0.0)
        dx_terms.append(acc)
    # Balanced tree-sum of the independent per-dx accumulators.
    while len(dx_terms) > 1:
        nxt = [a + b for a, b in zip(dx_terms[0::2], dx_terms[1::2])]
        if len(dx_terms) % 2:
            nxt.append(dx_terms[-1])
        dx_terms = nxt
    att = jax.nn.sigmoid(dx_terms[0])                                 # (1, L) f32

    # Broadcast multiply in x's native dtype; lane-dense store of the strip.
    x = x_ref[0]
    o_ref[0] = (x * att.astype(x.dtype)).astype(o_ref.dtype)


def _vmem_budget_bytes():
    phys = 64 * 1024 * 1024            # conservative default: v7x has 64 MiB per TC
    try:
        info = pltpu.get_tpu_info()
        phys = int(getattr(info, "vmem_capacity_bytes", phys))
    except Exception:
        pass
    # ~78% of physical: v7x -> ~50 MiB, v5e/v6e (128 MiB) -> capped at ~100 MiB.
    return max(32 * 1024 * 1024, min(int(phys * 0.78), 100 * 1024 * 1024))


def _block_vmem_bytes(C, L, halo_elems, itemsize, with_halo):
    io = 4 * C * L * itemsize                       # x strip + out strip, double-buffered
    halo = 4 * C * halo_elems * itemsize if with_halo else 0
    temps = 24 * L * 4                              # pooled maps / fpad / per-dx f32 accs
    return io + halo + temps


def _pick_num_strips(N, C, H, W, itemsize, P, budget):
    halo_elems = 128 * pl.cdiv(P * W, 128)
    cands = []
    for ns in range(1, H + 1):
        if H % ns:
            continue
        L = (H // ns) * W
        if ns > 1 and (L % 128 or L % halo_elems):
            continue
        cands.append((ns, L))
    fitting = [c for c in cands
               if _block_vmem_bytes(C, c[1], halo_elems, itemsize, c[0] > 1) <= budget]
    if fitting:
        ns = fitting[0][0]                          # biggest strip that fits the budget
        if N * ns < 2:                              # v7x: give both TensorCores work at N==1
            multi = [c for c in fitting if c[0] >= 2]
            if multi:
                ns = multi[0][0]
        return ns
    return cands[-1][0]                             # nothing fits: most-split valid option


def spatial_attention(x, conv_weight, kernel_size=7, num_strips=None):
    """x: (N, C, H, W); conv_weight: (1, 2, K, K). Returns (N, C, H, W)."""
    assert kernel_size in (3, 7), "kernel size must be 3 or 7"
    N, C, H, W = x.shape
    HW = H * W
    K = kernel_size
    P = 3 if K == 7 else 1
    itemsize = jnp.dtype(x.dtype).itemsize

    budget = _vmem_budget_bytes()
    halo_elems = 128 * pl.cdiv(P * W, 128)
    if num_strips is None:
        num_strips = _pick_num_strips(N, C, H, W, itemsize, P, budget)
    ns = int(num_strips)
    assert H % ns == 0, "num_strips must divide H"
    L = (H // ns) * W
    with_halo = ns > 1
    if with_halo:
        assert L % 128 == 0 and L % halo_elems == 0, (
            "strip size must be a multiple of 128 lanes and of the halo block")

    # Free reshape for contiguous NCHW: put H*W on the lane axis.
    xf = x.reshape(N, C, HW)
    w_flat = conv_weight.reshape(-1).astype(jnp.float32)              # (2*K*K,)
    # Column index of every flattened strip pixel (strips are whole rows so it is the
    # same for every strip); constant index_map -> DMA'd once, never refetched.
    col_ids = jnp.tile(jnp.arange(W, dtype=jnp.int32), H).reshape(1, HW)

    kernel = functools.partial(
        _spatial_attention_kernel, W=W, K=K, P=P, L=L, PW=P * W, C=C,
        halo_elems=halo_elems, with_halo=with_halo)

    in_specs = [
        pl.BlockSpec(memory_space=pltpu.MemorySpace.SMEM),            # conv weights
        pl.BlockSpec((1, L), lambda n, s: (0, 0)),                    # column ids
        pl.BlockSpec((1, C, L), lambda n, s: (n, 0, s)),              # main strip
    ]
    args = [w_flat, col_ids, xf]
    if with_halo:
        bps = L // halo_elems                                         # halo blocks / strip
        nblk = HW // halo_elems
        in_specs += [
            # P rows just above the strip: last halo block before the strip start
            # (clamped at the top edge; the kernel zeroes it for the first strip).
            pl.BlockSpec((1, C, halo_elems),
                         lambda n, s, bps=bps: (n, 0, jnp.maximum(s * bps - 1, 0))),
            # P rows just below the strip: first halo block after the strip end
            # (clamped at the bottom edge; zeroed for the last strip).
            pl.BlockSpec((1, C, halo_elems),
                         lambda n, s, bps=bps, nblk=nblk: (
                             n, 0, jnp.minimum((s + 1) * bps, nblk - 1))),
        ]
        args += [xf, xf]                                              # same HBM buffer

    out = pl.pallas_call(
        kernel,
        out_shape=jax.ShapeDtypeStruct((N, C, HW), x.dtype),
        grid=(N, ns),
        in_specs=in_specs,
        out_specs=pl.BlockSpec((1, C, L), lambda n, s: (n, 0, s)),
        compiler_params=pltpu.CompilerParams(
            dimension_semantics=("parallel", "parallel"),
            vmem_limit_bytes=budget,
        ),
    )(*args)
    return out.reshape(N, C, H, W)


def _reference(x, conv_weight, kernel_size=7):
    P = 3 if kernel_size == 7 else 1
    avg_out = jnp.mean(x, axis=1, keepdims=True)
    max_out = jnp.max(x, axis=1, keepdims=True)
    out = jnp.concatenate([avg_out, max_out], axis=1)                 # (N, 2, H, W)
    conv = lax.conv_general_dilated(
        out, conv_weight,
        window_strides=(1, 1), padding=[(P, P), (P, P)],
        dimension_numbers=("NCHW", "OIHW", "NCHW"))
    return jax.nn.sigmoid(conv) * x


if __name__ == "__main__":
    kernel_size = 7
    N, C, H, W = 2, 4, 16, 16

    key = jax.random.PRNGKey(0)
    kx_key, kw_key = jax.random.split(key)
    x = jax.random.normal(kx_key, (N, C, H, W), dtype=jnp.float32)
    # Deterministic weight init (kaiming-uniform-ish scale, no bias as in the module).
    fan_in = 2 * kernel_size * kernel_size
    bound = 1.0 / (fan_in ** 0.5)
    conv_weight = jax.random.uniform(
        kw_key, (1, 2, kernel_size, kernel_size),
        minval=-bound, maxval=bound, dtype=jnp.float32)

    ref = _reference(x, conv_weight, kernel_size=kernel_size)

    # 1) Default config: auto strip selection (single full-image strip at this size).
    out = jax.block_until_ready(spatial_attention(x, conv_weight, kernel_size=kernel_size))
    assert out.shape == (N, C, H, W)
    assert jnp.allclose(out, ref, atol=1e-4, rtol=1e-4), "mismatch vs JAX reference"

    # 2) Forced 2-strip config: exercises the H-strip + halo path used for large C*H*W.
    out2 = jax.block_until_ready(
        spatial_attention(x, conv_weight, kernel_size=kernel_size, num_strips=2))
    assert jnp.allclose(out2, ref, atol=1e-4, rtol=1e-4), "mismatch vs JAX reference (strips)"

    print("KERNEL_OK")
</pallas_src>

<mosaic_0001>
module attributes {stable_mosaic.version = 11 : i64} {
  func.func @_spatial_attention_kernel(%arg0: i32, %arg1: i32, %arg2: memref<98xf32, #tpu.memory_space<smem>>, %arg3: memref<1x256xi32, #tpu.memory_space<vmem>>, %arg4: memref<1x4x256xf32, #tpu.memory_space<vmem>>, %arg5: memref<1x4x256xf32, #tpu.memory_space<vmem>>) attributes {dimension_semantics = [#tpu.dimension_semantics<parallel>, #tpu.dimension_semantics<parallel>], iteration_bounds = array<i64: 2, 1>, scalar_prefetch = 0 : i64, scratch_operands = 0 : i64, tpu.core_type = #tpu.core_type<tc>, window_params = [{transform_indices = @transform_0, window_bounds = array<i64: 98>}, {pipeline_mode = #tpu.pipeline_mode<synchronous>, transform_indices = @transform_1, window_bounds = array<i64: 1, 256>}, {transform_indices = @transform_2, window_bounds = array<i64: 1, 4, 256>}, {transform_indices = @transform_3, window_bounds = array<i64: 1, 4, 256>}]} {
    %cst = arith.constant 0.000000e+00 : f32
    %0 = vector.broadcast %cst : f32 to vector<1x256xf32>
    %cst_0 = arith.constant 0xFF800000 : f32
    %1 = vector.broadcast %cst_0 : f32 to vector<1x256xf32>
    %c0 = arith.constant 0 : index
    %c0_1 = arith.constant 0 : index
    %c0_2 = arith.constant 0 : index
    %2 = vector.load %arg4[%c0, %c0_1, %c0_2] : memref<1x4x256xf32, #tpu.memory_space<vmem>>, vector<1x4x256xf32>
    %3 = vector.shape_cast %2 : vector<1x4x256xf32> to vector<4x256xf32>
    %cst_3 = arith.constant dense<0.000000e+00> : vector<256xf32>
    %4 = vector.multi_reduction <add>, %3, %cst_3 [0] : vector<4x256xf32> to vector<256xf32>
    %5 = vector.shape_cast %4 : vector<256xf32> to vector<1x256xf32>
    %6 = arith.addf %0, %5 : vector<1x256xf32>
    %cst_4 = arith.constant dense<0xFF800000> : vector<256xf32>
    %7 = vector.multi_reduction <maximumf>, %3, %cst_4 [0] : vector<4x256xf32> to vector<256xf32>
    %8 = vector.shape_cast %7 : vector<256xf32> to vector<1x256xf32>
    %9 = arith.maximumf %1, %8 : vector<1x256xf32>
    %cst_5 = arith.constant 2.500000e-01 : f32
    %10 = vector.broadcast %cst_5 : f32 to vector<1x256xf32>
    %11 = arith.mulf %6, %10 : vector<1x256xf32>
    %12 = tpu.concatenate %11, %9 in 0 : vector<1x256xf32>, vector<1x256xf32> -> vector<2x256xf32>
    %cst_6 = arith.constant 0.000000e+00 : f32
    %13 = vector.broadcast %cst_6 : f32 to vector<2x48xf32>
    %cst_7 = arith.constant 0.000000e+00 : f32
    %14 = vector.broadcast %cst_7 : f32 to vector<2x48xf32>
    %cst_8 = arith.constant 0.000000e+00 : f32
    %15 = vector.broadcast %cst_8 : f32 to vector<2x3xf32>
    %16 = tpu.concatenate %15, %13, %12, %14, %15 in 1 : vector<2x3xf32>, vector<2x48xf32>, vector<2x256xf32>, vector<2x48xf32>, vector<2x3xf32> -> vector<2x358xf32>
    %c0_9 = arith.constant 0 : index
    %c0_10 = arith.constant 0 : index
    %17 = vector.load %arg3[%c0_9, %c0_10] : memref<1x256xi32, #tpu.memory_space<vmem>>, vector<1x256xi32>
    %18 = vector.extract_strided_slice %16 {offsets = [0, 0], sizes = [2, 256], strides = [1, 1]} : vector<2x358xf32> to vector<2x256xf32>
    %c0_11 = arith.constant 0 : index
    %19 = memref.load %arg2[%c0_11] : memref<98xf32, #tpu.memory_space<smem>>
    %c49 = arith.constant 49 : index
    %20 = memref.load %arg2[%c49] : memref<98xf32, #tpu.memory_space<smem>>
    %21 = vector.extract_strided_slice %18 {offsets = [0, 0], sizes = [1, 256], strides = [1, 1]} : vector<2x256xf32> to vector<1x256xf32>
    %22 = vector.broadcast %19 : f32 to vector<1x256xf32>
    %23 = arith.mulf %22, %21 : vector<1x256xf32>
    %24 = vector.extract_strided_slice %18 {offsets = [1, 0], sizes = [1, 256], strides = [1, 1]} : vector<2x256xf32> to vector<1x256xf32>
    %25 = vector.broadcast %20 : f32 to vector<1x256xf32>
    %26 = arith.mulf %25, %24 : vector<1x256xf32>
    %27 = arith.addf %23, %26 : vector<1x256xf32>
    %28 = vector.extract_strided_slice %16 {offsets = [0, 16], sizes = [2, 256], strides = [1, 1]} : vector<2x358xf32> to vector<2x256xf32>
    %c7 = arith.constant 7 : index
    %29 = memref.load %arg2[%c7] : memref<98xf32, #tpu.memory_space<smem>>
    %c56 = arith.constant 56 : index
    %30 = memref.load %arg2[%c56] : memref<98xf32, #tpu.memory_space<smem>>
    %31 = vector.extract_strided_slice %28 {offsets = [0, 0], sizes = [1, 256], strides = [1, 1]} : vector<2x256xf32> to vector<1x256xf32>
    %32 = vector.broadcast %29 : f32 to vector<1x256xf32>
    %33 = arith.mulf %32, %31 : vector<1x256xf32>
    %34 = vector.extract_strided_slice %28 {offsets = [1, 0], sizes = [1, 256], strides = [1, 1]} : vector<2x256xf32> to vector<1x256xf32>
    %35 = vector.broadcast %30 : f32 to vector<1x256xf32>
    %36 = arith.mulf %35, %34 : vector<1x256xf32>
    %37 = arith.addf %33, %36 : vector<1x256xf32>
    %38 = arith.addf %27, %37 : vector<1x256xf32>
    %39 = vector.extract_strided_slice %16 {offsets = [0, 32], sizes = [2, 256], strides = [1, 1]} : vector<2x358xf32> to vector<2x256xf32>
    %c14 = arith.constant 14 : index
    %40 = memref.load %arg2[%c14] : memref<98xf32, #tpu.memory_space<smem>>
    %c63 = arith.constant 63 : index
    %41 = memref.load %arg2[%c63] : memref<98xf32, #tpu.memory_space<smem>>
    %42 = vector.extract_strided_slice %39 {offsets = [0, 0], sizes = [1, 256], strides = [1, 1]} : vector<2x256xf32> to vector<1x256xf32>
    %43 = vector.broadcast %40 : f32 to vector<1x256xf32>
    %44 = arith.mulf %43, %42 : vector<1x256xf32>
    %45 = vector.extract_strided_slice %39 {offsets = [1, 0], sizes = [1, 256], strides = [1, 1]} : vector<2x256xf32> to vector<1x256xf32>
    %46 = vector.broadcast %41 : f32 to vector<1x256xf32>
    %47 = arith.mulf %46, %45 : vector<1x256xf32>
    %48 = arith.addf %44, %47 : vector<1x256xf32>
    %49 = arith.addf %38, %48 : vector<1x256xf32>
    %50 = vector.extract_strided_slice %16 {offsets = [0, 48], sizes = [2, 256], strides = [1, 1]} : vector<2x358xf32> to vector<2x256xf32>
    %c21 = arith.constant 21 : index
    %51 = memref.load %arg2[%c21] : memref<98xf32, #tpu.memory_space<smem>>
    %c70 = arith.constant 70 : index
    %52 = memref.load %arg2[%c70] : memref<98xf32, #tpu.memory_space<smem>>
    %53 = vector.extract_strided_slice %50 {offsets = [0, 0], sizes = [1, 256], strides = [1, 1]} : vector<2x256xf32> to vector<1x256xf32>
    %54 = vector.broadcast %51 : f32 to vector<1x256xf32>
    %55 = arith.mulf %54, %53 : vector<1x256xf32>
    %56 = vector.extract_strided_slice %50 {offsets = [1, 0], sizes = [1, 256], strides = [1, 1]} : vector<2x256xf32> to vector<1x256xf32>
    %57 = vector.broadcast %52 : f32 to vector<1x256xf32>
    %58 = arith.mulf %57, %56 : vector<1x256xf32>
    %59 = arith.addf %55, %58 : vector<1x256xf32>
    %60 = arith.addf %49, %59 : vector<1x256xf32>
    %61 = vector.extract_strided_slice %16 {offsets = [0, 64], sizes = [2, 256], strides = [1, 1]} : vector<2x358xf32> to vector<2x256xf32>
    %c28 = arith.constant 28 : index
    %62 = memref.load %arg2[%c28] : memref<98xf32, #tpu.memory_space<smem>>
    %c77 = arith.constant 77 : index
    %63 = memref.load %arg2[%c77] : memref<98xf32, #tpu.memory_space<smem>>
    %64 = vector.extract_strided_slice %61 {offsets = [0, 0], sizes = [1, 256], strides = [1, 1]} : vector<2x256xf32> to vector<1x256xf32>
    %65 = vector.broadcast %62 : f32 to vector<1x256xf32>
    %66 = arith.mulf %65, %64 : vector<1x256xf32>
    %67 = vector.extract_strided_slice %61 {offsets = [1, 0], sizes = [1, 256], strides = [1, 1]} : vector<2x256xf32> to vector<1x256xf32>
    %68 = vector.broadcast %63 : f32 to vector<1x256xf32>
    %69 = arith.mulf %68, %67 : vector<1x256xf32>
    %70 = arith.addf %66, %69 : vector<1x256xf32>
    %71 = arith.addf %60, %70 : vector<1x256xf32>
    %72 = vector.extract_strided_slice %16 {offsets = [0, 80], sizes = [2, 256], strides = [1, 1]} : vector<2x358xf32> to vector<2x256xf32>
    %c35 = arith.constant 35 : index
    %73 = memref.load %arg2[%c35] : memref<98xf32, #tpu.memory_space<smem>>
    %c84 = arith.constant 84 : index
    %74 = memref.load %arg2[%c84] : memref<98xf32, #tpu.memory_space<smem>>
    %75 = vector.extract_strided_slice %72 {offsets = [0, 0], sizes = [1, 256], strides = [1, 1]} : vector<2x256xf32> to vector<1x256xf32>
    %76 = vector.broadcast %73 : f32 to vector<1x256xf32>
    %77 = arith.mulf %76, %75 : vector<1x256xf32>
    %78 = vector.extract_strided_slice %72 {offsets = [1, 0], sizes = [1, 256], strides = [1, 1]} : vector<2x256xf32> to vector<1x256xf32>
    %79 = vector.broadcast %74 : f32 to vector<1x256xf32>
    %80 = arith.mulf %79, %78 : vector<1x256xf32>
    %81 = arith.addf %77, %80 : vector<1x256xf32>
    %82 = arith.addf %71, %81 : vector<1x256xf32>
    %83 = vector.extract_strided_slice %16 {offsets = [0, 96], sizes = [2, 256], strides = [1, 1]} : vector<2x358xf32> to vector<2x256xf32>
    %c42 = arith.constant 42 : index
    %84 = memref.load %arg2[%c42] : memref<98xf32, #tpu.memory_space<smem>>
    %c91 = arith.constant 91 : index
    %85 = memref.load %arg2[%c91] : memref<98xf32, #tpu.memory_space<smem>>
    %86 = vector.extract_strided_slice %83 {offsets = [0, 0], sizes = [1, 256], strides = [1, 1]} : vector<2x256xf32> to vector<1x256xf32>
    %87 = vector.broadcast %84 : f32 to vector<1x256xf32>
    %88 = arith.mulf %87, %86 : vector<1x256xf32>
    %89 = vector.extract_strided_slice %83 {offsets = [1, 0], sizes = [1, 256], strides = [1, 1]} : vector<2x256xf32> to vector<1x256xf32>
    %90 = vector.broadcast %85 : f32 to vector<1x256xf32>
    %91 = arith.mulf %90, %89 : vector<1x256xf32>
    %92 = arith.addf %88, %91 : vector<1x256xf32>
    %93 = arith.addf %82, %92 : vector<1x256xf32>
    %c-3_i32 = arith.constant -3 : i32
    %94 = vector.broadcast %c-3_i32 : i32 to vector<1x256xi32>
    %95 = arith.addi %17, %94 : vector<1x256xi32>
    %c0_i32 = arith.constant 0 : i32
    %96 = vector.broadcast %c0_i32 : i32 to vector<1x256xi32>
    %97 = arith.cmpi sge, %95, %96 : vector<1x256xi32>
    %c-3_i32_12 = arith.constant -3 : i32
    %98 = vector.broadcast %c-3_i32_12 : i32 to vector<1x256xi32>
    %99 = arith.addi %17, %98 : vector<1x256xi32>
    %c16_i32 = arith.constant 16 : i32
    %100 = vector.broadcast %c16_i32 : i32 to vector<1x256xi32>
    %101 = arith.cmpi slt, %99, %100 : vector<1x256xi32>
    %102 = arith.andi %97, %101 : vector<1x256xi1>
    %cst_13 = arith.constant 0.000000e+00 : f32
    %103 = vector.broadcast %cst_13 : f32 to vector<1x256xf32>
    %104 = arith.select %102, %93, %103 : vector<1x256xi1>, vector<1x256xf32>
    %105 = vector.extract_strided_slice %16 {offsets = [0, 1], sizes = [2, 256], strides = [1, 1]} : vector<2x358xf32> to vector<2x256xf32>
    %c1 = arith.constant 1 : index
    %106 = memref.load %arg2[%c1] : memref<98xf32, #tpu.memory_space<smem>>
    %c50 = arith.constant 50 : index
    %107 = memref.load %arg2[%c50] : memref<98xf32, #tpu.memory_space<smem>>
    %108 = vector.extract_strided_slice %105 {offsets = [0, 0], sizes = [1, 256], strides = [1, 1]} : vector<2x256xf32> to vector<1x256xf32>
    %109 = vector.broadcast %106 : f32 to vector<1x256xf32>
    %110 = arith.mulf %109, %108 : vector<1x256xf32>
    %111 = vector.extract_strided_slice %105 {offsets = [1, 0], sizes = [1, 256], strides = [1, 1]} : vector<2x256xf32> to vector<1x256xf32>
    %112 = vector.broadcast %107 : f32 to vector<1x256xf32>
    %113 = arith.mulf %112, %111 : vector<1x256xf32>
    %114 = arith.addf %110, %113 : vector<1x256xf32>
    %115 = vector.extract_strided_slice %16 {offsets = [0, 17], sizes = [2, 256], strides = [1, 1]} : vector<2x358xf32> to vector<2x256xf32>
    %c8 = arith.constant 8 : index
    %116 = memref.load %arg2[%c8] : memref<98xf32, #tpu.memory_space<smem>>
    %c57 = arith.constant 57 : index
    %117 = memref.load %arg2[%c57] : memref<98xf32, #tpu.memory_space<smem>>
    %118 = vector.extract_strided_slice %115 {offsets = [0, 0], sizes = [1, 256], strides = [1, 1]} : vector<2x256xf32> to vector<1x256xf32>
    %119 = vector.broadcast %116 : f32 to vector<1x256xf32>
    %120 = arith.mulf %119, %118 : vector<1x256xf32>
    %121 = vector.extract_strided_slice %115 {offsets = [1, 0], sizes = [1, 256], strides = [1, 1]} : vector<2x256xf32> to vector<1x256xf32>
    %122 = vector.broadcast %117 : f32 to vector<1x256xf32>
    %123 = arith.mulf %122, %121 : vector<1x256xf32>
    %124 = arith.addf %120, %123 : vector<1x256xf32>
    %125 = arith.addf %114, %124 : vector<1x256xf32>
    %126 = vector.extract_strided_slice %16 {offsets = [0, 33], sizes = [2, 256], strides = [1, 1]} : vector<2x358xf32> to vector<2x256xf32>
    %c15 = arith.constant 15 : index
    %127 = memref.load %arg2[%c15] : memref<98xf32, #tpu.memory_space<smem>>
    %c64 = arith.constant 64 : index
    %128 = memref.load %arg2[%c64] : memref<98xf32, #tpu.memory_space<smem>>
    %129 = vector.extract_strided_slice %126 {offsets = [0, 0], sizes = [1, 256], strides = [1, 1]} : vector<2x256xf32> to vector<1x256xf32>
    %130 = vector.broadcast %127 : f32 to vector<1x256xf32>
    %131 = arith.mulf %130, %129 : vector<1x256xf32>
    %132 = vector.extract_strided_slice %126 {offsets = [1, 0], sizes = [1, 256], strides = [1, 1]} : vector<2x256xf32> to vector<1x256xf32>
    %133 = vector.broadcast %128 : f32 to vector<1x256xf32>
    %134 = arith.mulf %133, %132 : vector<1x256xf32>
    %135 = arith.addf %131, %134 : vector<1x256xf32>
    %136 = arith.addf %125, %135 : vector<1x256xf32>
    %137 = vector.extract_strided_slice %16 {offsets = [0, 49], sizes = [2, 256], strides = [1, 1]} : vector<2x358xf32> to vector<2x256xf32>
    %c22 = arith.constant 22 : index
    %138 = memref.load %arg2[%c22] : memref<98xf32, #tpu.memory_space<smem>>
    %c71 = arith.constant 71 : index
    %139 = memref.load %arg2[%c71] : memref<98xf32, #tpu.memory_space<smem>>
    %140 = vector.extract_strided_slice %137 {offsets = [0, 0], sizes = [1, 256], strides = [1, 1]} : vector<2x256xf32> to vector<1x256xf32>
    %141 = vector.broadcast %138 : f32 to vector<1x256xf32>
    %142 = arith.mulf %141, %140 : vector<1x256xf32>
    %143 = vector.extract_strided_slice %137 {offsets = [1, 0], sizes = [1, 256], strides = [1, 1]} : vector<2x256xf32> to vector<1x256xf32>
    %144 = vector.broadcast %139 : f32 to vector<1x256xf32>
    %145 = arith.mulf %144, %143 : vector<1x256xf32>
    %146 = arith.addf %142, %145 : vector<1x256xf32>
    %147 = arith.addf %136, %146 : vector<1x256xf32>
    %148 = vector.extract_strided_slice %16 {offsets = [0, 65], sizes = [2, 256], strides = [1, 1]} : vector<2x358xf32> to vector<2x256xf32>
    %c29 = arith.constant 29 : index
    %149 = memref.load %arg2[%c29] : memref<98xf32, #tpu.memory_space<smem>>
    %c78 = arith.constant 78 : index
    %150 = memref.load %arg2[%c78] : memref<98xf32, #tpu.memory_space<smem>>
    %151 = vector.extract_strided_slice %148 {offsets = [0, 0], sizes = [1, 256], strides = [1, 1]} : vector<2x256xf32> to vector<1x256xf32>
    %152 = vector.broadcast %149 : f32 to vector<1x256xf32>
    %153 = arith.mulf %152, %151 : vector<1x256xf32>
    %154 = vector.extract_strided_slice %148 {offsets = [1, 0], sizes = [1, 256], strides = [1, 1]} : vector<2x256xf32> to vector<1x256xf32>
    %155 = vector.broadcast %150 : f32 to vector<1x256xf32>
    %156 = arith.mulf %155, %154 : vector<1x256xf32>
    %157 = arith.addf %153, %156 : vector<1x256xf32>
    %158 = arith.addf %147, %157 : vector<1x256xf32>
    %159 = vector.extract_strided_slice %16 {offsets = [0, 81], sizes = [2, 256], strides = [1, 1]} : vector<2x358xf32> to vector<2x256xf32>
    %c36 = arith.constant 36 : index
    %160 = memref.load %arg2[%c36] : memref<98xf32, #tpu.memory_space<smem>>
    %c85 = arith.constant 85 : index
    %161 = memref.load %arg2[%c85] : memref<98xf32, #tpu.memory_space<smem>>
    %162 = vector.extract_strided_slice %159 {offsets = [0, 0], sizes = [1, 256], strides = [1, 1]} : vector<2x256xf32> to vector<1x256xf32>
    %163 = vector.broadcast %160 : f32 to vector<1x256xf32>
    %164 = arith.mulf %163, %162 : vector<1x256xf32>
    %165 = vector.extract_strided_slice %159 {offsets = [1, 0], sizes = [1, 256], strides = [1, 1]} : vector<2x256xf32> to vector<1x256xf32>
    %166 = vector.broadcast %161 : f32 to vector<1x256xf32>
    %167 = arith.mulf %166, %165 : vector<1x256xf32>
    %168 = arith.addf %164, %167 : vector<1x256xf32>
    %169 = arith.addf %158, %168 : vector<1x256xf32>
    %170 = vector.extract_strided_slice %16 {offsets = [0, 97], sizes = [2, 256], strides = [1, 1]} : vector<2x358xf32> to vector<2x256xf32>
    %c43 = arith.constant 43 : index
    %171 = memref.load %arg2[%c43] : memref<98xf32, #tpu.memory_space<smem>>
    %c92 = arith.constant 92 : index
    %172 = memref.load %arg2[%c92] : memref<98xf32, #tpu.memory_space<smem>>
    %173 = vector.extract_strided_slice %170 {offsets = [0, 0], sizes = [1, 256], strides = [1, 1]} : vector<2x256xf32> to vector<1x256xf32>
    %174 = vector.broadcast %171 : f32 to vector<1x256xf32>
    %175 = arith.mulf %174, %173 : vector<1x256xf32>
    %176 = vector.extract_strided_slice %170 {offsets = [1, 0], sizes = [1, 256], strides = [1, 1]} : vector<2x256xf32> to vector<1x256xf32>
    %177 = vector.broadcast %172 : f32 to vector<1x256xf32>
    %178 = arith.mulf %177, %176 : vector<1x256xf32>
    %179 = arith.addf %175, %178 : vector<1x256xf32>
    %180 = arith.addf %169, %179 : vector<1x256xf32>
    %c-2_i32 = arith.constant -2 : i32
    %181 = vector.broadcast %c-2_i32 : i32 to vector<1x256xi32>
    %182 = arith.addi %17, %181 : vector<1x256xi32>
    %c0_i32_14 = arith.constant 0 : i32
    %183 = vector.broadcast %c0_i32_14 : i32 to vector<1x256xi32>
    %184 = arith.cmpi sge, %182, %183 : vector<1x256xi32>
    %c-2_i32_15 = arith.constant -2 : i32
    %185 = vector.broadcast %c-2_i32_15 : i32 to vector<1x256xi32>
    %186 = arith.addi %17, %185 : vector<1x256xi32>
    %c16_i32_16 = arith.constant 16 : i32
    %187 = vector.broadcast %c16_i32_16 : i32 to vector<1x256xi32>
    %188 = arith.cmpi slt, %186, %187 : vector<1x256xi32>
    %189 = arith.andi %184, %188 : vector<1x256xi1>
    %cst_17 = arith.constant 0.000000e+00 : f32
    %190 = vector.broadcast %cst_17 : f32 to vector<1x256xf32>
    %191 = arith.select %189, %180, %190 : vector<1x256xi1>, vector<1x256xf32>
    %192 = vector.extract_strided_slice %16 {offsets = [0, 2], sizes = [2, 256], strides = [1, 1]} : vector<2x358xf32> to vector<2x256xf32>
    %c2 = arith.constant 2 : index
    %193 = memref.load %arg2[%c2] : memref<98xf32, #tpu.memory_space<smem>>
    %c51 = arith.constant 51 : index
    %194 = memref.load %arg2[%c51] : memref<98xf32, #tpu.memory_space<smem>>
    %195 = vector.extract_strided_slice %192 {offsets = [0, 0], sizes = [1, 256], strides = [1, 1]} : vector<2x256xf32> to vector<1x256xf32>
    %196 = vector.broadcast %193 : f32 to vector<1x256xf32>
    %197 = arith.mulf %196, %195 : vector<1x256xf32>
    %198 = vector.extract_strided_slice %192 {offsets = [1, 0], sizes = [1, 256], strides = [1, 1]} : vector<2x256xf32> to vector<1x256xf32>
    %199 = vector.broadcast %194 : f32 to vector<1x256xf32>
    %200 = arith.mulf %199, %198 : vector<1x256xf32>
    %201 = arith.addf %197, %200 : vector<1x256xf32>
    %202 = vector.extract_strided_slice %16 {offsets = [0, 18], sizes = [2, 256], strides = [1, 1]} : vector<2x358xf32> to vector<2x256xf32>
    %c9 = arith.constant 9 : index
    %203 = memref.load %arg2[%c9] : memref<98xf32, #tpu.memory_space<smem>>
    %c58 = arith.constant 58 : index
    %204 = memref.load %arg2[%c58] : memref<98xf32, #tpu.memory_space<smem>>
    %205 = vector.extract_strided_slice %202 {offsets = [0, 0], sizes = [1, 256], strides = [1, 1]} : vector<2x256xf32> to vector<1x256xf32>
    %206 = vector.broadcast %203 : f32 to vector<1x256xf32>
    %207 = arith.mulf %206, %205 : vector<1x256xf32>
    %208 = vector.extract_strided_slice %202 {offsets = [1, 0], sizes = [1, 256], strides = [1, 1]} : vector<2x256xf32> to vector<1x256xf32>
    %209 = vector.broadcast %204 : f32 to vector<1x256xf32>
    %210 = arith.mulf %209, %208 : vector<1x256xf32>
    %211 = arith.addf %207, %210 : vector<1x256xf32>
    %212 = arith.addf %201, %211 : vector<1x256xf32>
    %213 = vector.extract_strided_slice %16 {offsets = [0, 34], sizes = [2, 256], strides = [1, 1]} : vector<2x358xf32> to vector<2x256xf32>
    %c16 = arith.constant 16 : index
    %214 = memref.load %arg2[%c16] : memref<98xf32, #tpu.memory_space<smem>>
    %c65 = arith.constant 65 : index
    %215 = memref.load %arg2[%c65] : memref<98xf32, #tpu.memory_space<smem>>
    %216 = vector.extract_strided_slice %213 {offsets = [0, 0], sizes = [1, 256], strides = [1, 1]} : vector<2x256xf32> to vector<1x256xf32>
    %217 = vector.broadcast %214 : f32 to vector<1x256xf32>
    %218 = arith.mulf %217, %216 : vector<1x256xf32>
    %219 = vector.extract_strided_slice %213 {offsets = [1, 0], sizes = [1, 256], strides = [1, 1]} : vector<2x256xf32> to vector<1x256xf32>
    %220 = vector.broadcast %215 : f32 to vector<1x256xf32>
    %221 = arith.mulf %220, %219 : vector<1x256xf32>
    %222 = arith.addf %218, %221 : vector<1x256xf32>
    %223 = arith.addf %212, %222 : vector<1x256xf32>
    %224 = vector.extract_strided_slice %16 {offsets = [0, 50], sizes = [2, 256], strides = [1, 1]} : vector<2x358xf32> to vector<2x256xf32>
    %c23 = arith.constant 23 : index
    %225 = memref.load %arg2[%c23] : memref<98xf32, #tpu.memory_space<smem>>
    %c72 = arith.constant 72 : index
    %226 = memref.load %arg2[%c72] : memref<98xf32, #tpu.memory_space<smem>>
    %227 = vector.extract_strided_slice %224 {offsets = [0, 0], sizes = [1, 256], strides = [1, 1]} : vector<2x256xf32> to vector<1x256xf32>
    %228 = vector.broadcast %225 : f32 to vector<1x256xf32>
    %229 = arith.mulf %228, %227 : vector<1x256xf32>
    %230 = vector.extract_strided_slice %224 {offsets = [1, 0], sizes = [1, 256], strides = [1, 1]} : vector<2x256xf32> to vector<1x256xf32>
    %231 = vector.broadcast %226 : f32 to vector<1x256xf32>
    %232 = arith.mulf %231, %230 : vector<1x256xf32>
    %233 = arith.addf %229, %232 : vector<1x256xf32>
    %234 = arith.addf %223, %233 : vector<1x256xf32>
    %235 = vector.extract_strided_slice %16 {offsets = [0, 66], sizes = [2, 256], strides = [1, 1]} : vector<2x358xf32> to vector<2x256xf32>
    %c30 = arith.constant 30 : index
    %236 = memref.load %arg2[%c30] : memref<98xf32, #tpu.memory_space<smem>>
    %c79 = arith.constant 79 : index
    %237 = memref.load %arg2[%c79] : memref<98xf32, #tpu.memory_space<smem>>
    %238 = vector.extract_strided_slice %235 {offsets = [0, 0], sizes = [1, 256], strides = [1, 1]} : vector<2x256xf32> to vector<1x256xf32>
    %239 = vector.broadcast %236 : f32 to vector<1x256xf32>
    %240 = arith.mulf %239, %238 : vector<1x256xf32>
    %241 = vector.extract_strided_slice %235 {offsets = [1, 0], sizes = [1, 256], strides = [1, 1]} : vector<2x256xf32> to vector<1x256xf32>
    %242 = vector.broadcast %237 : f32 to vector<1x256xf32>
    %243 = arith.mulf %242, %241 : vector<1x256xf32>
    %244 = arith.addf %240, %243 : vector<1x256xf32>
    %245 = arith.addf %234, %244 : vector<1x256xf32>
    %246 = vector.extract_strided_slice %16 {offsets = [0, 82], sizes = [2, 256], strides = [1, 1]} : vector<2x358xf32> to vector<2x256xf32>
    %c37 = arith.constant 37 : index
    %247 = memref.load %arg2[%c37] : memref<98xf32, #tpu.memory_space<smem>>
    %c86 = arith.constant 86 : index
    %248 = memref.load %arg2[%c86] : memref<98xf32, #tpu.memory_space<smem>>
    %249 = vector.extract_strided_slice %246 {offsets = [0, 0], sizes = [1, 256], strides = [1, 1]} : vector<2x256xf32> to vector<1x256xf32>
    %250 = vector.broadcast %247 : f32 to vector<1x256xf32>
    %251 = arith.mulf %250, %249 : vector<1x256xf32>
    %252 = vector.extract_strided_slice %246 {offsets = [1, 0], sizes = [1, 256], strides = [1, 1]} : vector<2x256xf32> to vector<1x256xf32>
    %253 = vector.broadcast %248 : f32 to vector<1x256xf32>
    %254 = arith.mulf %253, %252 : vector<1x256xf32>
    %255 = arith.addf %251, %254 : vector<1x256xf32>
    %256 = arith.addf %245, %255 : vector<1x256xf32>
    %257 = vector.extract_strided_slice %16 {offsets = [0, 98], sizes = [2, 256], strides = [1, 1]} : vector<2x358xf32> to vector<2x256xf32>
    %c44 = arith.constant 44 : index
    %258 = memref.load %arg2[%c44] : memref<98xf32, #tpu.memory_space<smem>>
    %c93 = arith.constant 93 : index
    %259 = memref.load %arg2[%c93] : memref<98xf32, #tpu.memory_space<smem>>
    %260 = vector.extract_strided_slice %257 {offsets = [0, 0], sizes = [1, 256], strides = [1, 1]} : vector<2x256xf32> to vector<1x256xf32>
    %261 = vector.broadcast %258 : f32 to vector<1x256xf32>
    %262 = arith.mulf %261, %260 : vector<1x256xf32>
    %263 = vector.extract_strided_slice %257 {offsets = [1, 0], sizes = [1, 256], strides = [1, 1]} : vector<2x256xf32> to vector<1x256xf32>
    %264 = vector.broadcast %259 : f32 to vector<1x256xf32>
    %265 = arith.mulf %264, %263 : vector<1x256xf32>
    %266 = arith.addf %262, %265 : vector<1x256xf32>
    %267 = arith.addf %256, %266 : vector<1x256xf32>
    %c-1_i32 = arith.constant -1 : i32
    %268 = vector.broadcast %c-1_i32 : i32 to vector<1x256xi32>
    %269 = arith.addi %17, %268 : vector<1x256xi32>
    %c0_i32_18 = arith.constant 0 : i32
    %270 = vector.broadcast %c0_i32_18 : i32 to vector<1x256xi32>
    %271 = arith.cmpi sge, %269, %270 : vector<1x256xi32>
    %c-1_i32_19 = arith.constant -1 : i32
    %272 = vector.broadcast %c-1_i32_19 : i32 to vector<1x256xi32>
    %273 = arith.addi %17, %272 : vector<1x256xi32>
    %c16_i32_20 = arith.constant 16 : i32
    %274 = vector.broadcast %c16_i32_20 : i32 to vector<1x256xi32>
    %275 = arith.cmpi slt, %273, %274 : vector<1x256xi32>
    %276 = arith.andi %271, %275 : vector<1x256xi1>
    %cst_21 = arith.constant 0.000000e+00 : f32
    %277 = vector.broadcast %cst_21 : f32 to vector<1x256xf32>
    %278 = arith.select %276, %267, %277 : vector<1x256xi1>, vector<1x256xf32>
    %279 = vector.extract_strided_slice %16 {offsets = [0, 3], sizes = [2, 256], strides = [1, 1]} : vector<2x358xf32> to vector<2x256xf32>
    %c3 = arith.constant 3 : index
    %280 = memref.load %arg2[%c3] : memref<98xf32, #tpu.memory_space<smem>>
    %c52 = arith.constant 52 : index
    %281 = memref.load %arg2[%c52] : memref<98xf32, #tpu.memory_space<smem>>
    %282 = vector.extract_strided_slice %279 {offsets = [0, 0], sizes = [1, 256], strides = [1, 1]} : vector<2x256xf32> to vector<1x256xf32>
    %283 = vector.broadcast %280 : f32 to vector<1x256xf32>
    %284 = arith.mulf %283, %282 : vector<1x256xf32>
    %285 = vector.extract_strided_slice %279 {offsets = [1, 0], sizes = [1, 256], strides = [1, 1]} : vector<2x256xf32> to vector<1x256xf32>
    %286 = vector.broadcast %281 : f32 to vector<1x256xf32>
    %287 = arith.mulf %286, %285 : vector<1x256xf32>
    %288 = arith.addf %284, %287 : vector<1x256xf32>
    %289 = vector.extract_strided_slice %16 {offsets = [0, 19], sizes = [2, 256], strides = [1, 1]} : vector<2x358xf32> to vector<2x256xf32>
    %c10 = arith.constant 10 : index
    %290 = memref.load %arg2[%c10] : memref<98xf32, #tpu.memory_space<smem>>
    %c59 = arith.constant 59 : index
    %291 = memref.load %arg2[%c59] : memref<98xf32, #tpu.memory_space<smem>>
    %292 = vector.extract_strided_slice %289 {offsets = [0, 0], sizes = [1, 256], strides = [1, 1]} : vector<2x256xf32> to vector<1x256xf32>
    %293 = vector.broadcast %290 : f32 to vector<1x256xf32>
    %294 = arith.mulf %293, %292 : vector<1x256xf32>
    %295 = vector.extract_strided_slice %289 {offsets = [1, 0], sizes = [1, 256], strides = [1, 1]} : vector<2x256xf32> to vector<1x256xf32>
    %296 = vector.broadcast %291 : f32 to vector<1x256xf32>
    %297 = arith.mulf %296, %295 : vector<1x256xf32>
    %298 = arith.addf %294, %297 : vector<1x256xf32>
    %299 = arith.addf %288, %298 : vector<1x256xf32>
    %300 = vector.extract_strided_slice %16 {offsets = [0, 35], sizes = [2, 256], strides = [1, 1]} : vector<2x358xf32> to vector<2x256xf32>
    %c17 = arith.constant 17 : index
    %301 = memref.load %arg2[%c17] : memref<98xf32, #tpu.memory_space<smem>>
    %c66 = arith.constant 66 : index
    %302 = memref.load %arg2[%c66] : memref<98xf32, #tpu.memory_space<smem>>
    %303 = vector.extract_strided_slice %300 {offsets = [0, 0], sizes = [1, 256], strides = [1, 1]} : vector<2x256xf32> to vector<1x256xf32>
    %304 = vector.broadcast %301 : f32 to vector<1x256xf32>
    %305 = arith.mulf %304, %303 : vector<1x256xf32>
    %306 = vector.extract_strided_slice %300 {offsets = [1, 0], sizes = [1, 256], strides = [1, 1]} : vector<2x256xf32> to vector<1x256xf32>
    %307 = vector.broadcast %302 : f32 to vector<1x256xf32>
    %308 = arith.mulf %307, %306 : vector<1x256xf32>
    %309 = arith.addf %305, %308 : vector<1x256xf32>
    %310 = arith.addf %299, %309 : vector<1x256xf32>
    %311 = vector.extract_strided_slice %16 {offsets = [0, 51], sizes = [2, 256], strides = [1, 1]} : vector<2x358xf32> to vector<2x256xf32>
    %c24 = arith.constant 24 : index
    %312 = memref.load %arg2[%c24] : memref<98xf32, #tpu.memory_space<smem>>
    %c73 = arith.constant 73 : index
    %313 = memref.load %arg2[%c73] : memref<98xf32, #tpu.memory_space<smem>>
    %314 = vector.extract_strided_slice %311 {offsets = [0, 0], sizes = [1, 256], strides = [1, 1]} : vector<2x256xf32> to vector<1x256xf32>
    %315 = vector.broadcast %312 : f32 to vector<1x256xf32>
    %316 = arith.mulf %315, %314 : vector<1x256xf32>
    %317 = vector.extract_strided_slice %311 {offsets = [1, 0], sizes = [1, 256], strides = [1, 1]} : vector<2x256xf32> to vector<1x256xf32>
    %318 = vector.broadcast %313 : f32 to vector<1x256xf32>
    %319 = arith.mulf %318, %317 : vector<1x256xf32>
    %320 = arith.addf %316, %319 : vector<1x256xf32>
    %321 = arith.addf %310, %320 : vector<1x256xf32>
    %322 = vector.extract_strided_slice %16 {offsets = [0, 67], sizes = [2, 256], strides = [1, 1]} : vector<2x358xf32> to vector<2x256xf32>
    %c31 = arith.constant 31 : index
    %323 = memref.load %arg2[%c31] : memref<98xf32, #tpu.memory_space<smem>>
    %c80 = arith.constant 80 : index
    %324 = memref.load %arg2[%c80] : memref<98xf32, #tpu.memory_space<smem>>
    %325 = vector.extract_strided_slice %322 {offsets = [0, 0], sizes = [1, 256], strides = [1, 1]} : vector<2x256xf32> to vector<1x256xf32>
    %326 = vector.broadcast %323 : f32 to vector<1x256xf32>
    %327 = arith.mulf %326, %325 : vector<1x256xf32>
    %328 = vector.extract_strided_slice %322 {offsets = [1, 0], sizes = [1, 256], strides = [1, 1]} : vector<2x256xf32> to vector<1x256xf32>
    %329 = vector.broadcast %324 : f32 to vector<1x256xf32>
    %330 = arith.mulf %329, %328 : vector<1x256xf32>
    %331 = arith.addf %327, %330 : vector<1x256xf32>
    %332 = arith.addf %321, %331 : vector<1x256xf32>
    %333 = vector.extract_strided_slice %16 {offsets = [0, 83], sizes = [2, 256], strides = [1, 1]} : vector<2x358xf32> to vector<2x256xf32>
    %c38 = arith.constant 38 : index
    %334 = memref.load %arg2[%c38] : memref<98xf32, #tpu.memory_space<smem>>
    %c87 = arith.constant 87 : index
    %335 = memref.load %arg2[%c87] : memref<98xf32, #tpu.memory_space<smem>>
    %336 = vector.extract_strided_slice %333 {offsets = [0, 0], sizes = [1, 256], strides = [1, 1]} : vector<2x256xf32> to vector<1x256xf32>
    %337 = vector.broadcast %334 : f32 to vector<1x256xf32>
    %338 = arith.mulf %337, %336 : vector<1x256xf32>
    %339 = vector.extract_strided_slice %333 {offsets = [1, 0], sizes = [1, 256], strides = [1, 1]} : vector<2x256xf32> to vector<1x256xf32>
    %340 = vector.broadcast %335 : f32 to vector<1x256xf32>
    %341 = arith.mulf %340, %339 : vector<1x256xf32>
    %342 = arith.addf %338, %341 : vector<1x256xf32>
    %343 = arith.addf %332, %342 : vector<1x256xf32>
    %344 = vector.extract_strided_slice %16 {offsets = [0, 99], sizes = [2, 256], strides = [1, 1]} : vector<2x358xf32> to vector<2x256xf32>
    %c45 = arith.constant 45 : index
    %345 = memref.load %arg2[%c45] : memref<98xf32, #tpu.memory_space<smem>>
    %c94 = arith.constant 94 : index
    %346 = memref.load %arg2[%c94] : memref<98xf32, #tpu.memory_space<smem>>
    %347 = vector.extract_strided_slice %344 {offsets = [0, 0], sizes = [1, 256], strides = [1, 1]} : vector<2x256xf32> to vector<1x256xf32>
    %348 = vector.broadcast %345 : f32 to vector<1x256xf32>
    %349 = arith.mulf %348, %347 : vector<1x256xf32>
    %350 = vector.extract_strided_slice %344 {offsets = [1, 0], sizes = [1, 256], strides = [1, 1]} : vector<2x256xf32> to vector<1x256xf32>
    %351 = vector.broadcast %346 : f32 to vector<1x256xf32>
    %352 = arith.mulf %351, %350 : vector<1x256xf32>
    %353 = arith.addf %349, %352 : vector<1x256xf32>
    %354 = arith.addf %343, %353 : vector<1x256xf32>
    %355 = vector.extract_strided_slice %16 {offsets = [0, 4], sizes = [2, 256], strides = [1, 1]} : vector<2x358xf32> to vector<2x256xf32>
    %c4 = arith.constant 4 : index
    %356 = memref.load %arg2[%c4] : memref<98xf32, #tpu.memory_space<smem>>
    %c53 = arith.constant 53 : index
    %357 = memref.load %arg2[%c53] : memref<98xf32, #tpu.memory_space<smem>>
    %358 = vector.extract_strided_slice %355 {offsets = [0, 0], sizes = [1, 256], strides = [1, 1]} : vector<2x256xf32> to vector<1x256xf32>
    %359 = vector.broadcast %356 : f32 to vector<1x256xf32>
    %360 = arith.mulf %359, %358 : vector<1x256xf32>
    %361 = vector.extract_strided_slice %355 {offsets = [1, 0], sizes = [1, 256], strides = [1, 1]} : vector<2x256xf32> to vector<1x256xf32>
    %362 = vector.broadcast %357 : f32 to vector<1x256xf32>
    %363 = arith.mulf %362, %361 : vector<1x256xf32>
    %364 = arith.addf %360, %363 : vector<1x256xf32>
    %365 = vector.extract_strided_slice %16 {offsets = [0, 20], sizes = [2, 256], strides = [1, 1]} : vector<2x358xf32> to vector<2x256xf32>
    %c11 = arith.constant 11 : index
    %366 = memref.load %arg2[%c11] : memref<98xf32, #tpu.memory_space<smem>>
    %c60 = arith.constant 60 : index
    %367 = memref.load %arg2[%c60] : memref<98xf32, #tpu.memory_space<smem>>
    %368 = vector.extract_strided_slice %365 {offsets = [0, 0], sizes = [1, 256], strides = [1, 1]} : vector<2x256xf32> to vector<1x256xf32>
    %369 = vector.broadcast %366 : f32 to vector<1x256xf32>
    %370 = arith.mulf %369, %368 : vector<1x256xf32>
    %371 = vector.extract_strided_slice %365 {offsets = [1, 0], sizes = [1, 256], strides = [1, 1]} : vector<2x256xf32> to vector<1x256xf32>
    %372 = vector.broadcast %367 : f32 to vector<1x256xf32>
    %373 = arith.mulf %372, %371 : vector<1x256xf32>
    %374 = arith.addf %370, %373 : vector<1x256xf32>
    %375 = arith.addf %364, %374 : vector<1x256xf32>
    %376 = vector.extract_strided_slice %16 {offsets = [0, 36], sizes = [2, 256], strides = [1, 1]} : vector<2x358xf32> to vector<2x256xf32>
    %c18 = arith.constant 18 : index
    %377 = memref.load %arg2[%c18] : memref<98xf32, #tpu.memory_space<smem>>
    %c67 = arith.constant 67 : index
    %378 = memref.load %arg2[%c67] : memref<98xf32, #tpu.memory_space<smem>>
    %379 = vector.extract_strided_slice %376 {offsets = [0, 0], sizes = [1, 256], strides = [1, 1]} : vector<2x256xf32> to vector<1x256xf32>
    %380 = vector.broadcast %377 : f32 to vector<1x256xf32>
    %381 = arith.mulf %380, %379 : vector<1x256xf32>
    %382 = vector.extract_strided_slice %376 {offsets = [1, 0], sizes = [1, 256], strides = [1, 1]} : vector<2x256xf32> to vector<1x256xf32>
    %383 = vector.broadcast %378 : f32 to vector<1x256xf32>
    %384 = arith.mulf %383, %382 : vector<1x256xf32>
    %385 = arith.addf %381, %384 : vector<1x256xf32>
    %386 = arith.addf %375, %385 : vector<1x256xf32>
    %387 = vector.extract_strided_slice %16 {offsets = [0, 52], sizes = [2, 256], strides = [1, 1]} : vector<2x358xf32> to vector<2x256xf32>
    %c25 = arith.constant 25 : index
    %388 = memref.load %arg2[%c25] : memref<98xf32, #tpu.memory_space<smem>>
    %c74 = arith.constant 74 : index
    %389 = memref.load %arg2[%c74] : memref<98xf32, #tpu.memory_space<smem>>
    %390 = vector.extract_strided_slice %387 {offsets = [0, 0], sizes = [1, 256], strides = [1, 1]} : vector<2x256xf32> to vector<1x256xf32>
    %391 = vector.broadcast %388 : f32 to vector<1x256xf32>
    %392 = arith.mulf %391, %390 : vector<1x256xf32>
    %393 = vector.extract_strided_slice %387 {offsets = [1, 0], sizes = [1, 256], strides = [1, 1]} : vector<2x256xf32> to vector<1x256xf32>
    %394 = vector.broadcast %389 : f32 to vector<1x256xf32>
    %395 = arith.mulf %394, %393 : vector<1x256xf32>
    %396 = arith.addf %392, %395 : vector<1x256xf32>
    %397 = arith.addf %386, %396 : vector<1x256xf32>
    %398 = vector.extract_strided_slice %16 {offsets = [0, 68], sizes = [2, 256], strides = [1, 1]} : vector<2x358xf32> to vector<2x256xf32>
    %c32 = arith.constant 32 : index
    %399 = memref.load %arg2[%c32] : memref<98xf32, #tpu.memory_space<smem>>
    %c81 = arith.constant 81 : index
    %400 = memref.load %arg2[%c81] : memref<98xf32, #tpu.memory_space<smem>>
    %401 = vector.extract_strided_slice %398 {offsets = [0, 0], sizes = [1, 256], strides = [1, 1]} : vector<2x256xf32> to vector<1x256xf32>
    %402 = vector.broadcast %399 : f32 to vector<1x256xf32>
    %403 = arith.mulf %402, %401 : vector<1x256xf32>
    %404 = vector.extract_strided_slice %398 {offsets = [1, 0], sizes = [1, 256], strides = [1, 1]} : vector<2x256xf32> to vector<1x256xf32>
    %405 = vector.broadcast %400 : f32 to vector<1x256xf32>
    %406 = arith.mulf %405, %404 : vector<1x256xf32>
    %407 = arith.addf %403, %406 : vector<1x256xf32>
    %408 = arith.addf %397, %407 : vector<1x256xf32>
    %409 = vector.extract_strided_slice %16 {offsets = [0, 84], sizes = [2, 256], strides = [1, 1]} : vector<2x358xf32> to vector<2x256xf32>
    %c39 = arith.constant 39 : index
    %410 = memref.load %arg2[%c39] : memref<98xf32, #tpu.memory_space<smem>>
    %c88 = arith.constant 88 : index
    %411 = memref.load %arg2[%c88] : memref<98xf32, #tpu.memory_space<smem>>
    %412 = vector.extract_strided_slice %409 {offsets = [0, 0], sizes = [1, 256], strides = [1, 1]} : vector<2x256xf32> to vector<1x256xf32>
    %413 = vector.broadcast %410 : f32 to vector<1x256xf32>
    %414 = arith.mulf %413, %412 : vector<1x256xf32>
    %415 = vector.extract_strided_slice %409 {offsets = [1, 0], sizes = [1, 256], strides = [1, 1]} : vector<2x256xf32> to vector<1x256xf32>
    %416 = vector.broadcast %411 : f32 to vector<1x256xf32>
    %417 = arith.mulf %416, %415 : vector<1x256xf32>
    %418 = arith.addf %414, %417 : vector<1x256xf32>
    %419 = arith.addf %408, %418 : vector<1x256xf32>
    %420 = vector.extract_strided_slice %16 {offsets = [0, 100], sizes = [2, 256], strides = [1, 1]} : vector<2x358xf32> to vector<2x256xf32>
    %c46 = arith.constant 46 : index
    %421 = memref.load %arg2[%c46] : memref<98xf32, #tpu.memory_space<smem>>
    %c95 = arith.constant 95 : index
    %422 = memref.load %arg2[%c95] : memref<98xf32, #tpu.memory_space<smem>>
    %423 = vector.extract_strided_slice %420 {offsets = [0, 0], sizes = [1, 256], strides = [1, 1]} : vector<2x256xf32> to vector<1x256xf32>
    %424 = vector.broadcast %421 : f32 to vector<1x256xf32>
    %425 = arith.mulf %424, %423 : vector<1x256xf32>
    %426 = vector.extract_strided_slice %420 {offsets = [1, 0], sizes = [1, 256], strides = [1, 1]} : vector<2x256xf32> to vector<1x256xf32>
    %427 = vector.broadcast %422 : f32 to vector<1x256xf32>
    %428 = arith.mulf %427, %426 : vector<1x256xf32>
    %429 = arith.addf %425, %428 : vector<1x256xf32>
    %430 = arith.addf %419, %429 : vector<1x256xf32>
    %c1_i32 = arith.constant 1 : i32
    %431 = vector.broadcast %c1_i32 : i32 to vector<1x256xi32>
    %432 = arith.addi %17, %431 : vector<1x256xi32>
    %c0_i32_22 = arith.constant 0 : i32
    %433 = vector.broadcast %c0_i32_22 : i32 to vector<1x256xi32>
    %434 = arith.cmpi sge, %432, %433 : vector<1x256xi32>
    %c1_i32_23 = arith.constant 1 : i32
    %435 = vector.broadcast %c1_i32_23 : i32 to vector<1x256xi32>
    %436 = arith.addi %17, %435 : vector<1x256xi32>
    %c16_i32_24 = arith.constant 16 : i32
    %437 = vector.broadcast %c16_i32_24 : i32 to vector<1x256xi32>
    %438 = arith.cmpi slt, %436, %437 : vector<1x256xi32>
    %439 = arith.andi %434, %438 : vector<1x256xi1>
    %cst_25 = arith.constant 0.000000e+00 : f32
    %440 = vector.broadcast %cst_25 : f32 to vector<1x256xf32>
    %441 = arith.select %439, %430, %440 : vector<1x256xi1>, vector<1x256xf32>
    %442 = vector.extract_strided_slice %16 {offsets = [0, 5], sizes = [2, 256], strides = [1, 1]} : vector<2x358xf32> to vector<2x256xf32>
    %c5 = arith.constant 5 : index
    %443 = memref.load %arg2[%c5] : memref<98xf32, #tpu.memory_space<smem>>
    %c54 = arith.constant 54 : index
    %444 = memref.load %arg2[%c54] : memref<98xf32, #tpu.memory_space<smem>>
    %445 = vector.extract_strided_slice %442 {offsets = [0, 0], sizes = [1, 256], strides = [1, 1]} : vector<2x256xf32> to vector<1x256xf32>
    %446 = vector.broadcast %443 : f32 to vector<1x256xf32>
    %447 = arith.mulf %446, %445 : vector<1x256xf32>
    %448 = vector.extract_strided_slice %442 {offsets = [1, 0], sizes = [1, 256], strides = [1, 1]} : vector<2x256xf32> to vector<1x256xf32>
    %449 = vector.broadcast %444 : f32 to vector<1x256xf32>
    %450 = arith.mulf %449, %448 : vector<1x256xf32>
    %451 = arith.addf %447, %450 : vector<1x256xf32>
    %452 = vector.extract_strided_slice %16 {offsets = [0, 21], sizes = [2, 256], strides = [1, 1]} : vector<2x358xf32> to vector<2x256xf32>
    %c12 = arith.constant 12 : index
    %453 = memref.load %arg2[%c12] : memref<98xf32, #tpu.memory_space<smem>>
    %c61 = arith.constant 61 : index
    %454 = memref.load %arg2[%c61] : memref<98xf32, #tpu.memory_space<smem>>
    %455 = vector.extract_strided_slice %452 {offsets = [0, 0], sizes = [1, 256], strides = [1, 1]} : vector<2x256xf32> to vector<1x256xf32>
    %456 = vector.broadcast %453 : f32 to vector<1x256xf32>
    %457 = arith.mulf %456, %455 : vector<1x256xf32>
    %458 = vector.extract_strided_slice %452 {offsets = [1, 0], sizes = [1, 256], strides = [1, 1]} : vector<2x256xf32> to vector<1x256xf32>
    %459 = vector.broadcast %454 : f32 to vector<1x256xf32>
    %460 = arith.mulf %459, %458 : vector<1x256xf32>
    %461 = arith.addf %457, %460 : vector<1x256xf32>
    %462 = arith.addf %451, %461 : vector<1x256xf32>
    %463 = vector.extract_strided_slice %16 {offsets = [0, 37], sizes = [2, 256], strides = [1, 1]} : vector<2x358xf32> to vector<2x256xf32>
    %c19 = arith.constant 19 : index
    %464 = memref.load %arg2[%c19] : memref<98xf32, #tpu.memory_space<smem>>
    %c68 = arith.constant 68 : index
    %465 = memref.load %arg2[%c68] : memref<98xf32, #tpu.memory_space<smem>>
    %466 = vector.extract_strided_slice %463 {offsets = [0, 0], sizes = [1, 256], strides = [1, 1]} : vector<2x256xf32> to vector<1x256xf32>
    %467 = vector.broadcast %464 : f32 to vector<1x256xf32>
    %468 = arith.mulf %467, %466 : vector<1x256xf32>
    %469 = vector.extract_strided_slice %463 {offsets = [1, 0], sizes = [1, 256], strides = [1, 1]} : vector<2x256xf32> to vector<1x256xf32>
    %470 = vector.broadcast %465 : f32 to vector<1x256xf32>
    %471 = arith.mulf %470, %469 : vector<1x256xf32>
    %472 = arith.addf %468, %471 : vector<1x256xf32>
    %473 = arith.addf %462, %472 : vector<1x256xf32>
    %474 = vector.extract_strided_slice %16 {offsets = [0, 53], sizes = [2, 256], strides = [1, 1]} : vector<2x358xf32> to vector<2x256xf32>
    %c26 = arith.constant 26 : index
    %475 = memref.load %arg2[%c26] : memref<98xf32, #tpu.memory_space<smem>>
    %c75 = arith.constant 75 : index
    %476 = memref.load %arg2[%c75] : memref<98xf32, #tpu.memory_space<smem>>
    %477 = vector.extract_strided_slice %474 {offsets = [0, 0], sizes = [1, 256], strides = [1, 1]} : vector<2x256xf32> to vector<1x256xf32>
    %478 = vector.broadcast %475 : f32 to vector<1x256xf32>
    %479 = arith.mulf %478, %477 : vector<1x256xf32>
    %480 = vector.extract_strided_slice %474 {offsets = [1, 0], sizes = [1, 256], strides = [1, 1]} : vector<2x256xf32> to vector<1x256xf32>
    %481 = vector.broadcast %476 : f32 to vector<1x256xf32>
    %482 = arith.mulf %481, %480 : vector<1x256xf32>
    %483 = arith.addf %479, %482 : vector<1x256xf32>
    %484 = arith.addf %473, %483 : vector<1x256xf32>
    %485 = vector.extract_strided_slice %16 {offsets = [0, 69], sizes = [2, 256], strides = [1, 1]} : vector<2x358xf32> to vector<2x256xf32>
    %c33 = arith.constant 33 : index
    %486 = memref.load %arg2[%c33] : memref<98xf32, #tpu.memory_space<smem>>
    %c82 = arith.constant 82 : index
    %487 = memref.load %arg2[%c82] : memref<98xf32, #tpu.memory_space<smem>>
    %488 = vector.extract_strided_slice %485 {offsets = [0, 0], sizes = [1, 256], strides = [1, 1]} : vector<2x256xf32> to vector<1x256xf32>
    %489 = vector.broadcast %486 : f32 to vector<1x256xf32>
    %490 = arith.mulf %489, %488 : vector<1x256xf32>
    %491 = vector.extract_strided_slice %485 {offsets = [1, 0], sizes = [1, 256], strides = [1, 1]} : vector<2x256xf32> to vector<1x256xf32>
    %492 = vector.broadcast %487 : f32 to vector<1x256xf32>
    %493 = arith.mulf %492, %491 : vector<1x256xf32>
    %494 = arith.addf %490, %493 : vector<1x256xf32>
    %495 = arith.addf %484, %494 : vector<1x256xf32>
    %496 = vector.extract_strided_slice %16 {offsets = [0, 85], sizes = [2, 256], strides = [1, 1]} : vector<2x358xf32> to vector<2x256xf32>
    %c40 = arith.constant 40 : index
    %497 = memref.load %arg2[%c40] : memref<98xf32, #tpu.memory_space<smem>>
    %c89 = arith.constant 89 : index
    %498 = memref.load %arg2[%c89] : memref<98xf32, #tpu.memory_space<smem>>
    %499 = vector.extract_strided_slice %496 {offsets = [0, 0], sizes = [1, 256], strides = [1, 1]} : vector<2x256xf32> to vector<1x256xf32>
    %500 = vector.broadcast %497 : f32 to vector<1x256xf32>
    %501 = arith.mulf %500, %499 : vector<1x256xf32>
    %502 = vector.extract_strided_slice %496 {offsets = [1, 0], sizes = [1, 256], strides = [1, 1]} : vector<2x256xf32> to vector<1x256xf32>
    %503 = vector.broadcast %498 : f32 to vector<1x256xf32>
    %504 = arith.mulf %503, %502 : vector<1x256xf32>
    %505 = arith.addf %501, %504 : vector<1x256xf32>
    %506 = arith.addf %495, %505 : vector<1x256xf32>
    %507 = vector.extract_strided_slice %16 {offsets = [0, 101], sizes = [2, 256], strides = [1, 1]} : vector<2x358xf32> to vector<2x256xf32>
    %c47 = arith.constant 47 : index
    %508 = memref.load %arg2[%c47] : memref<98xf32, #tpu.memory_space<smem>>
    %c96 = arith.constant 96 : index
    %509 = memref.load %arg2[%c96] : memref<98xf32, #tpu.memory_space<smem>>
    %510 = vector.extract_strided_slice %507 {offsets = [0, 0], sizes = [1, 256], strides = [1, 1]} : vector<2x256xf32> to vector<1x256xf32>
    %511 = vector.broadcast %508 : f32 to vector<1x256xf32>
    %512 = arith.mulf %511, %510 : vector<1x256xf32>
    %513 = vector.extract_strided_slice %507 {offsets = [1, 0], sizes = [1, 256], strides = [1, 1]} : vector<2x256xf32> to vector<1x256xf32>
    %514 = vector.broadcast %509 : f32 to vector<1x256xf32>
    %515 = arith.mulf %514, %513 : vector<1x256xf32>
    %516 = arith.addf %512, %515 : vector<1x256xf32>
    %517 = arith.addf %506, %516 : vector<1x256xf32>
    %c2_i32 = arith.constant 2 : i32
    %518 = vector.broadcast %c2_i32 : i32 to vector<1x256xi32>
    %519 = arith.addi %17, %518 : vector<1x256xi32>
    %c0_i32_26 = arith.constant 0 : i32
    %520 = vector.broadcast %c0_i32_26 : i32 to vector<1x256xi32>
    %521 = arith.cmpi sge, %519, %520 : vector<1x256xi32>
    %c2_i32_27 = arith.constant 2 : i32
    %522 = vector.broadcast %c2_i32_27 : i32 to vector<1x256xi32>
    %523 = arith.addi %17, %522 : vector<1x256xi32>
    %c16_i32_28 = arith.constant 16 : i32
    %524 = vector.broadcast %c16_i32_28 : i32 to vector<1x256xi32>
    %525 = arith.cmpi slt, %523, %524 : vector<1x256xi32>
    %526 = arith.andi %521, %525 : vector<1x256xi1>
    %cst_29 = arith.constant 0.000000e+00 : f32
    %527 = vector.broadcast %cst_29 : f32 to vector<1x256xf32>
    %528 = arith.select %526, %517, %527 : vector<1x256xi1>, vector<1x256xf32>
    %529 = vector.extract_strided_slice %16 {offsets = [0, 6], sizes = [2, 256], strides = [1, 1]} : vector<2x358xf32> to vector<2x256xf32>
    %c6 = arith.constant 6 : index
    %530 = memref.load %arg2[%c6] : memref<98xf32, #tpu.memory_space<smem>>
    %c55 = arith.constant 55 : index
    %531 = memref.load %arg2[%c55] : memref<98xf32, #tpu.memory_space<smem>>
    %532 = vector.extract_strided_slice %529 {offsets = [0, 0], sizes = [1, 256], strides = [1, 1]} : vector<2x256xf32> to vector<1x256xf32>
    %533 = vector.broadcast %530 : f32 to vector<1x256xf32>
    %534 = arith.mulf %533, %532 : vector<1x256xf32>
    %535 = vector.extract_strided_slice %529 {offsets = [1, 0], sizes = [1, 256], strides = [1, 1]} : vector<2x256xf32> to vector<1x256xf32>
    %536 = vector.broadcast %531 : f32 to vector<1x256xf32>
    %537 = arith.mulf %536, %535 : vector<1x256xf32>
    %538 = arith.addf %534, %537 : vector<1x256xf32>
    %539 = vector.extract_strided_slice %16 {offsets = [0, 22], sizes = [2, 256], strides = [1, 1]} : vector<2x358xf32> to vector<2x256xf32>
    %c13 = arith.constant 13 : index
    %540 = memref.load %arg2[%c13] : memref<98xf32, #tpu.memory_space<smem>>
    %c62 = arith.constant 62 : index
    %541 = memref.load %arg2[%c62] : memref<98xf32, #tpu.memory_space<smem>>
    %542 = vector.extract_strided_slice %539 {offsets = [0, 0], sizes = [1, 256], strides = [1, 1]} : vector<2x256xf32> to vector<1x256xf32>
    %543 = vector.broadcast %540 : f32 to vector<1x256xf32>
    %544 = arith.mulf %543, %542 : vector<1x256xf32>
    %545 = vector.extract_strided_slice %539 {offsets = [1, 0], sizes = [1, 256], strides = [1, 1]} : vector<2x256xf32> to vector<1x256xf32>
    %546 = vector.broadcast %541 : f32 to vector<1x256xf32>
    %547 = arith.mulf %546, %545 : vector<1x256xf32>
    %548 = arith.addf %544, %547 : vector<1x256xf32>
    %549 = arith.addf %538, %548 : vector<1x256xf32>
    %550 = vector.extract_strided_slice %16 {offsets = [0, 38], sizes = [2, 256], strides = [1, 1]} : vector<2x358xf32> to vector<2x256xf32>
    %c20 = arith.constant 20 : index
    %551 = memref.load %arg2[%c20] : memref<98xf32, #tpu.memory_space<smem>>
    %c69 = arith.constant 69 : index
    %552 = memref.load %arg2[%c69] : memref<98xf32, #tpu.memory_space<smem>>
    %553 = vector.extract_strided_slice %550 {offsets = [0, 0], sizes = [1, 256], strides = [1, 1]} : vector<2x256xf32> to vector<1x256xf32>
    %554 = vector.broadcast %551 : f32 to vector<1x256xf32>
    %555 = arith.mulf %554, %553 : vector<1x256xf32>
    %556 = vector.extract_strided_slice %550 {offsets = [1, 0], sizes = [1, 256], strides = [1, 1]} : vector<2x256xf32> to vector<1x256xf32>
    %557 = vector.broadcast %552 : f32 to vector<1x256xf32>
    %558 = arith.mulf %557, %556 : vector<1x256xf32>
    %559 = arith.addf %555, %558 : vector<1x256xf32>
    %560 = arith.addf %549, %559 : vector<1x256xf32>
    %561 = vector.extract_strided_slice %16 {offsets = [0, 54], sizes = [2, 256], strides = [1, 1]} : vector<2x358xf32> to vector<2x256xf32>
    %c27 = arith.constant 27 : index
    %562 = memref.load %arg2[%c27] : memref<98xf32, #tpu.memory_space<smem>>
    %c76 = arith.constant 76 : index
    %563 = memref.load %arg2[%c76] : memref<98xf32, #tpu.memory_space<smem>>
    %564 = vector.extract_strided_slice %561 {offsets = [0, 0], sizes = [1, 256], strides = [1, 1]} : vector<2x256xf32> to vector<1x256xf32>
    %565 = vector.broadcast %562 : f32 to vector<1x256xf32>
    %566 = arith.mulf %565, %564 : vector<1x256xf32>
    %567 = vector.extract_strided_slice %561 {offsets = [1, 0], sizes = [1, 256], strides = [1, 1]} : vector<2x256xf32> to vector<1x256xf32>
    %568 = vector.broadcast %563 : f32 to vector<1x256xf32>
    %569 = arith.mulf %568, %567 : vector<1x256xf32>
    %570 = arith.addf %566, %569 : vector<1x256xf32>
    %571 = arith.addf %560, %570 : vector<1x256xf32>
    %572 = vector.extract_strided_slice %16 {offsets = [0, 70], sizes = [2, 256], strides = [1, 1]} : vector<2x358xf32> to vector<2x256xf32>
    %c34 = arith.constant 34 : index
    %573 = memref.load %arg2[%c34] : memref<98xf32, #tpu.memory_space<smem>>
    %c83 = arith.constant 83 : index
    %574 = memref.load %arg2[%c83] : memref<98xf32, #tpu.memory_space<smem>>
    %575 = vector.extract_strided_slice %572 {offsets = [0, 0], sizes = [1, 256], strides = [1, 1]} : vector<2x256xf32> to vector<1x256xf32>
    %576 = vector.broadcast %573 : f32 to vector<1x256xf32>
    %577 = arith.mulf %576, %575 : vector<1x256xf32>
    %578 = vector.extract_strided_slice %572 {offsets = [1, 0], sizes = [1, 256], strides = [1, 1]} : vector<2x256xf32> to vector<1x256xf32>
    %579 = vector.broadcast %574 : f32 to vector<1x256xf32>
    %580 = arith.mulf %579, %578 : vector<1x256xf32>
    %581 = arith.addf %577, %580 : vector<1x256xf32>
    %582 = arith.addf %571, %581 : vector<1x256xf32>
    %583 = vector.extract_strided_slice %16 {offsets = [0, 86], sizes = [2, 256], strides = [1, 1]} : vector<2x358xf32> to vector<2x256xf32>
    %c41 = arith.constant 41 : index
    %584 = memref.load %arg2[%c41] : memref<98xf32, #tpu.memory_space<smem>>
    %c90 = arith.constant 90 : index
    %585 = memref.load %arg2[%c90] : memref<98xf32, #tpu.memory_space<smem>>
    %586 = vector.extract_strided_slice %583 {offsets = [0, 0], sizes = [1, 256], strides = [1, 1]} : vector<2x256xf32> to vector<1x256xf32>
    %587 = vector.broadcast %584 : f32 to vector<1x256xf32>
    %588 = arith.mulf %587, %586 : vector<1x256xf32>
    %589 = vector.extract_strided_slice %583 {offsets = [1, 0], sizes = [1, 256], strides = [1, 1]} : vector<2x256xf32> to vector<1x256xf32>
    %590 = vector.broadcast %585 : f32 to vector<1x256xf32>
    %591 = arith.mulf %590, %589 : vector<1x256xf32>
    %592 = arith.addf %588, %591 : vector<1x256xf32>
    %593 = arith.addf %582, %592 : vector<1x256xf32>
    %594 = vector.extract_strided_slice %16 {offsets = [0, 102], sizes = [2, 256], strides = [1, 1]} : vector<2x358xf32> to vector<2x256xf32>
    %c48 = arith.constant 48 : index
    %595 = memref.load %arg2[%c48] : memref<98xf32, #tpu.memory_space<smem>>
    %c97 = arith.constant 97 : index
    %596 = memref.load %arg2[%c97] : memref<98xf32, #tpu.memory_space<smem>>
    %597 = vector.extract_strided_slice %594 {offsets = [0, 0], sizes = [1, 256], strides = [1, 1]} : vector<2x256xf32> to vector<1x256xf32>
    %598 = vector.broadcast %595 : f32 to vector<1x256xf32>
    %599 = arith.mulf %598, %597 : vector<1x256xf32>
    %600 = vector.extract_strided_slice %594 {offsets = [1, 0], sizes = [1, 256], strides = [1, 1]} : vector<2x256xf32> to vector<1x256xf32>
    %601 = vector.broadcast %596 : f32 to vector<1x256xf32>
    %602 = arith.mulf %601, %600 : vector<1x256xf32>
    %603 = arith.addf %599, %602 : vector<1x256xf32>
    %604 = arith.addf %593, %603 : vector<1x256xf32>
    %c3_i32 = arith.constant 3 : i32
    %605 = vector.broadcast %c3_i32 : i32 to vector<1x256xi32>
    %606 = arith.addi %17, %605 : vector<1x256xi32>
    %c0_i32_30 = arith.constant 0 : i32
    %607 = vector.broadcast %c0_i32_30 : i32 to vector<1x256xi32>
    %608 = arith.cmpi sge, %606, %607 : vector<1x256xi32>
    %c3_i32_31 = arith.constant 3 : i32
    %609 = vector.broadcast %c3_i32_31 : i32 to vector<1x256xi32>
    %610 = arith.addi %17, %609 : vector<1x256xi32>
    %c16_i32_32 = arith.constant 16 : i32
    %611 = vector.broadcast %c16_i32_32 : i32 to vector<1x256xi32>
    %612 = arith.cmpi slt, %610, %611 : vector<1x256xi32>
    %613 = arith.andi %608, %612 : vector<1x256xi1>
    %cst_33 = arith.constant 0.000000e+00 : f32
    %614 = vector.broadcast %cst_33 : f32 to vector<1x256xf32>
    %615 = arith.select %613, %604, %614 : vector<1x256xi1>, vector<1x256xf32>
    %616 = arith.addf %104, %191 : vector<1x256xf32>
    %617 = arith.addf %278, %354 : vector<1x256xf32>
    %618 = arith.addf %441, %528 : vector<1x256xf32>
    %619 = arith.addf %616, %617 : vector<1x256xf32>
    %620 = arith.addf %618, %615 : vector<1x256xf32>
    %621 = arith.addf %619, %620 : vector<1x256xf32>
    %622 = arith.negf %621 : vector<1x256xf32>
    %623 = math.exp %622 : vector<1x256xf32>
    %cst_34 = arith.constant 1.000000e+00 : f32
    %624 = vector.broadcast %cst_34 : f32 to vector<1x256xf32>
    %625 = arith.addf %624, %623 : vector<1x256xf32>
    %626 = arith.divf %624, %625 : vector<1x256xf32>
    %c0_35 = arith.constant 0 : index
    %c0_36 = arith.constant 0 : index
    %c0_37 = arith.constant 0 : index
    %627 = vector.load %arg4[%c0_35, %c0_36, %c0_37] : memref<1x4x256xf32, #tpu.memory_space<vmem>>, vector<1x4x256xf32>
    %628 = vector.shape_cast %627 : vector<1x4x256xf32> to vector<4x256xf32>
    %629 = vector.broadcast %626 : vector<1x256xf32> to vector<4x256xf32>
    %630 = arith.mulf %628, %629 : vector<4x256xf32>
    %c0_38 = arith.constant 0 : index
    %c0_39 = arith.constant 0 : index
    %c0_40 = arith.constant 0 : index
    %631 = vector.load %arg5[%c0_38, %c0_39, %c0_40] : memref<1x4x256xf32, #tpu.memory_space<vmem>>, vector<1x4x256xf32>
    %632 = vector.shape_cast %631 : vector<1x4x256xf32> to vector<4x256xf32>
    %633 = vector.shape_cast %630 : vector<4x256xf32> to vector<1x4x256xf32>
    tpu.vector_store %arg5[%c0_38, %c0_39, %c0_40], %633 {strides = array<i32>} : memref<1x4x256xf32, #tpu.memory_space<vmem>>, vector<1x4x256xf32>,
    return
  }
  func.func @transform_0(%arg0: i32, %arg1: i32) -> i32 {
    %c0_i32 = arith.constant 0 : i32
    %c0_i32_0 = arith.constant 0 : i32
    return %c0_i32 : i32
  }
  func.func @transform_1(%arg0: i32, %arg1: i32) -> (i32, i32) {
    %c0_i32 = arith.constant 0 : i32
    %c0_i32_0 = arith.constant 0 : i32
    %c0_i32_1 = arith.constant 0 : i32
    return %c0_i32, %c0_i32_0 : i32, i32
  }
  func.func @transform_2(%arg0: i32, %arg1: i32) -> (i32, i32, i32) {
    %c0_i32 = arith.constant 0 : i32
    %c0_i32_0 = arith.constant 0 : i32
    return %arg0, %c0_i32, %arg1 : i32, i32, i32
  }
  func.func @transform_3(%arg0: i32, %arg1: i32) -> (i32, i32, i32) {
    %c0_i32 = arith.constant 0 : i32
    %c0_i32_0 = arith.constant 0 : i32
    return %arg0, %c0_i32, %arg1 : i32, i32, i32
  }
}

</mosaic_0001>

<bundles_post_ra>
// kernel: tpu_custom_call.1
= control target key start
LH: loop header
LB: loop body
LE: loop exit
PB: predicated region body
PF: predicated region fallthrough
CT: control target
= control target key end

     0   :  { %s4773_s0 = inlined_call_operand.hbm [shape: f32[98], index: 0, kind: input, shape index: {}]   ;;  %s4774_s1 = inlined_call_operand.vmem [shape: s32[1,256], index: 1, kind: input, shape index: {}]   ;;  %s4775_s2 = inlined_call_operand.hbm [shape: f32[2,4,256], index: 2, kind: input, shape index: {}]   ;;  %s4776_s3 = inlined_call_operand.hbm [shape: f32[2,4,256], index: 3, kind: output, shape index: {}]  }
   0x1   :  { %4855 = sst [smem:[#allocation49_spill]] %s4773_s0 }
   0x2   :  { %4856 = sst [smem:[#allocation50_spill]] %s4775_s2 }
   0x3   :  { %8 = vsyncpa [#allocation5], 0 }
   0x4   :  { %9 = vsyncpa [#allocation3], 0 }
   0x5   :  { %11 = vsyncpa [#allocation3 + $0x1], 0 }
   0x6   :  { %12 = vsyncpa [#allocation4], 0 }
   0x7   :  { %14 = vsyncpa [#allocation4 + $0x1], 0  ;;  %s2811_s12 = smov 0   ;;  %s2813_s13 = smov 0  }
   0x8   :  { %s2815_s14 = smov 0   ;;  %s2817_s15 = smov 0  }
   0x9   :  { %s2819_s16 = smov 0   ;;  %s2821_s17 = smov 0  }
   0xa LB: > { %4857 = sst [smem:[#allocation11_spill]] %s2756_s13  ;;  %s2433_s18 = sadd.s32 4294967295, %s2772_s17   ;;  %s2772_s17 = sphi %s2821_s17, %s20_s17   ;;  %s2768_s16 = sphi %s2819_s16, %s5012_s16   ;;  %s2764_s15 = sphi %s2817_s15, %s5011_s15   ;;  %s2760_s14 = sphi %s2815_s14, %s5010_s14   ;;  %s2756_s13 = sphi %s2813_s13, %s5009_s13   ;;  %s2752_s12 = sphi %s2811_s12, %s5008_s12  }
   0xb   : > { %4858 = sst [smem:[#allocation12_spill]] %s2760_s14  ;;  %s2434_s19 = sadd.s32 4294967294, %s2772_s17  }
   0xc   : > { %4859 = sst [smem:[#allocation13_spill]] %s2768_s16  ;;  %p96_p0 = scmp.ne.s32.totalorder %s2756_s13, %s2752_s12 }
   0xd   : > { %4860 = sst [smem:[#allocation14_spill]] %s2772_s17  ;;  %p2845_p1 = scmp.eq.s32.totalorder %s2433_s18, 0 }
   0xe   : > { %p2849_p2 = scmp.eq.s32.totalorder %s2433_s18, 1  ;;  %p128_p3 = scmp.eq.s32.totalorder %s2434_s19, 1 }
   0xf   : > { %s4861_s20 = scalar_select %p2845_p1, 1, 0 }
  0x10   : > { %p2855_p4 = por %p2845_p1, %p96_p0  ;;  %p2435_p5 = scmp.ge.s32.totalorder %s2772_s17, 1 }
  0x11   : > { %p2860_p6 = por %p128_p3, %p96_p0  ;;  %p135_p7 = scmp.lt.s32.totalorder %s2772_s17, 3 }
  0x12   : > { %s4863_s22 = scalar_select %p2855_p4, 1, 0 }
  0x13   : > { %s4864_s23 = scalar_select %p2860_p6, 1, 0 }
  0x14   : > { %p2865_p8 = pnand %p2435_p5, %p135_p7  ;;  %s32_s25 = sadd.s32 1, %s2768_s16 }
  0x15   : > { %p2879_p12 = scmp.ge.s32.totalorder %s32_s25, 2  ;;  %s83_s28 = sadd.s32 1, %s2760_s14 }
  0x16   : > { %p2558_p10 = pneg %p2865_p8  ;;  %p90_p13 = scmp.ne.s32.totalorder %s2760_s14, %s2756_s13 }
  0x17   : > { %p91_p0 = scmp.eq.s32.totalorder %s2772_s17, 0  ;;  %s4868_s0 = sld [smem:[#allocation49_spill]] }
  0x18   : > { %p2875_p11 = pnand %p2558_p10, %p2845_p1 }
  0x1a   : > { %p2645_p5 = pneg %p2875_p11 }
  0x1d   : > { %s2643_s4 = scalar_lea.hbm %s4868_s0, 16 }
  0x1e   : > { %p2644_p3 = scmp.ne.s32.totalorder %s4868_s0, %s2643_s4  ;;  %p2650_p9 = scmp.lt.u32.totalorder %s2643_s4, %s4868_s0 }
  0x20   : > { %p2646_p7 = pnand %p2645_p5, %p2644_p3 }
  0x22   : > { %p2647_p10 = pneg %p2646_p7 }
  0x24   : > { %p2652_p6 = pnand %p2650_p9, %p2647_p10 }
  0x26   : > { %2655 = shalt.err (!%p2652_p6)
}
  0x27   : > { %s2774_s9 = smov [#allocation2]   ;;  %s5014_s25 = smov (%p2879_p12, %s32_s25), 0 }
  0x28   : > { %2561 = dma.hbm_to_smem (!%p2875_p11), %s4868_s0, 16, %s2774_s9, [#allocation5]  }
  0x29   : > { %4869 = sst [smem:[#allocation15_spill]] %s5014_s25  ;;  %p2910_p6 = por %p91_p0, %p90_p13 }
  0x2a   : > { %p2919_p9 = por %p2849_p2, %p90_p13  ;;  %s78_s26 = ssub.s32 %s2768_s16, %s5014_s25 }
  0x2b   : > { %p2571_p3 = scmp.lt.s32.totalorder %s2772_s17, 2  ;;  %p81_p5 = scmp.eq.s32.totalorder %s78_s26, 0 }
  0x2c   : > { %s4871_s19 = scalar_select %p2919_p9, 1, 0 }
  0x2d   : > { %s160_s29 = sand.u32 1, %s2760_s14   ;;  %s2548_s4 = sshll.u32 %s2768_s16, 7 }
  0x2e   : > { %s2438_s27 = sshll.u32 %s160_s29, 3  ;;  %s4873_s2 = sld [smem:[#allocation50_spill]] }
  0x2f   : > { %s2928_s30 = scalar_select %p81_p5, %s2760_s14, %s83_s28  }
  0x30   : > { %s164_s21 = scalar_lea.vmem [#allocation6], %s2438_s27  ;;  %p2940_p2 = pnand %p2571_p3, %p2910_p6 }
  0x31   : > { %4872 = sst [smem:[#allocation16_spill]] %s2928_s30  ;;  %s174_s8 = sshll.u32 %s164_s21, 4  ;;  %s2936_s8 = int_to_ptr.vmem [resolvable:$true] %s174_s8 }
  0x32   : > { %s161_s28 = scalar_lea.sflag [#allocation3], %s160_s29  ;;  %p2658_p12 = pneg %p2940_p2 }
  0x34   : > { %s2934_s7 = scalar_lea.hbm %s4873_s2, %s2548_s4  ;;  %s2661_s27 = scalar_lea.hbm %s4873_s2, 256 }
  0x35   : > { %s2656_s10 = scalar_lea.hbm %s2934_s7, 128  ;;  %p2662_p7 = scmp.lt.u32.totalorder %s2934_s7, %s4873_s2 }
  0x36   : > { %p2657_p11 = scmp.ne.s32.totalorder %s2934_s7, %s2656_s10  ;;  %p2663_p10 = scmp.lt.u32.totalorder %s2661_s27, %s2656_s10 }
  0x37   : > { %p2665_p3 = scmp.lt.u32.totalorder %s2656_s10, %s2934_s7 }
  0x38   : > { %p2659_p13 = pnand %p2658_p12, %p2657_p11  ;;  %p2664_p6 = por %p2663_p10, %p2662_p7 }
  0x3a   : > { %p2660_p0 = pneg %p2659_p13  ;;  %p2666_p5 = por %p2665_p3, %p2664_p6 }
  0x3c   : > { %p2667_p9 = pnand %p2666_p5, %p2660_p0 }
  0x3e   : > { %2670 = shalt.err (!%p2667_p9)
}
  0x3f   : > { %s2671_s29 = scalar_lea.vmem %s2936_s8, 128  ;;  %s2775_s5 = smov [#allocation6]  }
  0x40   : > { %p2672_p11 = scmp.ne.s32.totalorder %s2936_s8, %s2671_s29  ;;  %s2676_s6 = sshll.u32 %s2775_s5, 4  ;;  %s2677_s6 = int_to_ptr.vmem [resolvable:$false] %s2676_s6 }
  0x41   : > { %s2678_s21 = scalar_lea.vmem %s2677_s6, 256  ;;  %p2679_p1 = scmp.lt.s32.totalorder %s2936_s8, %s2677_s6 }
  0x42   : > { %p2674_p13 = pnand %p2672_p11, %p2658_p12  ;;  %p2680_p7 = scmp.lt.s32.totalorder %s2678_s21, %s2671_s29 }
  0x44   : > { %p2675_p4 = pneg %p2674_p13  ;;  %p2681_p10 = por %p2680_p7, %p2679_p1 }
  0x46   : > { %p2682_p6 = pnand %p2681_p10, %p2675_p4 }
  0x48   : > { %2685 = shalt.err (!%p2682_p6)
}
  0x49   : > { %2565 = dma.hbm_to_vmem [thread:$0]  (!%p2940_p2), %s2934_s7, 128, %s2936_s8, %s161_s28  }
  0x4a   : > { %183 = sbr.rel (%p2865_p8) target bundleno = 776 (0x308), region = 32 }
  0x51   : > { %p4875_p9 = scmp.ne.s32.totalorder %s4861_s20, 0 }
  0x53   : > { %2739 = dma.done.wait (%p4875_p9), [#allocation5], 16  }
  0x54   : > { %2741 = vsyncadd (%p4875_p9), [#allocation5], 4294967280  ;;  %s2976_s10 = sand.u32 1, %s2756_s13   ;;  %p4876_p1 = scmp.ne.s32.totalorder %s4863_s22, 0 }
  0x55   : > { %s4781_s9 = sshll.u32 %s2976_s10, 3  ;;  %s190_s11 = scalar_lea.sflag [#allocation3], %s2976_s10 }
  0x56   : > { %s2982_s7 = scalar_lea.vmem [#allocation6], %s4781_s9 }
  0x57   : > { %2743 = dma.done.wait (%p4876_p1), %s190_s11, 128  }
  0x58   : > { %2745 = vsyncadd (%p4876_p1), %s190_s11, 4294967168 }
  0x59   : > { %198 = sfence }
  0x5a   : > { %v219_v0 = vld [vmem:[%s2982_s7] sm:$0xff]  ;;  %vm223_vm0 = vcmask 1043456   ;;  %vm256_vm1 = vcmask 1040384   ;;  %s2776_s20 = smov 51   ;;  %s2446_s22 = sld [smem:[#allocation2 + $0x7]]  ;;  %vm265_vm2 = vcmask 416768  }
  0x5b   : > { %v224_v1 = vsel %vm223_vm0, %v219_v0, 0.0  ;;  %v240_v2 = vsel %vm223_vm0, %v219_v0, -inf  ;;  %v221_v3 = vcombine.high %v219_v0, %v219_v0  ;;  %s2447_s24 = sld [smem:[#allocation2 + $0x38]]  ;;  %s2451_s8 = sld [smem:[#allocation2 + $0x46]]  ;;  %vm272_vm3 = vcmask 809984  }
  0x5c   : > { %v225_v4 = vrot.slane %v224_v1, 4  ;;  %v241_v5 = vrot.slane %v240_v2, 4  ;;  %s2449_s28 = sld [smem:[#allocation2 + $0x3f]]  ;;  %s2455_s26 = sld [smem:[#allocation2 + $0x54]]  ;;  %vm322_vm4 = vcmask 916480   ;;  %vm360_vm5 = vcmask 785408  }
  0x5d   : > { %v231_v6 = vsel %vm223_vm0, %v221_v3, 0.0  ;;  %v247_v7 = vsel %vm223_vm0, %v221_v3, -inf  ;;  %s2450_s27 = sld [smem:[#allocation2 + $0x15]]  ;;  %s2448_s18 = sld [smem:[#allocation2 + $0xe]]  ;;  %vm398_vm6 = vcmask 654336   ;;  %vm436_vm7 = vcmask 523264  }
  0x5e   : > { %v226_v8 = vadd.f32 %v225_v4, %v224_v1  ;;  %v242_v9 = vmax.f32 %v240_v2, %v241_v5  ;;  %v232_v10 = vrot.slane %v231_v6, 4  ;;  %v248_v11 = vrot.slane %v247_v7, 4  ;;  %s2454_s4 = sld [smem:[#allocation2 + $0x23]]  ;;  %s2453_s29 = sld [smem:[#allocation2 + $0x4d]] }
  0x5f   : > { %s2452_s5 = sld [smem:[#allocation2 + $0x1c]]  ;;  %s2461_s6 = sld [smem:[#allocation2 + $0x39]]  ;;  %vm474_vm8 = vcmask 392192   ;;  %vm512_vm9 = vcmask 261120   ;;  %vm831_vm11 = vcmask 1039360   ;;  %vm1124_vm14 = vcmask 1031168  }
  0x60   : > { %v227_v12 = vrot.slane %v226_v8, 2  ;;  %v243_v13 = vrot.slane %v242_v9, 2  ;;  %v233_v14 = vadd.f32 %v232_v10, %v231_v6  ;;  %v249_v15 = vmax.f32 %v247_v7, %v248_v11  ;;  %s2989_s21 = sld [smem:[#allocation2 + $0x8]]  ;;  %s2991_s11 = sld [smem:[#allocation2 + $0x2a]] }
  0x61   : > { %s2993_s9 = sld [smem:[#allocation2 + $0x5b]]  ;;  %s2995_s0 = sld [smem:[#allocation2 + $0x16]]  ;;  %v2999_v34 = vstv %s2447_s24  ;;  %v3001_v35 = vstv %s2451_s8  ;;  %v3017_v40 = vstv %s2446_s22  ;;  %vm2293_vm0 = vcmask 1022976  }
  0x62   : > { %v228_v16 = vadd.f32 %v227_v12, %v226_v8  ;;  %v244_v17 = vmax.f32 %v242_v9, %v243_v13  ;;  %v234_v18 = vrot.slane %v233_v14, 2  ;;  %v250_v19 = vrot.slane %v249_v15, 2  ;;  %s3003_s2 = sld [smem:[#allocation2 + $0xf]]  ;;  %s3011_s25 = sld [smem:[#allocation2 + $0x40]] }
  0x63   : > { %v3007_v37 = vstv %s2449_s28  ;;  %v3009_v38 = vstv %s2455_s26  ;;  %v3019_v41 = vstv %s2450_s27  ;;  %v3021_v42 = vstv %s2448_s18  ;;  %s3023_s24 = sld [smem:[#allocation2 + $0x24]]  ;;  %s3025_s8 = sld [smem:[#allocation2 + $0x55]] }
  0x64   : > { %v229_v20 = vrot.slane %v228_v16, 1  ;;  %v245_v21 = vrot.slane %v244_v17, 1  ;;  %v235_v22 = vadd.f32 %v234_v18, %v233_v14  ;;  %v251_v23 = vmax.f32 %v249_v15, %v250_v19  ;;  %s3035_s22 = sld [smem:[#allocation2 + $0x1d]]  ;;  %s3037_s28 = sld [smem:[#allocation2 + $0x4e]] }
  0x65   : > { %v3031_v45 = vstv %s2454_s4  ;;  %v3033_v46 = vstv %s2453_s29  ;;  %v3043_v49 = vstv %s2452_s5  ;;  %v3045_v50 = vstv %s2461_s6  ;;  %s3047_s26 = sld [smem:[#allocation2 + $0x10]]  ;;  %s3049_s27 = sld [smem:[#allocation2 + $0x41]] }
  0x66   : > { %v230_v24 = vadd.f32 %v229_v20, %v228_v16  ;;  %v246_v25 = vmax.f32 %v244_v17, %v245_v21  ;;  %v236_v26 = vrot.slane %v235_v22, 1  ;;  %v252_v27 = vrot.slane %v251_v23, 1  ;;  %s3055_s18 = sld [smem:[#allocation2 + $0x2b]]  ;;  %s3065_s4 = sld [smem:[#allocation2 + $0x5c]] }
  0x67   : > { %v3060_v57 = vstv %s2989_s21  ;;  %v3063_v58 = vstv %s2991_s11  ;;  %s3067_s29 = sld [smem:[#allocation2 + $0xb]]  ;;  %v3070_v62 = vstv %s2993_s9  ;;  %s3072_s5 = sld [smem:[#allocation2 + $0x3c]]  ;;  %v3081_v1 = vstv %s2995_s0 }
  0x68   : > { %v254_v28 = vmul.f32 0.25, %v230_v24  ;;  %v237_v29 = vadd.f32 %v236_v26, %v235_v22  ;;  %v253_v30 = vmax.f32 %v251_v23, %v252_v27  ;;  %s3074_s6 = sld [smem:[#allocation2 + $0x9]]  ;;  %s3086_s21 = sld [smem:[#allocation2 + $0x3a]]  ;;  %v3095_v4 = vstv %s3003_s2 }
  0x69   : > { %s3088_s9 = sld [smem:[#allocation2 + $0xa]]  ;;  %s4786_s11 = smov 112   ;;  %v3098_v5 = vstv %s3011_s25  ;;  %v3105_v8 = vstv %s3023_s24  ;;  %v3108_v9 = vstv %s3025_s8 }
  0x6a   : > { %v257_v31 = vsel %vm256_vm1, %v254_v28, %v246_v25  ;;  %v255_v32 = vmul.f32 0.25, %v237_v29  ;;  %s4784_s16 = smov 80   ;;  %s3100_s0 = sld [smem:[#allocation2 + $0x3b]]  ;;  %v3123_v15 = vstv %s3035_s22  ;;  %v3126_v16 = vstv %s3037_s28 }
  0x6b   : > { %261 = vrot.lane.b32.xlu0 %v257_v31, %s2776_s20  ;;  %s3118_s2 = sld [smem:[#allocation2 + $0x43]]  ;;  %v3129_v17 = vstv %s3047_s26  ;;  %s3133_s24 = sld [smem:[#allocation2 + $0x44]]  ;;  %v3140_v19 = vstv %s3049_s27 }
  0x6c   : > { %v258_v33 = vsel %vm256_vm1, %v255_v32, %v253_v30  ;;  %4878 = vst [vmem:[#allocation18_spill] sm:$0xff] %v3129_v17  ;;  %s3131_s25 = sld [smem:[#allocation2 + $0x13]]  ;;  %s4790_s8 = smov 96   ;;  %v3143_v20 = vstv %s3055_s18  ;;  %v3152_v23 = vstv %s3065_s4 }
  0x6d   : > { %s4788_s30 = smov 48   ;;  %s3145_s22 = sld [smem:[#allocation2 + $0xd]]  ;;  %v3155_v24 = vstv %s3067_s29  ;;  %v3166_v29 = vstv %s3072_s5 }
  0x6e   : > { %s3147_s28 = sld [smem:[#allocation2 + $0x3e]]  ;;  %4879 = vst [vmem:[#allocation19_spill] sm:$0xff] %v3155_v24  ;;  %s3157_s26 = sld [smem:[#allocation2 + $0x11]]  ;;  %4880 = vst [vmem:[#allocation20_spill] sm:$0xff] %v3166_v29  ;;  %v3169_v30 = vstv %s3074_s6  ;;  %v3172_v31 = vstv %s3086_s21 }
  0x6f   : > { %263 = vrot.lane.b32.xlu0 %v258_v33, %s2776_s20  ;;  %s2997_s20 = sld [smem:[#allocation2 + $0x47]]  ;;  %s3159_s27 = sld [smem:[#allocation2 + $0x42]]  ;;  %v3175_v32 = vstv %s3088_s9 }
  0x70   : > { %s3163_s18 = sld [smem:[#allocation2 + $0x17]]  ;;  %s3177_s4 = sld [smem:[#allocation2 + $0x48]] }
  0x71   : > { %s3179_s29 = sld [smem:[#allocation2 + $0x19]]  ;;  %s3201_s5 = sld [smem:[#allocation2 + $0x4a]] }
  0x72   : > { %s3203_s6 = sld [smem:[#allocation2 + $0x1a]]  ;;  %s4826_s21 = smov 32  }
  0x73   : > { %s4888_s9 = smov 80   ;;  %s3811_s14 = sld [smem:[#allocation2 + $0x35]] }
  0x74   : > { %s3827_s13 = sld [smem:[#allocation2 + $0x36]]  ;;  %s4933_s17 = smov 64  }
  0x75   : > { %v3084_v2 = vstv %s2997_s20  ;;  %s3102_s20 = sld [smem:[#allocation2 + $0xc]]  ;;  %p5004_p8 = scmp.ne.s32.totalorder %s4871_s19, 0 }
  0xdd   : > { %v3005_v36 = vpop.permute.xlu0 %261 }
  0xde   : > { %v3015_v39 = vsel %vm265_vm2, 0.0, %v3005_v36 }
  0xdf   : > { %4877 = vst [vmem:[#allocation17_spill] sm:$0xff] %v3015_v39  ;;  %v298_v43 = vmul.f32 %v2999_v34, %v3015_v39  ;;  %v374_v44 = vmul.f32 %v3001_v35, %v3015_v39  ;;  %v336_v47 = vmul.f32 %v3007_v37, %v3015_v39  ;;  %v450_v48 = vmul.f32 %v3009_v38, %v3015_v39 }
  0xe0   : > { %v294_v51 = vmul.f32 %v3017_v40, %v3015_v39  ;;  %v370_v53 = vmul.f32 %v3019_v41, %v3015_v39  ;;  %v412_v56 = vmul.f32 %v3033_v46, %v3015_v39  ;;  %v332_v63 = vmul.f32 %v3021_v42, %v3015_v39 }
  0xe1   : > { %v304_v52 = vrot.slane %v298_v43, 1  ;;  %v380_v54 = vrot.slane %v374_v44, 1  ;;  %v342_v55 = vrot.slane %v336_v47, 1  ;;  %v456_v61 = vrot.slane %v450_v48, 1 }
  0xe2   : > { %v571_v0 = vmul.f32 %v3045_v50, %v3015_v39  ;;  %v446_v3 = vmul.f32 %v3031_v45, %v3015_v39  ;;  %v418_v7 = vrot.slane %v412_v56, 1  ;;  %v488_v12 = vmul.f32 %v3070_v62, %v3015_v39 }
  0xe3   : > { %v310_v59 = vadd.f32 %v304_v52, %v294_v51  ;;  %v386_v60 = vadd.f32 %v380_v54, %v370_v53  ;;  %v348_v6 = vadd.f32 %v342_v55, %v332_v63  ;;  %v649_v13 = vmul.f32 %v3084_v2, %v3015_v39 }
  0xe4   : > { %v462_v10 = vadd.f32 %v456_v61, %v446_v3  ;;  %v577_v11 = vrot.slane %v571_v0, 1  ;;  %v408_v14 = vmul.f32 %v3043_v49, %v3015_v39  ;;  %v567_v18 = vmul.f32 %v3060_v57, %v3015_v39 }
  0xe5   : > { %316 = vrot.lane.b32.xlu1 %v310_v59, %s4786_s11  ;;  %392 = vrot.lane.b32.xlu0 %v386_v60, %s4784_s16  ;;  %s3110_s16 = sld [smem:[#allocation2 + $0x3d]]  ;;  %s3112_s11 = sld [smem:[#allocation2 + $0x12]]  ;;  %v610_v22 = vmul.f32 %v3098_v5, %v3015_v39  ;;  %v494_v26 = vrot.slane %v488_v12, 1  ;;  %v655_v27 = vrot.slane %v649_v13, 1  ;;  %v727_v28 = vmul.f32 %v3108_v9, %v3015_v39 }
  0xe6   : > { %v424_v21 = vadd.f32 %v418_v7, %v408_v14  ;;  %v583_v25 = vadd.f32 %v577_v11, %v567_v18  ;;  %v484_v33 = vmul.f32 %v3063_v58, %v3015_v39  ;;  %v645_v43 = vmul.f32 %v3081_v1, %v3015_v39 }
  0xe7   : > { %v3188_v44 = vstv %s3100_s0  ;;  %v3191_v47 = vstv %s3102_s20  ;;  %v616_v48 = vrot.slane %v610_v22, 1  ;;  %v688_v51 = vmul.f32 %v3126_v16, %v3015_v39  ;;  %s4895_s0 = smov 48   ;;  %s2533_s20 = sld [smem:[#allocation2 + $0x45]] }
  0xe8   : > { %4882 = vst [vmem:[#allocation21_spill] sm:$0xff] %v3188_v44  ;;  %4883 = vst [vmem:[#allocation22_spill] sm:$0xff] %v3191_v47  ;;  %v500_v54 = vadd.f32 %v494_v26, %v484_v33  ;;  %v661_v55 = vadd.f32 %v655_v27, %v645_v43  ;;  %v733_v56 = vrot.slane %v727_v28, 1  ;;  %v903_v59 = vmul.f32 %v3140_v19, %v3015_v39 }
  0xe9   : > { %354 = vrot.lane.b32.xlu1 %v348_v6, %s4790_s8  ;;  %468 = vrot.lane.b32.xlu0 %v462_v10, %s4788_s30  ;;  %s4828_s30 = smov 64   ;;  %s4881_s8 = smov 112   ;;  %v606_v60 = vmul.f32 %v3095_v4, %v3015_v39  ;;  %v3210_v61 = vstv %s3118_s2  ;;  %v3213_v63 = vstv %s3131_s25  ;;  %v723_v3 = vmul.f32 %v3105_v8, %v3015_v39 }
  0xea   : > { %4885 = vst [vmem:[#allocation24_spill] sm:$0xff] %v3210_v61  ;;  %4886 = vst [vmem:[#allocation25_spill] sm:$0xff] %v3213_v63  ;;  %v3216_v0 = vstv %s3133_s24  ;;  %v3225_v6 = vstv %s3145_s22  ;;  %v3228_v7 = vstv %s3147_s28  ;;  %v694_v11 = vrot.slane %v688_v51, 1  ;;  %s2493_s2 = sld [smem:[#allocation2 + $0x49]]  ;;  %s2532_s25 = sld [smem:[#allocation2 + $0x14]] }
  0xeb   : > { %v3196_v52 = vstv %s3110_s16  ;;  %v3199_v53 = vstv %s3112_s11  ;;  %4887 = vst [vmem:[#allocation26_spill] sm:$0xff] %v3216_v0  ;;  %s3218_s16 = sld [smem:[#allocation2 + $0x4b]]  ;;  %4889 = vst [vmem:[#allocation27_spill] sm:$0xff] %v3228_v7  ;;  %v622_v10 = vadd.f32 %v616_v48, %v606_v60  ;;  %v3231_v12 = vstv %s3157_s26  ;;  %s4894_s11 = smov 96  }
  0xec   : > { %4884 = vst [vmem:[#allocation23_spill] sm:$0xff] %v3196_v52  ;;  %4890 = vst [vmem:[#allocation28_spill] sm:$0xff] %v3231_v12  ;;  %v3234_v13 = vstv %s3159_s27  ;;  %v739_v14 = vadd.f32 %v733_v56, %v723_v3  ;;  %v909_v18 = vrot.slane %v903_v59, 1  ;;  %v1413_v22 = vmul.f32 %v3166_v29, %v3015_v39  ;;  %s2492_s24 = sld [smem:[#allocation2 + $0x18]]  ;;  %s2481_s22 = sld [smem:[#allocation2 + $0x4f]] }
  0xed   : > { %430 = vrot.lane.b32.xlu1 %v424_v21, %s4828_s30  ;;  %589 = vrot.lane.b32.xlu0 %v583_v25, %s4881_s8  ;;  %4891 = vst [vmem:[#allocation29_spill] sm:$0xff] %v3234_v13  ;;  %v766_v21 = vmul.f32 %v3152_v23, %v3015_v39  ;;  %v264_v25 = vpop.permute.xlu0 %263  ;;  %v684_v26 = vmul.f32 %v3123_v15, %v3015_v39  ;;  %v3243_v27 = vstv %s3163_s18  ;;  %v3246_v28 = vstv %s3177_s4  ;;  %s3720_s28 = sld [smem:[#allocation2 + $0x1e]]  ;;  %s3729_s26 = sld [smem:[#allocation2 + $0x20]] }
  0xee   : > { %4892 = vst [vmem:[#allocation30_spill] sm:$0xff] %v3246_v28  ;;  %v3249_v33 = vstv %s3179_s29  ;;  %v271_v43 = vsel %vm265_vm2, %v264_v25, 0.0  ;;  %v899_v48 = vmul.f32 %v3129_v17, %v3015_v39  ;;  %v864_v51 = vmul.f32 %v3172_v31, %v3015_v39  ;;  %s3731_s27 = sld [smem:[#allocation2]]  ;;  %s3737_s18 = sld [smem:[#allocation2 + $0x31]] }
  0xef   : > { %4893 = vst [vmem:[#allocation31_spill] sm:$0xff] %v3249_v33  ;;  %v1706_v56 = vmul.f32 %v3196_v52, %v3015_v39  ;;  %v3263_v59 = vstv %s3201_s5  ;;  %v3266_v60 = vstv %s3203_s6  ;;  %v1452_v17 = vmul.f32 %v3210_v61, %v3015_v39  ;;  %s3739_s4 = sld [smem:[#allocation2 + $0x21]]  ;;  %s3746_s29 = sld [smem:[#allocation2 + $0x52]] }
  0xf0   : > { %4896 = vst [vmem:[#allocation32_spill] sm:$0xff] %v3263_v59  ;;  %v915_v3 = vadd.f32 %v909_v18, %v899_v48  ;;  %v3272_v29 = vsel %vm265_vm2, %v3005_v36, %v264_v25  ;;  %v1409_v18 = vmul.f32 %v3155_v24, %v3015_v39  ;;  %v1745_v36 = vmul.f32 %v3216_v0, %v3015_v39  ;;  %s3748_s5 = sld [smem:[#allocation2 + $0x1b]]  ;;  %s3752_s6 = sld [smem:[#allocation2 + $0x4c]] }
  0xf1   : > { %506 = vrot.lane.b32.xlu1 %v500_v54, %s4826_s21  ;;  %667 = vrot.lane.b32.xlu0 %v661_v55, %s4888_s9  ;;  %v1157_v54 = vmul.f32 %v3188_v44, %v3015_v39  ;;  %v700_v55 = vadd.f32 %v694_v11, %v684_v26  ;;  %v3275_v44 = vsel %vm272_vm3, %v271_v43, 0.0  ;;  %v762_v11 = vmul.f32 %v3143_v20, %v3015_v39 }
  0xf2   : > { %v3280_v26 = vstv %s3218_s16  ;;  %v860_v25 = vmul.f32 %v3169_v30, %v3015_v39  ;;  %v1153_v43 = vmul.f32 %v3175_v32, %v3015_v39  ;;  %v1712_v48 = vrot.slane %v1706_v56, 1  ;;  %s3754_s16 = sld [smem:[#allocation2 + $0x1]] }
  0xf3   : > { %4897 = vst [vmem:[#allocation33_spill] sm:$0xff] %v3280_v26  ;;  %v1458_v61 = vrot.slane %v1452_v17, 1  ;;  %v1448_v0 = vmul.f32 %v3199_v53, %v3015_v39  ;;  %v1741_v24 = vmul.f32 %v3213_v63, %v3015_v39  ;;  %v942_v56 = vmul.f32 %v3246_v28, %v3015_v39 }
  0xf4   : > { %v1784_v63 = vmul.f32 %v3280_v26, %v3015_v39  ;;  %vm1966_vm2 = vcmask 1006592  }
  0xf5   : > { %628 = vrot.lane.b32.xlu1 %v622_v10, %s4894_s11  ;;  %745 = vrot.lane.b32.xlu0 %v739_v14, %s4895_s0  ;;  %v772_v10 = vrot.slane %v766_v21, 1  ;;  %v1419_v14 = vrot.slane %v1413_v22, 1  ;;  %v870_v21 = vrot.slane %v864_v51, 1  ;;  %v1163_v22 = vrot.slane %v1157_v54, 1 }
  0xf6   : > { %v1196_v51 = vmul.f32 %v3234_v13, %v3015_v39  ;;  %v1702_v54 = vmul.f32 %v3191_v47, %v3015_v39  ;;  %v1995_v13 = vmul.f32 %v3225_v6, %v3015_v39  ;;  %v1464_v47 = vadd.f32 %v1458_v61, %v1448_v0 }
  0xf7   : > { %v778_v52 = vadd.f32 %v772_v10, %v762_v11  ;;  %v876_v17 = vadd.f32 %v870_v21, %v860_v25  ;;  %v1169_v10 = vadd.f32 %v1163_v22, %v1153_v43  ;;  %v1491_v11 = vmul.f32 %v3263_v59, %v3015_v39 }
  0xf8   : > { %v1202_v28 = vrot.slane %v1196_v51, 1  ;;  %v938_v21 = vmul.f32 %v3243_v27, %v3015_v39  ;;  %v948_v22 = vrot.slane %v942_v56, 1  ;;  %v337_v25 = vmul.f32 %v3007_v37, %v3272_v29 }
  0xf9   : > { %706 = vrot.lane.b32.xlu1 %v700_v55, %s4828_s30  ;;  %921 = vrot.lane.b32.xlu0 %v915_v3, %s4894_s11  ;;  %v1999_v55 = vmul.f32 %v3228_v7, %v3015_v39  ;;  %v1425_v3 = vadd.f32 %v1419_v14, %v1409_v18  ;;  %v1751_v14 = vrot.slane %v1745_v36, 1  ;;  %v1718_v18 = vadd.f32 %v1712_v48, %v1702_v54 }
  0xfa   : > { %v1487_v36 = vmul.f32 %v3249_v33, %v3015_v39  ;;  %v299_v43 = vmul.f32 %v2999_v34, %v3272_v29  ;;  %v1497_v0 = vrot.slane %v1491_v11, 1  ;;  %v1780_v48 = vmul.f32 %v3266_v60, %v3015_v39 }
  0xfb   : > { %v2005_v7 = vrot.slane %v1999_v55, 1  ;;  %v1757_v61 = vadd.f32 %v1751_v14, %v1741_v24  ;;  %v413_v55 = vmul.f32 %v3033_v46, %v3272_v29  ;;  %v1790_v51 = vrot.slane %v1784_v63, 1 }
  0xfc   : > { %v333_v54 = vmul.f32 %v3021_v42, %v3272_v29  ;;  %v375_v56 = vmul.f32 %v3001_v35, %v3272_v29  ;;  %v489_v24 = vmul.f32 %v3070_v62, %v3272_v29  ;;  %v954_v14 = vadd.f32 %v948_v22, %v938_v21 }
  0xfd   : > { %784 = vrot.lane.b32.xlu1 %v778_v52, %s4826_s21  ;;  %1431 = vrot.lane.b32.xlu0 %v1425_v3, %s4881_s8  ;;  %v1192_v52 = vmul.f32 %v3231_v12, %v3015_v39  ;;  %v2011_v3 = vadd.f32 %v2005_v7, %v1995_v13  ;;  %v343_v11 = vrot.slane %v337_v25, 1  ;;  %v305_v7 = vrot.slane %v299_v43, 1 }
  0xfe   : > { %v611_v63 = vmul.f32 %v3098_v5, %v3272_v29  ;;  %v1503_v13 = vadd.f32 %v1497_v0, %v1487_v36  ;;  %v572_v39 = vmul.f32 %v3045_v50, %v3272_v29  ;;  %v1796_v33 = vadd.f32 %v1790_v51, %v1780_v48 }
  0xff   : > { %v1208_v59 = vadd.f32 %v1202_v28, %v1192_v52  ;;  %v409_v28 = vmul.f32 %v3043_v49, %v3272_v29  ;;  %v419_v52 = vrot.slane %v413_v55, 1  ;;  %v371_v21 = vmul.f32 %v3019_v41, %v3272_v29 }
 0x100   : > { %v381_v22 = vrot.slane %v375_v56, 1  ;;  %v689_v25 = vmul.f32 %v3126_v16, %v3272_v29  ;;  %v650_v43 = vmul.f32 %v3084_v2, %v3272_v29  ;;  %v349_v0 = vadd.f32 %v343_v11, %v333_v54 }
 0x101   : > { %882 = vrot.lane.b32.xlu1 %v876_v17, %s4881_s8  ;;  %1175 = vrot.lane.b32.xlu0 %v1169_v10, %s4881_s8  ;;  %v295_v17 = vmul.f32 %v3017_v40, %v3272_v29  ;;  %v451_v10 = vmul.f32 %v3009_v38, %v3272_v29  ;;  %v447_v48 = vmul.f32 %v3031_v45, %v3272_v29  ;;  %v617_v51 = vrot.slane %v611_v63, 1 }
 0x102   : > { %v3358_v56 = vadd.f32 %v419_v52, %v409_v28  ;;  %v607_v12 = vmul.f32 %v3095_v4, %v3272_v29  ;;  %v3364_v26 = vadd.f32 %v381_v22, %v371_v21  ;;  %v685_v54 = vmul.f32 %v3123_v15, %v3272_v29 }
 0x103   : > { %v457_v36 = vrot.slane %v451_v10, 1  ;;  %v311_v55 = vadd.f32 %v305_v7, %v295_v17  ;;  %v578_v10 = vrot.slane %v572_v39, 1  ;;  %v695_v17 = vrot.slane %v689_v25, 1 }
 0x104   : > { %v646_v7 = vmul.f32 %v3081_v1, %v3272_v29  ;;  %v656_v63 = vrot.slane %v650_v43, 1  ;;  %v3376_v28 = vadd.f32 %v617_v51, %v607_v12  ;;  %v763_v39 = vmul.f32 %v3143_v20, %v3272_v29 }
 0x105   : > { %1724 = vrot.lane.b32.xlu1 %v1718_v18, %s4881_s8  ;;  %1470 = vrot.lane.b32.xlu0 %v1464_v47, %s4894_s11  ;;  %v485_v18 = vmul.f32 %v3063_v58, %v3272_v29  ;;  %v495_v47 = vrot.slane %v489_v24, 1  ;;  %v568_v24 = vmul.f32 %v3060_v57, %v3272_v29  ;;  %v3382_v52 = vmul.f32 %v3105_v8, %v3272_v29 }
 0x106   : > { %v3386_v21 = vmul.f32 %v3108_v9, %v3272_v29  ;;  %v296_v12 = vmul.f32 %v3017_v40, %v3275_v44  ;;  %v300_v25 = vmul.f32 %v2999_v34, %v3275_v44  ;;  %v372_v40 = vmul.f32 %v3019_v41, %v3275_v44 }
 0x107   : > { %v3370_v11 = vadd.f32 %v495_v47, %v485_v18  ;;  %v3390_v22 = vadd.f32 %v578_v10, %v568_v24  ;;  %v3396_v18 = vadd.f32 %v695_v17, %v685_v54  ;;  %v376_v34 = vmul.f32 %v3001_v35, %v3275_v44 }
 0x108   : > { %v306_v43 = vrot.slane %v300_v25, 1  ;;  %v3415_v51 = vmul.f32 %v3140_v19, %v3272_v29  ;;  %v334_v24 = vmul.f32 %v3021_v42, %v3275_v44  ;;  %v338_v10 = vmul.f32 %v3007_v37, %v3275_v44 }
 0x109   : > { %1763 = vrot.lane.b32.xlu1 %v1757_v61, %s4894_s11  ;;  %2017 = vrot.lane.b32.xlu0 %v2011_v3, %s4881_s8  ;;  %v767_v61 = vmul.f32 %v3152_v23, %v3272_v29  ;;  %v3372_v3 = vadd.f32 %v457_v36, %v447_v48  ;;  %v3400_v36 = vmul.f32 %v3169_v30, %v3272_v29  ;;  %v382_v54 = vrot.slane %v376_v34, 1 }
 0x10a   : > { %v3423_v41 = vadd.f32 %v306_v43, %v296_v12  ;;  %v448_v35 = vmul.f32 %v3031_v45, %v3275_v44  ;;  %v452_v17 = vmul.f32 %v3009_v38, %v3275_v44  ;;  %v410_v42 = vmul.f32 %v3043_v49, %v3275_v44 }
 0x10b   : > { %v773_v47 = vrot.slane %v767_v61, 1  ;;  %v414_v37 = vmul.f32 %v3033_v46, %v3275_v44  ;;  %v573_v45 = vmul.f32 %v3045_v50, %v3275_v44  ;;  %v490_v49 = vmul.f32 %v3070_v62, %v3275_v44 }
 0x10c   : > { %v651_v50 = vmul.f32 %v3084_v2, %v3275_v44  ;;  %v612_v62 = vmul.f32 %v3098_v5, %v3275_v44 }
 0x10d   : > { %1214 = vrot.lane.b32.xlu1 %v1208_v59, %s4894_s11  ;;  %960 = vrot.lane.b32.xlu0 %v954_v14, %s4888_s9  ;;  %v3404_v59 = vmul.f32 %v3172_v31, %v3272_v29  ;;  %v3406_v14 = vadd.f32 %v656_v63, %v646_v7  ;;  %v3429_v61 = vadd.f32 %v773_v47, %v763_v39  ;;  %v344_v7 = vrot.slane %v338_v10, 1 }
 0x10e   : > { %v569_v63 = vmul.f32 %v3060_v57, %v3275_v44  ;;  %v420_v38 = vrot.slane %v414_v37, 1  ;;  %v486_v39 = vmul.f32 %v3063_v58, %v3275_v44  ;;  %v579_v25 = vrot.slane %v573_v45, 1  ;;  %v4900_v37 = vld [vmem:[#allocation21_spill] sm:$0xff] }
 0x10f   : > { %v3441_v12 = vadd.f32 %v344_v7, %v334_v24  ;;  %v647_v57 = vmul.f32 %v3081_v1, %v3275_v44  ;;  %v496_v43 = vrot.slane %v490_v49, 1  ;;  %v608_v58 = vmul.f32 %v3095_v4, %v3275_v44 }
 0x110   : > { %v3455_v47 = vadd.f32 %v420_v38, %v410_v42  ;;  %v729_v1 = vmul.f32 %v3108_v9, %v3275_v44  ;;  %v618_v2 = vrot.slane %v612_v62, 1  ;;  %v686_v24 = vmul.f32 %v3123_v15, %v3275_v44  ;;  %v4898_v9 = vld [vmem:[#allocation19_spill] sm:$0xff] }
 0x111   : > { %1509 = vrot.lane.b32.xlu1 %v1503_v13, %s4888_s9  ;;  %1802 = vrot.lane.b32.xlu0 %v1796_v33, %s4888_s9  ;;  %v3435_v13 = vadd.f32 %v382_v54, %v372_v40  ;;  %v458_v33 = vrot.slane %v452_v17, 1  ;;  %v725_v40 = vmul.f32 %v3105_v8, %v3275_v44  ;;  %v3467_v34 = vadd.f32 %v496_v43, %v486_v39  ;;  %v4899_v54 = vld [vmem:[#allocation20_spill] sm:$0xff] }
 0x112   : > { %v690_v4 = vmul.f32 %v3126_v16, %v3275_v44  ;;  %v735_v8 = vrot.slane %v729_v1, 1  ;;  %v1411_v10 = vmul.f32 %v4898_v9, %v3275_v44  ;;  %v3483_v17 = vadd.f32 %v618_v2, %v608_v58 }
 0x113   : > { %v3449_v46 = vadd.f32 %v458_v33, %v448_v35  ;;  %v1415_v35 = vmul.f32 %v4899_v54, %v3275_v44  ;;  %v764_v16 = vmul.f32 %v3143_v20, %v3275_v44  ;;  %v1155_v42 = vmul.f32 %v3175_v32, %v3275_v44 }
 0x114   : > { %v696_v15 = vrot.slane %v690_v4, 1  ;;  %v3489_v7 = vadd.f32 %v735_v8, %v725_v40  ;;  %v1159_v33 = vmul.f32 %v4900_v37, %v3275_v44  ;;  %v862_v38 = vmul.f32 %v3169_v30, %v3275_v44  ;;  %v4904_v40 = vld [vmem:[#allocation27_spill] sm:$0xff]  ;;  %v4905_v4 = vld [vmem:[#allocation18_spill] sm:$0xff] }
 0x115   : > { %356 = vrot.lane.b32.xlu0 %v349_v0, %s4894_s11  ;;  %318 = vrot.lane.b32.xlu1 %v311_v55, %s4881_s8  ;;  %v3461_v0 = vadd.f32 %v579_v25, %v569_v63  ;;  %v657_v55 = vrot.slane %v651_v50, 1  ;;  %v866_v20 = vmul.f32 %v3172_v31, %v3275_v44  ;;  %v1450_v49 = vmul.f32 %v3199_v53, %v3275_v44  ;;  %v4901_v25 = vld [vmem:[#allocation24_spill] sm:$0xff]  ;;  %v4902_v31 = vld [vmem:[#allocation22_spill] sm:$0xff] }
 0x116   : > { %v3495_v63 = vadd.f32 %v696_v15, %v686_v24  ;;  %v1165_v39 = vrot.slane %v1159_v33, 1  ;;  %v1704_v43 = vmul.f32 %v4902_v31, %v3275_v44  ;;  %v2001_v1 = vmul.f32 %v4904_v40, %v3275_v44 }
 0x117   : > { %v3477_v5 = vadd.f32 %v657_v55, %v647_v57  ;;  %v1454_v57 = vmul.f32 %v4901_v25, %v3275_v44  ;;  %v872_v30 = vrot.slane %v866_v20, 1  ;;  %v1997_v55 = vmul.f32 %v3225_v6, %v3275_v44 }
 0x118   : > { %v3517_v62 = vadd.f32 %v1165_v39, %v1155_v42  ;;  %v901_v8 = vmul.f32 %v4905_v4, %v3275_v44  ;;  %v2007_v15 = vrot.slane %v2001_v1, 1  ;;  %v1782_v39 = vmul.f32 %v3266_v60, %v3275_v44  ;;  %v4913_v1 = vld [vmem:[#allocation29_spill] sm:$0xff] }
 0x119   : > { %432 = vrot.lane.b32.xlu0 %v3358_v56, %s4828_s30  ;;  %394 = vrot.lane.b32.xlu1 %v3364_v26, %s4888_s9  ;;  %v768_v56 = vmul.f32 %v3152_v23, %v3275_v44  ;;  %v1421_v26 = vrot.slane %v1415_v35, 1  ;;  %v3523_v2 = vadd.f32 %v872_v30, %v862_v38 }
 0x11a   : > { %v3545_v20 = vadd.f32 %v2007_v15, %v1997_v55  ;;  %v871_v55 = vrot.slane %v3404_v59, 1  ;;  %v910_v59 = vrot.slane %v3415_v51, 1 }
 0x11b   : > { %v774_v45 = vrot.slane %v768_v56, 1  ;;  %v3505_v23 = vadd.f32 %v1421_v26, %v1411_v10  ;;  %v905_v10 = vmul.f32 %v3140_v19, %v3275_v44  ;;  %v4906_v56 = vld [vmem:[#allocation30_spill] sm:$0xff]  ;;  %v4907_v19 = vld [vmem:[#allocation25_spill] sm:$0xff] }
 0x11c   : > { %v944_v26 = vmul.f32 %v4906_v56, %v3275_v44  ;;  %4909 = vst [vmem:[#allocation19_spill] sm:$0xff] %v3545_v20 }
 0x11d   : > { %508 = vrot.lane.b32.xlu0 %v3370_v11, %s4826_s21  ;;  %470 = vrot.lane.b32.xlu1 %v3372_v3, %s4895_s0  ;;  %v3511_v50 = vadd.f32 %v774_v45, %v764_v16  ;;  %v4903_v11 = vld [vmem:[#allocation23_spill] sm:$0xff]  ;;  %v1460_v3 = vrot.slane %v1454_v57, 1  ;;  %v940_v16 = vmul.f32 %v3243_v27, %v3275_v44  ;;  %v911_v33 = vrot.slane %v905_v10, 1 }
 0x11e   : > { %v1708_v58 = vmul.f32 %v4903_v11, %v3275_v44  ;;  %v1743_v45 = vmul.f32 %v4907_v19, %v3275_v44  ;;  %v1707_v10 = vmul.f32 %v4903_v11, %v3272_v29  ;;  %v1414_v11 = vmul.f32 %v4899_v54, %v3272_v29 }
 0x11f   : > { %v3533_v35 = vadd.f32 %v1460_v3, %v1450_v49  ;;  %v4910_v49 = vld [vmem:[#allocation33_spill] sm:$0xff]  ;;  %v3551_v30 = vadd.f32 %v911_v33, %v901_v8 }
 0x120   : > { %v1714_v24 = vrot.slane %v1708_v58, 1  ;;  %v1786_v57 = vmul.f32 %v4910_v49, %v3275_v44  ;;  %v4912_v58 = vld [vmem:[#allocation28_spill] sm:$0xff] }
 0x121   : > { %630 = vrot.lane.b32.xlu0 %v3376_v28, %s4894_s11  ;;  %591 = vrot.lane.b32.xlu1 %v3390_v22, %s4881_s8  ;;  %v4908_v28 = vld [vmem:[#allocation26_spill] sm:$0xff]  ;;  %v950_v22 = vrot.slane %v944_v26, 1  ;;  %4911 = vst [vmem:[#allocation20_spill] sm:$0xff] %v3551_v30  ;;  %v1194_v3 = vmul.f32 %v4912_v58, %v3275_v44  ;;  %v4915_v30 = vld [vmem:[#allocation32_spill] sm:$0xff] }
 0x122   : > { %v3539_v42 = vadd.f32 %v1714_v24, %v1704_v43  ;;  %v1747_v38 = vmul.f32 %v4908_v28, %v3275_v44  ;;  %v1198_v24 = vmul.f32 %v4913_v1, %v3275_v44  ;;  %v1792_v15 = vrot.slane %v1786_v57, 1 }
 0x123   : > { %v3564_v8 = vadd.f32 %v950_v22, %v940_v16  ;;  %v1785_v57 = vmul.f32 %v4910_v49, %v3272_v29  ;;  %v1746_v51 = vmul.f32 %v4908_v28, %v3272_v29 }
 0x124   : > { %v1753_v43 = vrot.slane %v1747_v38, 1  ;;  %v1204_v33 = vrot.slane %v1198_v24, 1  ;;  %v4914_v38 = vld [vmem:[#allocation31_spill] sm:$0xff]  ;;  %v3578_v16 = vadd.f32 %v1792_v15, %v1782_v39  ;;  %v1781_v39 = vmul.f32 %v3266_v60, %v3272_v29 }
 0x125   : > { %708 = vrot.lane.b32.xlu0 %v3396_v18, %s4828_s30  ;;  %669 = vrot.lane.b32.xlu1 %v3406_v14, %s4888_s9  ;;  %v1489_v48 = vmul.f32 %v4914_v38, %v3275_v44  ;;  %v1493_v18 = vmul.f32 %v4915_v30, %v3275_v44  ;;  %v4916_v14 = vrot.slane %v3386_v21, 1  ;;  %v900_v21 = vmul.f32 %v4905_v4, %v3272_v29 }
 0x126   : > { %v3566_v26 = vadd.f32 %v1753_v43, %v1743_v45  ;;  %v3580_v45 = vadd.f32 %v1204_v33, %v1194_v3  ;;  %v1791_v43 = vrot.slane %v1785_v57, 1  ;;  %v1713_v3 = vrot.slane %v1707_v10, 1 }
 0x127   : > { %v740_v20 = vadd.f32 %v4916_v14, %v3382_v52  ;;  %v1499_v22 = vrot.slane %v1493_v18, 1  ;;  %v877_v52 = vadd.f32 %v871_v55, %v3400_v36  ;;  %v916_v49 = vadd.f32 %v910_v59, %v900_v21 }
 0x128   : > { %v1420_v24 = vrot.slane %v1414_v11, 1  ;;  %v1703_v36 = vmul.f32 %v4902_v31, %v3272_v29  ;;  %v1752_v60 = vrot.slane %v1746_v51, 1  ;;  %v1197_v4 = vmul.f32 %v4913_v1, %v3272_v29 }
 0x129   : > { %786 = vrot.lane.b32.xlu0 %v3429_v61, %s4826_s21  ;;  %747 = vrot.lane.b32.xlu1 %v740_v20, %s4895_s0  ;;  %v3592_v54 = vadd.f32 %v1499_v22, %v1489_v48  ;;  %v1158_v61 = vmul.f32 %v4900_v37, %v3272_v29  ;;  %v3598_v20 = vadd.f32 %v1791_v43, %v1781_v39  ;;  %v2033_v39 = vstv %s2532_s25  ;;  %s3765_s25 = sld [smem:[#allocation2 + $0x50]] }
 0x12a   : > { %v1410_v48 = vmul.f32 %v4898_v9, %v3272_v29  ;;  %v1719_v28 = vadd.f32 %v1713_v3, %v1703_v36  ;;  %v1453_v37 = vmul.f32 %v4901_v25, %v3272_v29  ;;  %v1742_v15 = vmul.f32 %v4907_v19, %v3272_v29 }
 0x12b   : > { %v1164_v10 = vrot.slane %v1158_v61, 1  ;;  %v1154_v9 = vmul.f32 %v3175_v32, %v3272_v29  ;;  %v1203_v33 = vrot.slane %v1197_v4, 1  ;;  %v1492_v14 = vmul.f32 %v4915_v30, %v3272_v29 }
 0x12c   : > { %v1426_v55 = vadd.f32 %v1420_v24, %v1410_v48  ;;  %v1758_v31 = vadd.f32 %v1752_v60, %v1742_v15  ;;  %v1459_v1 = vrot.slane %v1453_v37, 1  ;;  %v2000_v25 = vmul.f32 %v4904_v40, %v3272_v29 }
 0x12d   : > { %884 = vrot.lane.b32.xlu0 %v877_v52, %s4881_s8  ;;  %923 = vrot.lane.b32.xlu1 %v916_v49, %s4894_s11  ;;  %v1170_v18 = vadd.f32 %v1164_v10, %v1154_v9  ;;  %v1193_v19 = vmul.f32 %v4912_v58, %v3272_v29  ;;  %v1449_v32 = vmul.f32 %v3199_v53, %v3272_v29  ;;  %v1498_v22 = vrot.slane %v1492_v14, 1 }
 0x12e   : > { %v2006_v57 = vrot.slane %v2000_v25, 1  ;;  %v943_v30 = vmul.f32 %v4906_v56, %v3272_v29  ;;  %v1488_v40 = vmul.f32 %v4914_v38, %v3272_v29  ;;  %v1996_v58 = vmul.f32 %v3225_v6, %v3272_v29 }
 0x12f   : > { %v1209_v59 = vadd.f32 %v1203_v33, %v1193_v19  ;;  %v1465_v11 = vadd.f32 %v1459_v1, %v1449_v32  ;;  %v939_v56 = vmul.f32 %v3243_v27, %v3272_v29  ;;  %v3712_v43 = vstv %s2492_s24  ;;  %s3774_s24 = sld [smem:[#allocation2 + $0x25]] }
 0x130   : > { %v1504_v52 = vadd.f32 %v1498_v22, %v1488_v40  ;;  %v2012_v21 = vadd.f32 %v2006_v57, %v1996_v58  ;;  %v949_v53 = vrot.slane %v943_v30, 1  ;;  %v1233_v48 = vmul.f32 %v3712_v43, %v3275_v44 }
 0x131   : > { %1726 = vrot.lane.b32.xlu0 %v1719_v28, %s4881_s8  ;;  %1433 = vrot.lane.b32.xlu1 %v1426_v55, %s4881_s8  ;;  %v3788_v22 = vstv %s3729_s26  ;;  %s3803_s26 = sld [smem:[#allocation2 + $0x58]] }
 0x132   : > { %v955_v51 = vadd.f32 %v949_v53, %v939_v56 }
 0x135   : > { %1765 = vrot.lane.b32.xlu0 %v1758_v31, %s4894_s11  ;;  %1177 = vrot.lane.b32.xlu1 %v1170_v18, %s4881_s8  ;;  %v2036_v18 = vmul.f32 %v2033_v39, %v3275_v44 }
 0x139   : > { %1216 = vrot.lane.b32.xlu0 %v1209_v59, %s4894_s11  ;;  %1472 = vrot.lane.b32.xlu1 %v1465_v11, %s4894_s11  ;;  %v3777_v59 = vstv %s3720_s28  ;;  %s3793_s28 = sld [smem:[#allocation2 + $0x27]] }
 0x13a   : > { %v978_v11 = vmul.f32 %v3777_v59, %v3272_v29 }
 0x13d   : > { %1511 = vrot.lane.b32.xlu0 %v1504_v52, %s4888_s9  ;;  %2019 = vrot.lane.b32.xlu1 %v2012_v21, %s4881_s8  ;;  %v3801_v52 = vstv %s3739_s4  ;;  %s3825_s4 = sld [smem:[#allocation2 + $0x5]] }
 0x141   : > { %320 = vrot.lane.b32.xlu0 %v3423_v41, %s4881_s8  ;;  %962 = vrot.lane.b32.xlu1 %v955_v51, %s4888_s9 }
 0x145   : > { %396 = vrot.lane.b32.xlu0 %v3435_v13, %s4888_s9  ;;  %358 = vrot.lane.b32.xlu1 %v3441_v12, %s4894_s11 }
 0x149   : > { %472 = vrot.lane.b32.xlu0 %v3449_v46, %s4895_s0  ;;  %434 = vrot.lane.b32.xlu1 %v3455_v47, %s4828_s30 }
 0x14d   : > { %593 = vrot.lane.b32.xlu0 %v3461_v0, %s4881_s8  ;;  %510 = vrot.lane.b32.xlu1 %v3467_v34, %s4826_s21  ;;  %v4925_v34 = vld [vmem:[#allocation19_spill] sm:$0xff] }
 0x151   : > { %671 = vrot.lane.b32.xlu0 %v3477_v5, %s4888_s9  ;;  %632 = vrot.lane.b32.xlu1 %v3483_v17, %s4894_s11  ;;  %v4926_v5 = vld [vmem:[#allocation20_spill] sm:$0xff]  ;;  %v2037_v17 = vstv %s2533_s20  ;;  %s3760_s20 = sld [smem:[#allocation2 + $0x32]] }
 0x152   : > { %v2040_v37 = vmul.f32 %v2037_v17, %v3275_v44 }
 0x155   : > { %749 = vrot.lane.b32.xlu0 %v3489_v7, %s4895_s0  ;;  %710 = vrot.lane.b32.xlu1 %v3495_v63, %s4828_s30  ;;  %s3809_s30 = sld [smem:[#allocation2 + $0x4]] }
 0x157   : > { %v3661_v6 = vpop.permute.xlu1 %316  ;;  %v3663_v27 = vpop.permute.xlu0 %392 }
 0x158   : > { %4917 = vst [vmem:[#allocation21_spill] sm:$0xff] %v3661_v6  ;;  %4918 = vst [vmem:[#allocation24_spill] sm:$0xff] %v3663_v27 }
 0x159   : > { %1435 = vrot.lane.b32.xlu0 %v3505_v23, %s4881_s8  ;;  %788 = vrot.lane.b32.xlu1 %v3511_v50, %s4826_s21  ;;  %v2039_v23 = vmul.f32 %v2037_v17, %v3272_v29  ;;  %v1234_v50 = vstv %s2493_s2  ;;  %s3762_s2 = sld [smem:[#allocation2 + $0x1f]]  ;;  %s3791_s21 = sld [smem:[#allocation2 + $0x33]] }
 0x15a   : > { %v1236_v32 = vmul.f32 %v1234_v50, %v3272_v29 }
 0x15b   : > { %v3669_v41 = vpop.permute.xlu1 %354  ;;  %v3671_v13 = vpop.permute.xlu0 %468 }
 0x15c   : > { %4919 = vst [vmem:[#allocation22_spill] sm:$0xff] %v3669_v41  ;;  %4920 = vst [vmem:[#allocation23_spill] sm:$0xff] %v3671_v13 }
 0x15d   : > { %1179 = vrot.lane.b32.xlu0 %v3517_v62, %s4881_s8  ;;  %886 = vrot.lane.b32.xlu1 %v3523_v2, %s4881_s8 }
 0x15f   : > { %v3677_v12 = vpop.permute.xlu1 %430  ;;  %v3679_v46 = vpop.permute.xlu0 %589 }
 0x160   : > { %4921 = vst [vmem:[#allocation27_spill] sm:$0xff] %v3677_v12  ;;  %4922 = vst [vmem:[#allocation18_spill] sm:$0xff] %v3679_v46 }
 0x161   : > { %1474 = vrot.lane.b32.xlu0 %v3533_v35, %s4894_s11  ;;  %1728 = vrot.lane.b32.xlu1 %v3539_v42, %s4881_s8  ;;  %v2045_v35 = vrot.slane %v2039_v23, 1  ;;  %v4930_v42 = vld [vmem:[#allocation17_spill] sm:$0xff]  ;;  %v3817_v23 = vstv %s3748_s5  ;;  %s3843_s5 = sld [smem:[#allocation2 + $0x59]] }
 0x162   : > { %v1235_v38 = vmul.f32 %v1234_v50, %v4930_v42  ;;  %v2038_v36 = vmul.f32 %v2037_v17, %v4930_v42  ;;  %v2034_v9 = vmul.f32 %v2033_v39, %v4930_v42  ;;  %v3814_v17 = vstv %s3746_s29  ;;  %s3841_s29 = sld [smem:[#allocation2 + $0x28]] }
 0x163   : > { %v3685_v47 = vpop.permute.xlu1 %506  ;;  %v3687_v0 = vpop.permute.xlu0 %667 }
 0x164   : > { %4923 = vst [vmem:[#allocation30_spill] sm:$0xff] %v3685_v47  ;;  %4924 = vst [vmem:[#allocation25_spill] sm:$0xff] %v3687_v0  ;;  %v1241_v61 = vrot.slane %v1235_v38, 1  ;;  %v2044_v10 = vrot.slane %v2038_v36, 1  ;;  %v1526_v38 = vmul.f32 %v3788_v22, %v4930_v42  ;;  %v1821_v0 = vmul.f32 %v3801_v52, %v3275_v44 }
 0x165   : > { %2021 = vrot.lane.b32.xlu0 %v4925_v34, %s4881_s8  ;;  %925 = vrot.lane.b32.xlu1 %v4926_v5, %s4894_s11  ;;  %s2509_s8 = sld [smem:[#allocation2 + $0x51]]  ;;  %v1242_v5 = vrot.slane %v1236_v32, 1  ;;  %v3896_v32 = vstv %s3803_s26  ;;  %s3966_s26 = sld [smem:[#allocation2 + $0x2d]] }
 0x166   : > { %v2050_v25 = vadd.f32 %v2044_v10, %v2034_v9  ;;  %v3869_v9 = vstv %s3774_s24  ;;  %s3889_s24 = sld [smem:[#allocation2 + $0x2c]] }
 0x167   : > { %v3693_v7 = vpop.permute.xlu1 %628  ;;  %v3695_v63 = vpop.permute.xlu0 %745 }
 0x168   : > { %4927 = vst [vmem:[#allocation26_spill] sm:$0xff] %v3693_v7  ;;  %4928 = vst [vmem:[#allocation33_spill] sm:$0xff] %v3695_v63 }
 0x169   : > { %964 = vrot.lane.b32.xlu0 %v3564_v8, %s4888_s9  ;;  %1767 = vrot.lane.b32.xlu1 %v3566_v26, %s4894_s11  ;;  %v2035_v8 = vmul.f32 %v2033_v39, %v3272_v29  ;;  %v1237_v26 = vmul.f32 %v1234_v50, %v3275_v44  ;;  %v3820_v50 = vstv %s3752_s6  ;;  %v1232_v39 = vmul.f32 %v3712_v43, %v3272_v29  ;;  %s3852_s6 = sld [smem:[#allocation2 + $0x34]] }
 0x16b   : > { %v3702_v62 = vpop.permute.xlu1 %706  ;;  %v3704_v2 = vpop.permute.xlu0 %921  ;;  %v2051_v24 = vadd.f32 %v2045_v35, %v2035_v8  ;;  %v1243_v60 = vrot.slane %v1237_v26, 1  ;;  %v3750_v15 = vstv %s2509_s8  ;;  %s3781_s8 = sld [smem:[#allocation2 + $0x2]]  ;;  %v3823_v35 = vstv %s3754_s16 }
 0x16c   : > { %4929 = vst [vmem:[#allocation28_spill] sm:$0xff] %v3702_v62  ;;  %v1530_v19 = vmul.f32 %v3750_v15, %v4930_v42  ;;  %v1532_v30 = vmul.f32 %v3750_v15, %v3275_v44  ;;  %v3836_v8 = vstv %s3760_s20  ;;  %v3839_v26 = vstv %s3762_s2  ;;  %s3862_s16 = sld [smem:[#allocation2 + $0x22]]  ;;  %s3864_s20 = sld [smem:[#allocation2 + $0x53]] }
 0x16d   : > { %1806 = vrot.lane.b32.xlu0 %v3578_v16, %s4888_s9  ;;  %1218 = vrot.lane.b32.xlu1 %v3580_v45, %s4894_s11  ;;  %v1231_v16 = vmul.f32 %v3712_v43, %v4930_v42  ;;  %v3727_v45 = vstv %s2481_s22  ;;  %v1249_v31 = vadd.f32 %v1243_v60, %v1233_v48  ;;  %s3779_s22 = sld [smem:[#allocation2 + $0x56]] }
 0x16e   : > { %v982_v4 = vmul.f32 %v3727_v45, %v3272_v29  ;;  %v981_v40 = vmul.f32 %v3727_v45, %v4930_v42  ;;  %v1536_v34 = vrot.slane %v1530_v19, 1  ;;  %v983_v10 = vmul.f32 %v3727_v45, %v3275_v44  ;;  %s3877_s2 = sld [smem:[#allocation2 + $0x26]] }
 0x16f   : > { %v3715_v49 = vpop.permute.xlu1 %784  ;;  %v3717_v3 = vpop.permute.xlu0 %1431  ;;  %v1247_v55 = vadd.f32 %v1241_v61, %v1231_v16  ;;  %v1538_v61 = vrot.slane %v1532_v30, 1  ;;  %v3848_v16 = vstv %s3765_s25  ;;  %s3879_s25 = sld [smem:[#allocation2 + $0x57]]  ;;  %v3884_v45 = vstv %s3791_s21 }
 0x170   : > { %4931 = vst [vmem:[#allocation29_spill] sm:$0xff] %v3715_v49  ;;  %v988_v33 = vrot.slane %v982_v4, 1  ;;  %v987_v36 = vrot.slane %v981_v40, 1  ;;  %v1542_v60 = vadd.f32 %v1536_v34, %v1526_v38  ;;  %v1248_v4 = vadd.f32 %v1242_v5, %v1232_v39  ;;  %4935 = vst [vmem:[#allocation19_spill] sm:$0xff] %v3884_v45  ;;  %s3920_s21 = sld [smem:[#allocation2 + $0x5f]] }
 0x171   : > { %2058 = vrot.lane.b32.xlu0 %v2051_v24, %s4894_s11  ;;  %1513 = vrot.lane.b32.xlu1 %v3592_v54, %s4888_s9  ;;  %v1528_v24 = vmul.f32 %v3788_v22, %v3275_v44  ;;  %v979_v19 = vmul.f32 %v3777_v59, %v3275_v44  ;;  %v1531_v34 = vmul.f32 %v3750_v15, %v3272_v29  ;;  %v3912_v5 = vstv %s3811_s14  ;;  %s3936_s14 = sld [smem:[#allocation2 + $0x29]] }
 0x172   : > { %v994_v56 = vadd.f32 %v988_v33, %v978_v11  ;;  %v3875_v33 = vstv %s3781_s8  ;;  %s3898_s8 = sld [smem:[#allocation2 + $0x2e]]  ;;  %v3915_v38 = vstv %s3825_s4  ;;  %v3918_v39 = vstv %s3827_s13  ;;  %s3934_s13 = sld [smem:[#allocation2 + $0x60]] }
 0x173   : > { %v3741_v54 = vpop.permute.xlu1 %882  ;;  %v3743_v28 = vpop.permute.xlu0 %1175  ;;  %4937 = vst [vmem:[#allocation17_spill] sm:$0xff] %v3915_v38  ;;  %4938 = vst [vmem:[#allocation34_spill] sm:$0xff] %v3918_v39  ;;  %v1820_v15 = vmul.f32 %v3801_v52, %v3272_v29  ;;  %v1537_v58 = vrot.slane %v1531_v34, 1  ;;  %v3955_v47 = vstv %s3862_s16  ;;  %v3958_v13 = vstv %s3864_s20  ;;  %s4291_s4 = sld [smem:[#allocation2 + $0x5e]]  ;;  %s2786_s16 = smov 124  }
 0x174   : > { %v3961_v12 = vstv %s3877_s2  ;;  %v2075_v34 = vmul.f32 %v3817_v23, %v3275_v44  ;;  %v1825_v49 = vmul.f32 %v3814_v17, %v3275_v44  ;;  %s2787_s20 = smov 123   ;;  %s2788_s2 = smov 125  }
 0x175   : > { %1253 = vrot.lane.b32.xlu0 %v1247_v55, %s4888_s9  ;;  %1804 = vrot.lane.b32.xlu1 %v3598_v20, %s4888_s9  ;;  %v2046_v20 = vrot.slane %v2040_v37, 1  ;;  %v1824_v55 = vmul.f32 %v3814_v17, %v3272_v29  ;;  %v977_v37 = vmul.f32 %v3777_v59, %v4930_v42  ;;  %v3909_v59 = vstv %s3809_s30  ;;  %s3948_s30 = sld [smem:[#allocation2 + $0x5a]] }
 0x176   : > { %v3964_v27 = vstv %s3879_s25  ;;  %v3998_v63 = vstv %s3920_s21  ;;  %s2789_s25 = smov 122  }
 0x177   : > { %v3767_v1 = vpop.permute.xlu1 %1724  ;;  %v3769_v14 = vpop.permute.xlu0 %1470  ;;  %v2052_v51 = vadd.f32 %v2046_v20, %v2036_v18  ;;  %v3887_v18 = vstv %s3793_s28  ;;  %v993_v20 = vadd.f32 %v987_v36, %v977_v37  ;;  %v1830_v40 = vrot.slane %v1824_v55, 1  ;;  %s3922_s28 = sld [smem:[#allocation2 + $0x2f]] }
 0x178   : > { %v2079_v36 = vmul.f32 %v3820_v50, %v3275_v44  ;;  %v3946_v55 = vstv %s3852_s6  ;;  %s2785_s6 = smov 126  }
 0x179   : > { %1257 = vrot.lane.b32.xlu0 %v1249_v31, %s4888_s9  ;;  %2056 = vrot.lane.b32.xlu1 %v2050_v25, %s4894_s11  ;;  %v3872_v31 = vstv %s3779_s22  ;;  %s3891_s22 = sld [smem:[#allocation2 + $0x5d]]  ;;  %v1544_v25 = vadd.f32 %v1538_v61, %v1528_v24  ;;  %v3929_v24 = vstv %s3841_s29  ;;  %4939 = vst [vmem:[#allocation35_spill] sm:$0xff] %v3946_v55  ;;  %s4343_s29 = sld [smem:[#allocation2 + $0x30]] }
 0x17a   : > { %v3932_v61 = vstv %s3843_s5  ;;  %v1022_v46 = vmul.f32 %v3872_v31, %v3275_v44  ;;  %s4463_s5 = sld [smem:[#allocation2 + $0x37]] }
 0x17b   : > { %v3805_v21 = vpop.permute.xlu1 %1763  ;;  %v3807_v53 = vpop.permute.xlu0 %2017 }
 0x17c   : > { %4932 = vst [vmem:[#allocation31_spill] sm:$0xff] %v3807_v53  ;;  %v1275_v53 = vmul.f32 %v3848_v16, %v3272_v29 }
 0x17d   : > { %1001 = vrot.lane.b32.xlu0 %v994_v56, %s4933_s17  ;;  %2060 = vrot.lane.b32.xlu1 %v2052_v51, %s4894_s11  ;;  %s3850_s11 = sld [smem:[#allocation2 + $0x3]]  ;;  %v989_v56 = vrot.slane %v983_v10, 1  ;;  %v2077_v51 = vmul.f32 %v3820_v50, %v4930_v42  ;;  %v4001_v62 = vstv %s3922_s28 }
 0x17e   : > { %4944 = vst [vmem:[#allocation40_spill] sm:$0xff] %v4001_v62 }
 0x17f   : > { %v3854_v43 = vpop.permute.xlu1 %1214  ;;  %v3856_v48 = vpop.permute.xlu0 %960  ;;  %v2083_v57 = vrot.slane %v2077_v51, 1  ;;  %v3978_v51 = vstv %s3891_s22  ;;  %s5003_s22 = sshll.u32 %s2976_s10, 3 }
 0x180   : > { %4934 = vst [vmem:[#allocation32_spill] sm:$0xff] %v3856_v48  ;;  %v1391_v48 = vmul.f32 %v3912_v5, %v4930_v42 }
 0x181   : > { %1548 = vrot.lane.b32.xlu0 %v1542_v60, %s4933_s17  ;;  %1255 = vrot.lane.b32.xlu1 %v1248_v4, %s4888_s9  ;;  %v1823_v60 = vmul.f32 %v3814_v17, %v4930_v42  ;;  %v4011_v17 = vstv %s3936_s14 }
 0x182   : > { %4945 = vst [vmem:[#allocation41_spill] sm:$0xff] %v4011_v17 }
 0x183   : > { %v3900_v11 = vpop.permute.xlu1 %1509  ;;  %v3902_v30 = vpop.permute.xlu0 %1802  ;;  %v3943_v4 = vstv %s3850_s11  ;;  %s2784_s11 = smov 127  }
 0x184   : > { %4936 = vst [vmem:[#allocation20_spill] sm:$0xff] %v3902_v30 }
 0x185   : > { %1552 = vrot.lane.b32.xlu0 %v1544_v25, %s4933_s17  ;;  %999 = vrot.lane.b32.xlu1 %v993_v20, %s4933_s17  ;;  %v1836_v25 = vadd.f32 %v1830_v40, %v1820_v15  ;;  %v995_v20 = vadd.f32 %v989_v56, %v979_v19  ;;  %v2073_v19 = vmul.f32 %v3817_v23, %v4930_v42  ;;  %v3975_v56 = vstv %s3889_s24  ;;  %s2549_s24 = sshll.u32 %s2764_s15, 7  ;;  %s2790_s15 = smov [#allocation7]  }
 0x186   : > { %v1527_v40 = vmul.f32 %v3788_v22, %v3272_v29  ;;  %v2085_v15 = vrot.slane %v2079_v36, 1  ;;  %v1819_v36 = vmul.f32 %v3801_v52, %v4930_v42  ;;  %v1274_v52 = vmul.f32 %v3848_v16, %v4930_v42  ;;  %s4724_s14 = scalar_lea.hbm %s4776_s3, %s2549_s24 }
 0x187   : > { %v3950_v10 = vpop.permute.xlu1 %318  ;;  %v3952_v37 = vpop.permute.xlu0 %356  ;;  %v2089_v30 = vadd.f32 %v2083_v57, %v2073_v19  ;;  %v1020_v57 = vmul.f32 %v3872_v31, %v4930_v42 }
 0x188   : > { %4940 = vst [vmem:[#allocation36_spill] sm:$0xff] %v3950_v10  ;;  %4941 = vst [vmem:[#allocation37_spill] sm:$0xff] %v3952_v37  ;;  %v1543_v22 = vadd.f32 %v1537_v58, %v1527_v40  ;;  %v4008_v58 = vstv %s3934_s13  ;;  %v2091_v19 = vadd.f32 %v2085_v15, %v2075_v34  ;;  %v2078_v37 = vmul.f32 %v3820_v50, %v3272_v29 }
 0x189   : > { %1843 = vrot.lane.b32.xlu0 %v1836_v25, %s4933_s17  ;;  %1003 = vrot.lane.b32.xlu1 %v995_v20, %s4933_s17  ;;  %v1829_v25 = vrot.slane %v1823_v60, 1  ;;  %v3983_v20 = vstv %s3898_s8  ;;  %v549_v60 = vmul.f32 %v3836_v8, %v4930_v42  ;;  %v545_v34 = vmul.f32 %v3823_v35, %v4930_v42  ;;  %s216_s8 = scalar_lea.vmem [#allocation7], %s5003_s22 }
 0x18a   : > { %v1026_v50 = vrot.slane %v1020_v57, 1  ;;  %v1280_v10 = vrot.slane %v1274_v52, 1  ;;  %s2337_s21 = sshll.u32 %s216_s8, 4  ;;  %s4726_s21 = int_to_ptr.vmem [resolvable:$true] %s2337_s21 }
 0x18b   : > { %v3985_v41 = vpop.permute.xlu1 %394  ;;  %v3987_v6 = vpop.permute.xlu0 %432  ;;  %v1835_v40 = vadd.f32 %v1829_v25, %v1819_v36  ;;  %v555_v15 = vrot.slane %v549_v60, 1  ;;  %v4031_v25 = vstv %s3966_s26  ;;  %v842_v36 = vmul.f32 %v3884_v45, %v4930_v42  ;;  %s2686_s26 = scalar_lea.vmem %s4726_s21, 128 }
 0x18c   : > { %4942 = vst [vmem:[#allocation38_spill] sm:$0xff] %v3985_v41  ;;  %4943 = vst [vmem:[#allocation39_spill] sm:$0xff] %v3987_v6  ;;  %v4016_v6 = vstv %s3948_s30  ;;  %v1831_v41 = vrot.slane %v1825_v49, 1  ;;  %v1271_v49 = vmul.f32 %v3839_v26, %v3272_v29  ;;  %v2074_v60 = vmul.f32 %v3817_v23, %v3272_v29  ;;  %s2321_s30 = scalar_lea.sflag [#allocation4], %s2976_s10  ;;  %p2687_p4 = scmp.ne.s32.totalorder %s4726_s21, %s2686_s26 }
 0x18d   : > { %2095 = vrot.lane.b32.xlu0 %v2089_v30, %s4888_s9  ;;  %1550 = vrot.lane.b32.xlu1 %v1543_v22, %s4933_s17  ;;  %4946 = vst [vmem:[#allocation42_spill] sm:$0xff] %v4016_v6  ;;  %v1281_v22 = vrot.slane %v1275_v53, 1  ;;  %4949 = vst [vmem:[#allocation45_spill] sm:$0xff] %v4031_v25  ;;  %v1016_v53 = vmul.f32 %v3869_v9, %v4930_v42  ;;  %v1018_v25 = vmul.f32 %v3869_v9, %v3275_v44 }
 0x18e   : > { %v1837_v17 = vadd.f32 %v1831_v41, %v1821_v0  ;;  %v2084_v6 = vrot.slane %v2078_v37, 1  ;;  %v1028_v45 = vrot.slane %v1022_v46, 1  ;;  %v4053_v62 = vadd.f32 %v555_v15, %v545_v34  ;;  %p2688_p2 = pnand %p2687_p4, %p5004_p8 }
 0x18f   : > { %v4018_v7 = vpop.permute.xlu1 %470  ;;  %v4020_v30 = vpop.permute.xlu0 %508  ;;  %v1287_v57 = vadd.f32 %v1281_v22, %v1271_v49  ;;  %v1270_v23 = vmul.f32 %v3839_v26, %v4930_v42  ;;  %v838_v22 = vmul.f32 %v3875_v33, %v4930_v42  ;;  %v848_v41 = vrot.slane %v842_v36, 1 }
 0x190   : > { %4947 = vst [vmem:[#allocation43_spill] sm:$0xff] %v4018_v7  ;;  %4948 = vst [vmem:[#allocation44_spill] sm:$0xff] %v4020_v30  ;;  %v1684_v46 = vmul.f32 %v3918_v39, %v4930_v42  ;;  %v1272_v37 = vmul.f32 %v3839_v26, %v3275_v44  ;;  %v1862_v15 = vmul.f32 %v3932_v61, %v4930_v42  ;;  %p2689_p12 = pneg %p2688_p2 }
 0x191   : > { %2099 = vrot.lane.b32.xlu0 %v2091_v19, %s4888_s9  ;;  %1841 = vrot.lane.b32.xlu1 %v1835_v40, %s4933_s17  ;;  %v1570_v19 = vmul.f32 %v3896_v32, %v3272_v29  ;;  %v1276_v40 = vmul.f32 %v3848_v16, %v3275_v44  ;;  %v1032_v16 = vadd.f32 %v1026_v50, %v1016_v53 }
 0x192   : > { %v2090_v49 = vadd.f32 %v2084_v6, %v2074_v60  ;;  %v1034_v53 = vadd.f32 %v1028_v45, %v1018_v25  ;;  %v1566_v50 = vmul.f32 %v3887_v18, %v3272_v29  ;;  %v1021_v36 = vmul.f32 %v3872_v31, %v3272_v29 }
 0x193   : > { %v4049_v30 = vpop.permute.xlu1 %591  ;;  %v4051_v7 = vpop.permute.xlu0 %630  ;;  %v1576_v0 = vrot.slane %v1570_v19, 1  ;;  %v1282_v34 = vrot.slane %v1276_v40, 1  ;;  %v1286_v19 = vadd.f32 %v1280_v10, %v1270_v23  ;;  %v1387_v26 = vmul.f32 %v3909_v59, %v4930_v42 }
 0x194   : > { %v1397_v40 = vrot.slane %v1391_v48, 1  ;;  %v854_v6 = vadd.f32 %v848_v41, %v838_v22  ;;  %v1680_v45 = vmul.f32 %v3915_v38, %v4930_v42  ;;  %v1690_v25 = vrot.slane %v1684_v46, 1 }
 0x195   : > { %1294 = vrot.lane.b32.xlu0 %v1287_v57, %s4933_s17  ;;  %1845 = vrot.lane.b32.xlu1 %v1837_v17, %s4933_s17  ;;  %v1135_v57 = vmul.f32 %v3946_v55, %v4930_v42  ;;  %v1569_v31 = vmul.f32 %v3896_v32, %v4930_v42  ;;  %v1582_v10 = vadd.f32 %v1576_v0, %v1566_v50  ;;  %v1868_v23 = vrot.slane %v1862_v15, 1 }
 0x196   : > { %v1288_v60 = vadd.f32 %v1282_v34, %v1272_v37  ;;  %v1864_v48 = vmul.f32 %v3932_v61, %v3275_v44  ;;  %v1017_v22 = vmul.f32 %v3869_v9, %v3272_v29  ;;  %v1027_v41 = vrot.slane %v1021_v36, 1 }
 0x197   : > { %v4069_v52 = vpop.permute.xlu1 %669  ;;  %v4071_v17 = vpop.permute.xlu0 %708  ;;  %v1571_v46 = vmul.f32 %v3896_v32, %v3275_v44  ;;  %v4099_v0 = vadd.f32 %v1397_v40, %v1387_v26  ;;  %v1131_v37 = vmul.f32 %v3943_v4, %v4930_v42  ;;  %v1141_v34 = vrot.slane %v1135_v57, 1 }
 0x198   : > { %v2117_v15 = vmul.f32 %v3958_v13, %v3272_v29  ;;  %v1565_v9 = vmul.f32 %v3887_v18, %v4930_v42  ;;  %v1575_v50 = vrot.slane %v1569_v31, 1  ;;  %v1863_v32 = vmul.f32 %v3932_v61, %v3272_v29 }
 0x199   : > { %1038 = vrot.lane.b32.xlu0 %v1032_v16, %s4895_s0  ;;  %2097 = vrot.lane.b32.xlu1 %v2090_v49, %s4888_s9  ;;  %v1858_v16 = vmul.f32 %v3929_v24, %v4930_v42  ;;  %v1696_v49 = vadd.f32 %v1690_v25, %v1680_v45  ;;  %v1860_v26 = vmul.f32 %v3929_v24, %v3275_v44  ;;  %v1870_v40 = vrot.slane %v1864_v48, 1  ;;  %s4962_s9 = smov 32  }
 0x19a   : > { %v1567_v57 = vmul.f32 %v3887_v18, %v3275_v44  ;;  %v1577_v45 = vrot.slane %v1571_v46, 1  ;;  %v1313_v25 = vmul.f32 %v3964_v27, %v4930_v42  ;;  %v4951_v31 = vstv %s3737_s18 }
 0x19b   : > { %v4089_v39 = vpop.permute.xlu1 %747  ;;  %v4091_v55 = vpop.permute.xlu0 %786  ;;  %v1874_v36 = vadd.f32 %v1868_v23, %v1858_v16  ;;  %v282_v61 = vmul.f32 %v4951_v31, %v3272_v29  ;;  %v1147_v48 = vadd.f32 %v1141_v34, %v1131_v37  ;;  %v2113_v18 = vmul.f32 %v3955_v47, %v3272_v29 }
 0x19c   : > { %4950 = vst [vmem:[#allocation46_spill] sm:$0xff] %v4091_v55  ;;  %v2123_v16 = vrot.slane %v2117_v15, 1  ;;  %v1869_v46 = vrot.slane %v1863_v32, 1  ;;  %v1876_v37 = vadd.f32 %v1870_v40, %v1860_v26  ;;  %v1309_v34 = vmul.f32 %v3961_v12, %v4930_v42 }
 0x19d   : > { %1042 = vrot.lane.b32.xlu0 %v1034_v53, %s4895_s0  ;;  %1292 = vrot.lane.b32.xlu1 %v1286_v19, %s4933_s17  ;;  %v1033_v19 = vadd.f32 %v1027_v41, %v1017_v22  ;;  %v1581_v22 = vadd.f32 %v1575_v50, %v1565_v9  ;;  %v1859_v41 = vmul.f32 %v3929_v24, %v3272_v29  ;;  %v1319_v9 = vrot.slane %v1313_v25, 1 }
 0x19e   : > { %v1583_v15 = vadd.f32 %v1577_v45, %v1567_v57  ;;  %v286_v24 = vrot.slane %v282_v61, 1  ;;  %v2129_v32 = vadd.f32 %v2123_v16, %v2113_v18  ;;  %v4952_v26 = vstv %s3731_s27 }
 0x19f   : > { %v4115_v38 = vpop.permute.xlu1 %923  ;;  %v4117_v53 = vpop.permute.xlu0 %884  ;;  %v279_v40 = vmul.f32 %v4952_v26, %v3272_v29  ;;  %v2112_v31 = vmul.f32 %v3955_v47, %v4930_v42  ;;  %v1875_v57 = vadd.f32 %v1869_v46, %v1859_v41  ;;  %v1315_v45 = vmul.f32 %v3964_v27, %v3275_v44 }
 0x1a0   : > { %v888_v23 = vsel %vm322_vm4, %v3741_v54, %v4117_v53  ;;  %v927_v54 = vsel %vm360_vm5, %v3704_v2, %v4115_v38  ;;  %v2118_v61 = vmul.f32 %v3958_v13, %v3275_v44  ;;  %v1325_v16 = vadd.f32 %v1319_v9, %v1309_v34 }
 0x1a1   : > { %v893_v55 = vadd.f32 %v888_v23, %v854_v6  ;;  %1589 = vrot.lane.b32.xlu0 %v1582_v10, %s4895_s0  ;;  %1296 = vrot.lane.b32.xlu1 %v1288_v60, %s4933_s17  ;;  %v2116_v6 = vmul.f32 %v3958_v13, %v4930_v42  ;;  %v1060_v23 = vmul.f32 %v3978_v51, %v3272_v29 }
 0x1a2   : > { %v4170_v41 = vadd.f32 %v286_v24, %v279_v40  ;;  %v1056_v46 = vmul.f32 %v3975_v56, %v3272_v29  ;;  %v2124_v24 = vrot.slane %v2118_v61, 1 }
 0x1a3   : > { %v4140_v10 = vpop.permute.xlu1 %1433  ;;  %v4142_v60 = vpop.permute.xlu0 %1726  ;;  %v4144_v50 = vadd.f32 %v927_v54, %v893_v55  ;;  %v1311_v55 = vmul.f32 %v3961_v12, %v3275_v44  ;;  %v2122_v25 = vrot.slane %v2116_v6, 1  ;;  %v1314_v54 = vmul.f32 %v3964_v27, %v3272_v29 }
 0x1a4   : > { %v1730_v2 = vsel %vm322_vm4, %v3767_v1, %v4142_v60  ;;  %v2114_v1 = vmul.f32 %v3955_v47, %v3275_v44  ;;  %v1437_v47 = vsel %vm322_vm4, %v3717_v3, %v4140_v10  ;;  %v1321_v6 = vrot.slane %v1315_v45, 1 }
 0x1a5   : > { %1880 = vrot.lane.b32.xlu0 %v1874_v36, %s4895_s0  ;;  %1040 = vrot.lane.b32.xlu1 %v1033_v19, %s4895_s0  ;;  %v1735_v36 = vadd.f32 %v1730_v2, %v1696_v49  ;;  %v1310_v3 = vmul.f32 %v3961_v12, %v3272_v29  ;;  %v2128_v9 = vadd.f32 %v2122_v25, %v2112_v31  ;;  %v1066_v2 = vrot.slane %v1060_v23, 1 }
 0x1a6   : > { %v1442_v27 = vadd.f32 %v1437_v47, %v4099_v0  ;;  %v1320_v25 = vrot.slane %v1314_v54, 1  ;;  %v550_v0 = vmul.f32 %v3836_v8, %v3272_v29  ;;  %v551_v47 = vmul.f32 %v3836_v8, %v3275_v44 }
 0x1a7   : > { %v4166_v19 = vpop.permute.xlu1 %1177  ;;  %v4168_v18 = vpop.permute.xlu0 %1765 }
 0x1a8   : > { %v1181_v13 = vsel %vm322_vm4, %v3743_v28, %v4166_v19  ;;  %v1769_v49 = vsel %vm360_vm5, %v3805_v21, %v4168_v18  ;;  %v1608_v28 = vmul.f32 %v3998_v63, %v4930_v42  ;;  %v1604_v21 = vmul.f32 %v3983_v20, %v4930_v42 }
 0x1a9   : > { %v4185_v34 = vadd.f32 %v1769_v49, %v1735_v36  ;;  %1587 = vrot.lane.b32.xlu1 %v1581_v22, %s4895_s0  ;;  %1884 = vrot.lane.b32.xlu0 %v1876_v37, %s4895_s0  ;;  %v1186_v26 = vadd.f32 %v1181_v13, %v1147_v48  ;;  %v2783_v37 = vmov 1966171168   ;;  %v529_v36 = vlaneseq }
 0x1aa   : > { %v527_v45 = vunpack.c.l.s4 %v2783_v37  ;;  %v1614_v23 = vrot.slane %v1608_v28, 1  ;;  %v2130_v13 = vadd.f32 %v2124_v24, %v2114_v1  ;;  %v1610_v49 = vmul.f32 %v3998_v63, %v3275_v44 }
 0x1ab   : > { %v4196_v40 = vpop.permute.xlu1 %1472  ;;  %v4198_v22 = vpop.permute.xlu0 %1216  ;;  %v4222_v37 = vshrl.u32 %v529_v36, 7  ;;  %v547_v1 = vmul.f32 %v3823_v35, %v3275_v44  ;;  %v556_v24 = vrot.slane %v550_v0, 1  ;;  %v4956_v0 = vld [vmem:[#allocation36_spill] sm:$0xff] }
 0x1ac   : > { %v1476_v12 = vsel %vm360_vm5, %v3769_v14, %v4196_v40  ;;  %v1220_v31 = vsel %vm360_vm5, %v3854_v43, %v4198_v22  ;;  %v1327_v14 = vadd.f32 %v1321_v6, %v1311_v55  ;;  %v1059_v43 = vmul.f32 %v3978_v51, %v4930_v42 }
 0x1ad   : > { %v1481_v48 = vadd.f32 %v1476_v12, %v1442_v27  ;;  %v4208_v61 = vadd.f32 %v1220_v31, %v1186_v26  ;;  %1591 = vrot.lane.b32.xlu1 %v1583_v15, %s4895_s0  ;;  %2136 = vrot.lane.b32.xlu0 %v2129_v32, %s4933_s17  ;;  %v1072_v26 = vadd.f32 %v1066_v2, %v1056_v46  ;;  %v528_v15 = vunpack.c.0.s8 %v527_v45  ;;  %v4955_v31 = vld [vmem:[#allocation32_spill] sm:$0xff] }
 0x1ae   : > { %4953 = vst [vmem:[#allocation47_spill] sm:$0xff] %v4222_v37  ;;  %v546_v32 = vmul.f32 %v3823_v35, %v3272_v29  ;;  %v4229_v55 = vadd.f32 %v1320_v25, %v1310_v3  ;;  %v1061_v6 = vmul.f32 %v3978_v51, %v3275_v44  ;;  %v1620_v46 = vadd.f32 %v1614_v23, %v1604_v21 }
 0x1af   : > { %v4218_v54 = vpop.permute.xlu1 %2019  ;;  %v4220_v27 = vpop.permute.xlu0 %1511  ;;  %v557_v2 = vrot.slane %v551_v47, 1  ;;  %v1065_v3 = vrot.slane %v1059_v43, 1  ;;  %v1606_v45 = vmul.f32 %v3983_v20, %v3275_v44  ;;  %v1616_v35 = vrot.slane %v1610_v49, 1  ;;  %v4957_v47 = vld [vmem:[#allocation40_spill] sm:$0xff] }
 0x1b0   : > { %v1515_v8 = vsel %vm398_vm6, %v3900_v11, %v4220_v27  ;;  %v1055_v11 = vmul.f32 %v3975_v56, %v4930_v42  ;;  %v4246_v12 = vsub.s32 %v528_v15, %v4222_v37  ;;  %v1609_v21 = vmul.f32 %v3998_v63, %v3272_v29  ;;  %v4958_v15 = vld [vmem:[#allocation18_spill] sm:$0xff] }
 0x1b1   : > { %v4235_v28 = vadd.f32 %v1515_v8, %v1481_v48  ;;  %1882 = vrot.lane.b32.xlu1 %v1875_v57, %s4895_s0  ;;  %1331 = vrot.lane.b32.xlu0 %v1325_v16, %s4895_s0  ;;  %v1057_v57 = vmul.f32 %v3975_v56, %v3275_v44  ;;  %v1902_v16 = vmul.f32 %v4008_v58, %v3272_v29  ;;  %v1067_v23 = vrot.slane %v1061_v6, 1 }
 0x1b2   : > { %v1898_v43 = vmul.f32 %v4957_v47, %v3272_v29  ;;  %v4266_v63 = vadd.f32 %v556_v24, %v546_v32  ;;  %v4268_v49 = vadd.f32 %v557_v2, %v547_v1  ;;  %v595_v8 = vsel %vm322_vm4, %v4958_v15, %v4049_v30  ;;  %v4960_v1 = vld [vmem:[#allocation37_spill] sm:$0xff] }
 0x1b3   : > { %4954 = vst [vmem:[#allocation48_spill] sm:$0xff] %v4235_v28  ;;  %v4243_v36 = vpop.permute.xlu1 %962  ;;  %v321_v51 = vpop.permute.xlu0 %320  ;;  %v1071_v6 = vadd.f32 %v1065_v3, %v1055_v11  ;;  %v4280_v2 = vadd.f32 %v1067_v23, %v1057_v57  ;;  %v4961_v11 = vld [vmem:[#allocation41_spill] sm:$0xff]  ;;  %v4963_v57 = vld [vmem:[#allocation38_spill] sm:$0xff] }
 0x1b4   : > { %v966_v25 = vsel %vm398_vm6, %v4955_v31, %v4243_v36  ;;  %v324_v48 = vsel %vm322_vm4, %v4956_v0, %v321_v51  ;;  %v1622_v51 = vadd.f32 %v1616_v35, %v1606_v45  ;;  %v1605_v31 = vmul.f32 %v3983_v20, %v3272_v29 }
 0x1b5   : > { %v4262_v56 = vadd.f32 %v966_v25, %v4144_v50  ;;  %2134 = vrot.lane.b32.xlu1 %v2128_v9, %s4933_s17  ;;  %1335 = vrot.lane.b32.xlu0 %v1327_v14, %s4895_s0  ;;  %v328_v50 = vadd.f32 %v324_v48, %v4170_v41  ;;  %v1908_v9 = vrot.slane %v1902_v16, 1  ;;  %v1615_v0 = vrot.slane %v1609_v21, 1  ;;  %v4959_v14 = vld [vmem:[#allocation42_spill] sm:$0xff] }
 0x1b6   : > { %v2155_v32 = vmul.f32 %v4959_v14, %v4930_v42  ;;  %v2151_v3 = vmul.f32 %v4961_v11, %v4930_v42  ;;  %v1388_v20 = vmul.f32 %v3909_v59, %v3272_v29  ;;  %v600_v41 = vadd.f32 %v595_v8, %v4053_v62 }
 0x1b7   : > { %v359_v25 = vpop.permute.xlu1 %358  ;;  %v397_v37 = vpop.permute.xlu0 %396  ;;  %v1392_v35 = vmul.f32 %v3912_v5, %v3272_v29  ;;  %v1389_v21 = vmul.f32 %v3909_v59, %v3275_v44  ;;  %v1393_v48 = vmul.f32 %v3912_v5, %v3275_v44  ;;  %v1901_v62 = vmul.f32 %v4008_v58, %v4930_v42 }
 0x1b8   : > { %v362_v24 = vsel %vm360_vm5, %v4960_v1, %v359_v25  ;;  %v400_v16 = vsel %vm398_vm6, %v4963_v57, %v397_v37  ;;  %v1914_v15 = vadd.f32 %v1908_v9, %v1898_v43  ;;  %v4301_v8 = vadd.f32 %v1615_v0, %v1605_v31  ;;  %v4964_v25 = vld [vmem:[#allocation26_spill] sm:$0xff]  ;;  %v4966_v31 = vld [vmem:[#allocation25_spill] sm:$0xff]  ;;  %v4969_v1 = vld [vmem:[#allocation44_spill] sm:$0xff] }
 0x1b9   : > { %v366_v45 = vadd.f32 %v362_v24, %v328_v50  ;;  %2138 = vrot.lane.b32.xlu1 %v2130_v13, %s4933_s17  ;;  %1079 = vrot.lane.b32.xlu0 %v1072_v26, %s4962_s9  ;;  %v2161_v50 = vrot.slane %v2155_v32, 1  ;;  %v634_v37 = vsel %vm360_vm5, %v4964_v25, %v4051_v7  ;;  %v4965_v24 = vld [vmem:[#allocation39_spill] sm:$0xff]  ;;  %v1897_v5 = vmul.f32 %v4957_v47, %v4930_v42  ;;  %s4332_s17 = sld [smem:[#allocation2 + $0x61]] }
 0x1ba   : > { %v2157_v57 = vmul.f32 %v4959_v14, %v3275_v44  ;;  %v1398_v0 = vrot.slane %v1392_v35, 1  ;;  %v2153_v43 = vmul.f32 %v4961_v11, %v3275_v44  ;;  %v673_v9 = vsel %vm398_vm6, %v4966_v31, %v4069_v52  ;;  %v4967_v32 = vld [vmem:[#allocation43_spill] sm:$0xff] }
 0x1bb   : > { %v404_v13 = vadd.f32 %v400_v16, %v366_v45  ;;  %v435_v23 = vpop.permute.xlu1 %434  ;;  %v473_v26 = vpop.permute.xlu0 %472  ;;  %v639_v45 = vadd.f32 %v634_v37, %v600_v41  ;;  %v1399_v25 = vrot.slane %v1393_v48, 1  ;;  %v4968_v35 = vld [vmem:[#allocation19_spill] sm:$0xff]  ;;  %v840_v48 = vmul.f32 %v3875_v33, %v3275_v44 }
 0x1bc   : > { %v438_v59 = vsel %vm436_vm7, %v4965_v24, %v435_v23  ;;  %v476_v23 = vsel %vm474_vm8, %v4967_v32, %v473_v26  ;;  %v1907_v24 = vrot.slane %v1901_v62, 1  ;;  %v2163_v26 = vrot.slane %v2157_v57, 1 }
 0x1bd   : > { %v442_v16 = vadd.f32 %v438_v59, %v404_v13  ;;  %1333 = vrot.lane.b32.xlu1 %v4229_v55, %s4895_s0  ;;  %1626 = vrot.lane.b32.xlu0 %v1620_v46, %s4962_s9  ;;  %v2167_v55 = vadd.f32 %v2161_v50, %v2151_v3  ;;  %v839_v46 = vmul.f32 %v3875_v33, %v3272_v29 }
 0x1be   : > { %v843_v59 = vmul.f32 %v4968_v35, %v3272_v29  ;;  %v678_v62 = vadd.f32 %v673_v9, %v639_v45  ;;  %v844_v50 = vmul.f32 %v4968_v35, %v3275_v44  ;;  %v4346_v57 = vadd.f32 %v1398_v0, %v1388_v20 }
 0x1bf   : > { %v480_v41 = vadd.f32 %v476_v23, %v442_v16  ;;  %v511_v13 = vpop.permute.xlu1 %510  ;;  %v594_v37 = vpop.permute.xlu0 %593  ;;  %v4341_v16 = vstv %s4291_s4  ;;  %v4348_v33 = vadd.f32 %v1399_v25, %v1389_v21  ;;  %v1913_v45 = vadd.f32 %v1907_v24, %v1897_v5 }
 0x1c0   : > { %v514_v28 = vsel %vm512_vm9, %v4969_v1, %v511_v13  ;;  %v596_v31 = vsel %vm322_vm4, %v4049_v30, %v594_v37  ;;  %v602_v30 = vadd.f32 %v594_v37, %v4268_v49  ;;  %v849_v23 = vrot.slane %v843_v59, 1  ;;  %v4970_v49 = vld [vmem:[#allocation28_spill] sm:$0xff]  ;;  %v4972_v37 = vld [vmem:[#allocation33_spill] sm:$0xff] }
 0x1c1   : > { %v4334_v3 = vadd.f32 %v514_v28, %v480_v41  ;;  %1077 = vrot.lane.b32.xlu1 %v1071_v6, %s4962_s9  ;;  %1630 = vrot.lane.b32.xlu0 %v1622_v51, %s4962_s9  ;;  %v601_v28 = vadd.f32 %v596_v31, %v4266_v63  ;;  %v4353_v51 = vmul.f32 %v3943_v4, %v3272_v29  ;;  %v850_v25 = vrot.slane %v844_v50, 1 }
 0x1c2   : > { %v4357_v41 = vmul.f32 %v3943_v4, %v3275_v44  ;;  %v712_v20 = vsel %vm436_vm7, %v4970_v49, %v4071_v17  ;;  %v2169_v63 = vadd.f32 %v2163_v26, %v2153_v43  ;;  %v4971_v4 = vld [vmem:[#allocation35_spill] sm:$0xff]  ;;  %v751_v35 = vsel %vm474_vm8, %v4972_v37, %v4089_v39  ;;  %v4975_v37 = vld [vmem:[#allocation29_spill] sm:$0xff] }
 0x1c3   : > { %v633_v9 = vpop.permute.xlu1 %632  ;;  %v672_v6 = vpop.permute.xlu0 %671  ;;  %v717_v5 = vadd.f32 %v712_v20, %v678_v62  ;;  %v4369_v13 = vmul.f32 %v4971_v4, %v3272_v29  ;;  %v1903_v59 = vmul.f32 %v4008_v58, %v3275_v44  ;;  %v4378_v26 = vadd.f32 %v849_v23, %v839_v46  ;;  %v4973_v20 = vld [vmem:[#allocation45_spill] sm:$0xff] }
 0x1c4   : > { %v635_v21 = vsel %vm360_vm5, %v4051_v7, %v633_v9  ;;  %v641_v24 = vadd.f32 %v633_v9, %v602_v30  ;;  %v674_v7 = vsel %vm398_vm6, %v4069_v52, %v672_v6  ;;  %v4382_v62 = vmul.f32 %v4971_v4, %v3275_v44 }
 0x1c5   : > { %v640_v0 = vadd.f32 %v635_v21, %v601_v28  ;;  %1081 = vrot.lane.b32.xlu1 %v4280_v2, %s4962_s9  ;;  %1921 = vrot.lane.b32.xlu0 %v1914_v15, %s4962_s9  ;;  %v1353_v50 = vmul.f32 %v4341_v16, %v3272_v29  ;;  %v1899_v30 = vmul.f32 %v4957_v47, %v3275_v44  ;;  %v4393_v28 = vstv %s4332_s17 }
 0x1c6   : > { %v680_v43 = vadd.f32 %v672_v6, %v641_v24  ;;  %v2156_v58 = vmul.f32 %v4959_v14, %v3272_v29  ;;  %v756_v46 = vadd.f32 %v751_v35, %v717_v5  ;;  %v4399_v23 = vstv %s4343_s29 }
 0x1c7   : > { %v679_v2 = vadd.f32 %v674_v7, %v640_v0  ;;  %v711_v15 = vpop.permute.xlu1 %710  ;;  %v750_v31 = vpop.permute.xlu0 %749  ;;  %v856_v49 = vadd.f32 %v850_v25, %v840_v48  ;;  %v1909_v47 = vrot.slane %v1903_v59, 1  ;;  %v1349_v14 = vmul.f32 %v4973_v20, %v3272_v29  ;;  %v4976_v25 = vld [vmem:[#allocation34_spill] sm:$0xff] }
 0x1c8   : > { %v713_v52 = vsel %vm436_vm7, %v4071_v17, %v711_v15  ;;  %v719_v6 = vadd.f32 %v711_v15, %v680_v43  ;;  %v752_v17 = vsel %vm474_vm8, %v4089_v39, %v750_v31  ;;  %v1142_v0 = vrot.slane %v4369_v13, 1 }
 0x1c9   : > { %v718_v9 = vadd.f32 %v713_v52, %v679_v2  ;;  %1628 = vrot.lane.b32.xlu1 %v4301_v8, %s4962_s9  ;;  %2173 = vrot.lane.b32.xlu0 %v2167_v55, %s4895_s0  ;;  %v1359_v4 = vrot.slane %v1353_v50, 1  ;;  %v2194_v8 = vmul.f32 %v4393_v28, %v4930_v42  ;;  %v4974_v55 = vld [vmem:[#allocation46_spill] sm:$0xff]  ;;  %v1686_v7 = vmul.f32 %v4976_v25, %v3275_v44 }
 0x1ca   : > { %v790_v35 = vsel %vm512_vm9, %v4975_v37, %v4974_v55  ;;  %v758_v59 = vadd.f32 %v750_v31, %v719_v6  ;;  %v2162_v15 = vrot.slane %v2156_v58, 1  ;;  %v1143_v50 = vrot.slane %v4382_v62, 1 }
 0x1cb   : > { %v757_v21 = vadd.f32 %v752_v17, %v718_v9  ;;  %v789_v24 = vpop.permute.xlu1 %788  ;;  %v1436_v5 = vpop.permute.xlu0 %1435  ;;  %v795_v43 = vadd.f32 %v790_v35, %v756_v46  ;;  %v1915_v52 = vadd.f32 %v1909_v47, %v1899_v30  ;;  %v2152_v9 = vmul.f32 %v4961_v11, %v3272_v29  ;;  %v4977_v11 = vld [vmem:[#allocation17_spill] sm:$0xff] }
 0x1cc   : > { %v791_v39 = vsel %vm512_vm9, %v4974_v55, %v789_v24  ;;  %v1438_v48 = vsel %vm322_vm4, %v4140_v10, %v1436_v5  ;;  %v1352_v10 = vmul.f32 %v4341_v16, %v4930_v42  ;;  %v1365_v31 = vadd.f32 %v1359_v4, %v1349_v14 }
 0x1cd   : > { %v796_v2 = vadd.f32 %v791_v39, %v757_v21  ;;  %1919 = vrot.lane.b32.xlu1 %v1913_v45, %s4962_s9  ;;  %2177 = vrot.lane.b32.xlu0 %v2169_v63, %s4895_s0  ;;  %v2200_v46 = vrot.slane %v2194_v8, 1  ;;  %v2196_v45 = vmul.f32 %v4393_v28, %v3275_v44  ;;  %v1682_v30 = vmul.f32 %v4977_v11, %v3275_v44 }
 0x1ce   : > { %v1685_v58 = vmul.f32 %v4976_v25, %v3272_v29  ;;  %v797_v6 = vadd.f32 %v789_v24, %v758_v59  ;;  %v1692_v47 = vrot.slane %v1686_v7, 1  ;;  %v2168_v14 = vadd.f32 %v2162_v15, %v2152_v9 }
 0x1cf   : > { %v805_v17 = vcombine.low %v795_v43, %v796_v2  ;;  %v887_v55 = vpop.permute.xlu1 %886  ;;  %v4424_v37 = vpop.permute.xlu0 %1179  ;;  %v1444_v21 = vadd.f32 %v1436_v5, %v4348_v33  ;;  %v2192_v4 = vmul.f32 %v4399_v23, %v3275_v44  ;;  %v1354_v8 = vmul.f32 %v4341_v16, %v3275_v44 }
 0x1d0   : > { %v889_v63 = vsel %vm322_vm4, %v4117_v53, %v887_v55  ;;  %v4433_v62 = vsel %vm322_vm4, %v4166_v19, %v4424_v37  ;;  %v2190_v53 = vmul.f32 %v4399_v23, %v4930_v42  ;;  %v1358_v19 = vrot.slane %v1352_v10, 1 }
 0x1d1   : > { %1923 = vrot.lane.b32.xlu1 %v1915_v52, %s4962_s9  ;;  %1372 = vrot.lane.b32.xlu0 %v1365_v31, %s4962_s9  ;;  %v812_v24 = vrot.slane %v805_v17, %v4246_v12  ;;  %v1443_v35 = vadd.f32 %v1438_v48, %v4346_v57  ;;  %v2202_v43 = vrot.slane %v2196_v45, 1  ;;  %v1348_v2 = vmul.f32 %v4973_v20, %v4930_v42 }
 0x1d2   : > { %v2206_v7 = vadd.f32 %v2200_v46, %v2190_v53  ;;  %v819_v16 = vrot.slane %v797_v6, %v4246_v12  ;;  %v1681_v57 = vmul.f32 %v4977_v11, %v3272_v29  ;;  %v1691_v48 = vrot.slane %v1685_v58, 1 }
 0x1d3   : > { %v1729_v39 = vpop.permute.xlu1 %1728  ;;  %v1475_v25 = vpop.permute.xlu0 %1474  ;;  %v1350_v52 = vmul.f32 %v4973_v20, %v3275_v44  ;;  %v1360_v9 = vrot.slane %v1354_v8, 1  ;;  %v894_v17 = vadd.f32 %v889_v63, %v4378_v26  ;;  %v2208_v45 = vadd.f32 %v2202_v43, %v2192_v4 }
 0x1d4   : > { %v1731_v59 = vsel %vm322_vm4, %v4142_v60, %v1729_v39  ;;  %v1477_v33 = vsel %vm360_vm5, %v4196_v40, %v1475_v25  ;;  %v4454_v5 = vadd.f32 %v1475_v25, %v1444_v21  ;;  %v895_v60 = vadd.f32 %v887_v55, %v856_v49 }
 0x1d5   : > { %v1482_v15 = vadd.f32 %v1477_v33, %v1443_v35  ;;  %2175 = vrot.lane.b32.xlu1 %v2168_v14, %s4895_s0  ;;  %2212 = vrot.lane.b32.xlu0 %v2206_v7, %s4962_s9  ;;  %v1364_v40 = vadd.f32 %v1358_v19, %v1348_v2  ;;  %v820_v10 = vcombine.low %v812_v24, %v819_v16  ;;  %s2528_s0 = sld [smem:[#allocation2 + $0x6]]  ;;  %v1976_v24 = vstv %s4463_s5 }
 0x1d6   : > { %v2195_v11 = vmul.f32 %v4393_v28, %v3272_v29  ;;  %v1698_v58 = vadd.f32 %v1692_v47, %v1682_v30  ;;  %v1697_v55 = vadd.f32 %v1691_v48, %v1681_v57  ;;  %v1148_v26 = vadd.f32 %v1142_v0, %v4353_v51 }
 0x1d7   : > { %v926_v31 = vpop.permute.xlu1 %925  ;;  %v4468_v46 = vpop.permute.xlu0 %2021  ;;  %v1149_v28 = vadd.f32 %v1143_v50, %v4357_v41  ;;  %v1366_v53 = vadd.f32 %v1360_v9, %v1350_v52  ;;  %v827_v21 = vrot.slane %v820_v10, %v4246_v12  ;;  %v2191_v50 = vmul.f32 %v4399_v23, %v3272_v29 }
 0x1d8   : > { %v928_v6 = vsel %vm360_vm5, %v4115_v38, %v926_v31  ;;  %v934_v49 = vadd.f32 %v926_v31, %v895_v60  ;;  %v4477_v20 = vsel %vm322_vm4, %v4218_v54, %v4468_v46  ;;  %v1737_v63 = vadd.f32 %v1729_v39, %v1698_v58  ;;  %v4978_v31 = vld [vmem:[#allocation31_spill] sm:$0xff] }
 0x1d9   : > { %v933_v14 = vadd.f32 %v928_v6, %v894_v17  ;;  %1370 = vrot.lane.b32.xlu1 %v1364_v40, %s4962_s9  ;;  %2216 = vrot.lane.b32.xlu0 %v2208_v45, %s4962_s9  ;;  %v1736_v38 = vadd.f32 %v1731_v59, %v1697_v55  ;;  %v2201_v19 = vrot.slane %v2195_v11, 1  ;;  %v1188_v35 = vadd.f32 %v4424_v37, %v1149_v28 }
 0x1da   : > { %v1977_v33 = vmul.f32 %v1976_v24, %v4930_v42  ;;  %v1979_v37 = vmul.f32 %v1976_v24, %v3275_v44  ;;  %v1978_v60 = vmul.f32 %v1976_v24, %v3272_v29  ;;  %v2023_v45 = vsel %vm322_vm4, %v4978_v31, %v4218_v54 }
 0x1db   : > { %v1768_v30 = vpop.permute.xlu1 %1767  ;;  %v965_v47 = vpop.permute.xlu0 %964  ;;  %v1972_v57 = vstv %s2528_s0 }
 0x1dc   : > { %v1770_v4 = vsel %vm360_vm5, %v4168_v18, %v1768_v30  ;;  %v1776_v8 = vadd.f32 %v1768_v30, %v1737_v63  ;;  %v967_v13 = vsel %vm398_vm6, %v4243_v36, %v965_v47  ;;  %v4490_v51 = vadd.f32 %v965_v47, %v934_v49 }
 0x1dd   : > { %v1775_v41 = vadd.f32 %v1770_v4, %v1736_v38  ;;  %v4492_v0 = vadd.f32 %v967_v13, %v933_v14  ;;  %1374 = vrot.lane.b32.xlu1 %v1366_v53, %s4962_s9  ;;  %828 = vrot.lane.b32.xlu0 %v827_v21, %s2784_s11  ;;  %v1187_v18 = vadd.f32 %v4433_v62, %v1148_v26  ;;  %v1985_v11 = vrot.slane %v1979_v37, 1 }
 0x1de   : > { %v2207_v36 = vadd.f32 %v2201_v19, %v2191_v50  ;;  %v1973_v52 = vmul.f32 %v1972_v57, %v4930_v42  ;;  %v1975_v9 = vmul.f32 %v1972_v57, %v3275_v44  ;;  %v1984_v49 = vrot.slane %v1978_v60, 1 }
 0x1df   : > { %v1219_v39 = vpop.permute.xlu1 %1218  ;;  %v1807_v25 = vpop.permute.xlu0 %1806  ;;  %v1974_v14 = vmul.f32 %v1972_v57, %v3272_v29 }
 0x1e0   : > { %v1221_v7 = vsel %vm360_vm5, %v4198_v22, %v1219_v39  ;;  %v1227_v43 = vadd.f32 %v1219_v39, %v1188_v35  ;;  %v4502_v59 = vadd.f32 %v1807_v25, %v1776_v8  ;;  %v1983_v22 = vrot.slane %v1977_v33, 1 }
 0x1e1   : > { %v1226_v2 = vadd.f32 %v1221_v7, %v1187_v18  ;;  %2214 = vrot.lane.b32.xlu1 %v2207_v36, %s4962_s9  ;;  %v1991_v63 = vadd.f32 %v1985_v11, %v1975_v9  ;;  %v1990_v30 = vadd.f32 %v1984_v49, %v1974_v14 }
 0x1e2   : > { %v1989_v6 = vadd.f32 %v1983_v22, %v1973_v52 }
 0x1e3   : > { %v1514_v23 = vpop.permute.xlu1 %1513  ;;  %v2059_v16 = vpop.permute.xlu0 %2058  ;;  %v2030_v53 = vadd.f32 %v4468_v46, %v1991_v63  ;;  %v2029_v21 = vadd.f32 %v4477_v20, %v1990_v30 }
 0x1e4   : > { %v1516_v62 = vsel %vm398_vm6, %v4220_v27, %v1514_v23  ;;  %v4510_v48 = vadd.f32 %v1514_v23, %v4454_v5  ;;  %v4979_v27 = vld [vmem:[#allocation20_spill] sm:$0xff]  ;;  %v2028_v44 = vadd.f32 %v2023_v45, %v1989_v6 }
 0x1e5   : > { %v4513_v40 = vadd.f32 %v1516_v62, %v1482_v15 }
 0x1e7   : > { %v1805_v10 = vpop.permute.xlu1 %1804  ;;  %v1254_v17 = vpop.permute.xlu0 %1253 }
 0x1e8   : > { %v1808_v5 = vsel %vm398_vm6, %v4979_v27, %v1805_v10  ;;  %v1809_v58 = vsel %vm398_vm6, %v1805_v10, %v1807_v25 }
 0x1e9   : > { %v4524_v15 = vadd.f32 %v1808_v5, %v4185_v34  ;;  %v4526_v55 = vadd.f32 %v1809_v58, %v1775_v41 }
 0x1eb   : > { %v2057_v26 = vpop.permute.xlu1 %2056  ;;  %v1258_v28 = vpop.permute.xlu0 %1257 }
 0x1ec   : > { %v2062_v54 = vsel %vm360_vm5, %v2057_v26, %v2059_v16  ;;  %v4530_v38 = vadd.f32 %v1258_v28, %v1227_v43 }
 0x1ed   : > { %v2067_v47 = vadd.f32 %v2062_v54, %v2028_v44 }
 0x1ef   : > { %v2061_v34 = vpop.permute.xlu1 %2060  ;;  %v1002_v19 = vpop.permute.xlu0 %1001 }
 0x1f0   : > { %v2063_v4 = vsel %vm360_vm5, %v2059_v16, %v2061_v34  ;;  %v2069_v8 = vadd.f32 %v2061_v34, %v2030_v53 }
 0x1f1   : > { %v2068_v13 = vadd.f32 %v2063_v4, %v2029_v21 }
 0x1f3   : > { %v1256_v29 = vpop.permute.xlu1 %1255  ;;  %v1549_v41 = vpop.permute.xlu0 %1548 }
 0x1f4   : > { %v1259_v50 = vsel %vm398_vm6, %v1254_v17, %v1256_v29  ;;  %v1260_v24 = vsel %vm398_vm6, %v1256_v29, %v1258_v28 }
 0x1f5   : > { %v4538_v35 = vadd.f32 %v1259_v50, %v4208_v61  ;;  %v4540_v18 = vadd.f32 %v1260_v24, %v1226_v2 }
 0x1f7   : > { %v1000_v46 = vpop.permute.xlu1 %999  ;;  %v1553_v39 = vpop.permute.xlu0 %1552 }
 0x1f8   : > { %v1005_v30 = vsel %vm436_vm7, %v1000_v46, %v1002_v19 }
 0x1fb   : > { %v1004_v20 = vpop.permute.xlu1 %1003  ;;  %v4542_v25 = vpop.permute.xlu0 %1843 }
 0x1fc   : > { %v1012_v29 = vadd.f32 %v1004_v20, %v4490_v51 }
 0x1ff   : > { %v1551_v36 = vpop.permute.xlu1 %1550  ;;  %v2096_v7 = vpop.permute.xlu0 %2095 }
 0x200   : > { %v1554_v50 = vsel %vm436_vm7, %v1549_v41, %v1551_v36  ;;  %v1555_v24 = vsel %vm436_vm7, %v1551_v36, %v1553_v39 }
 0x201   : > { %v1560_v41 = vadd.f32 %v1555_v24, %v4513_v40 }
 0x203   : > { %v1842_v43 = vpop.permute.xlu1 %1841  ;;  %v2100_v33 = vpop.permute.xlu0 %2099 }
 0x204   : > { %v4544_v23 = vadd.f32 %v2100_v33, %v2069_v8  ;;  %v1010_v8 = vadd.f32 %v1005_v30, %v4262_v56 }
 0x207   : > { %v4546_v16 = vpop.permute.xlu1 %1845  ;;  %v4548_v57 = vpop.permute.xlu0 %1294 }
 0x20b   : > { %v2098_v37 = vpop.permute.xlu1 %2097  ;;  %v1039_v61 = vpop.permute.xlu0 %1038 }
 0x20c   : > { %v2101_v2 = vsel %vm398_vm6, %v2096_v7, %v2098_v37  ;;  %v2102_v62 = vsel %vm398_vm6, %v2098_v37, %v2100_v33 }
 0x20d   : > { %v4552_v22 = vadd.f32 %v2101_v2, %v2067_v47  ;;  %v4554_v60 = vadd.f32 %v2102_v62, %v2068_v13  ;;  %v1006_v47 = vsel %vm436_vm7, %v1002_v19, %v1004_v20  ;;  %v1561_v19 = vadd.f32 %v1553_v39, %v4510_v48  ;;  %v4980_v62 = vld [vmem:[#allocation48_spill] sm:$0xff] }
 0x20e   : > { %v1011_v13 = vadd.f32 %v1006_v47, %v4492_v0 }
 0x20f   : > { %v4556_v52 = vpop.permute.xlu1 %1292  ;;  %v1043_v9 = vpop.permute.xlu0 %1042 }
 0x210   : > { %v1051_v7 = vadd.f32 %v1043_v9, %v1012_v29  ;;  %v1848_v29 = vsel %vm436_vm7, %v4542_v25, %v4546_v16 }
 0x213   : > { %v4558_v10 = vpop.permute.xlu1 %1296  ;;  %v1590_v17 = vpop.permute.xlu0 %1589 }
 0x217   : > { %v1041_v31 = vpop.permute.xlu1 %1040  ;;  %v1881_v45 = vpop.permute.xlu0 %1880 }
 0x218   : > { %v1044_v34 = vsel %vm474_vm8, %v1039_v61, %v1041_v31  ;;  %v1045_v4 = vsel %vm474_vm8, %v1041_v31, %v1043_v9  ;;  %v1559_v31 = vadd.f32 %v1554_v50, %v4980_v62 }
 0x219   : > { %v1049_v33 = vadd.f32 %v1044_v34, %v1010_v8  ;;  %v1050_v37 = vadd.f32 %v1045_v4, %v1011_v13  ;;  %v1847_v4 = vsel %vm436_vm7, %v1842_v43, %v4542_v25 }
 0x21a   : > { %v1852_v43 = vadd.f32 %v1847_v4, %v4524_v15 }
 0x21b   : > { %v1588_v11 = vpop.permute.xlu1 %1587  ;;  %v4560_v27 = vpop.permute.xlu0 %1884 }
 0x21c   : > { %v1593_v56 = vsel %vm474_vm8, %v1588_v11, %v1590_v17 }
 0x21d   : > { %v1598_v48 = vadd.f32 %v1593_v56, %v1559_v31 }
 0x21f   : > { %v1592_v5 = vpop.permute.xlu1 %1591  ;;  %v4562_v58 = vpop.permute.xlu0 %2136 }
 0x220   : > { %v1594_v0 = vsel %vm474_vm8, %v1590_v17, %v1592_v5  ;;  %v1600_v47 = vadd.f32 %v1592_v5, %v1561_v19 }
 0x221   : > { %v1599_v39 = vadd.f32 %v1594_v0, %v1560_v41 }
 0x223   : > { %v1883_v6 = vpop.permute.xlu1 %1882  ;;  %v4564_v49 = vpop.permute.xlu0 %1331 }
 0x227   : > { %v4566_v44 = vpop.permute.xlu1 %2134  ;;  %v4568_v14 = vpop.permute.xlu0 %1335 }
 0x22b   : > { %v4570_v26 = vpop.permute.xlu1 %2138  ;;  %v1080_v28 = vpop.permute.xlu0 %1079 }
 0x22f   : > { %v4572_v63 = vpop.permute.xlu1 %1333  ;;  %v1627_v54 = vpop.permute.xlu0 %1626 }
 0x230   : > { %v1337_v4 = vsel %vm474_vm8, %v4564_v49, %v4572_v63 }
 0x233   : > { %v1078_v53 = vpop.permute.xlu1 %1077  ;;  %v1631_v21 = vpop.permute.xlu0 %1630 }
 0x234   : > { %v1083_v46 = vsel %vm512_vm9, %v1078_v53, %v1080_v28  ;;  %v1639_v11 = vadd.f32 %v1631_v21, %v1600_v47  ;;  %v1298_v47 = vsel %vm436_vm7, %v4556_v52, %v4548_v57 }
 0x235   : > { %v1088_v20 = vadd.f32 %v1083_v46, %v1049_v33  ;;  %v1853_v33 = vadd.f32 %v1848_v29, %v4526_v55  ;;  %v1303_v52 = vadd.f32 %v1298_v47, %v4538_v35 }
 0x237   : > { %v1082_v61 = vpop.permute.xlu1 %1081  ;;  %v1922_v2 = vpop.permute.xlu0 %1921 }
 0x238   : > { %v1084_v51 = vsel %vm512_vm9, %v1080_v28, %v1082_v61  ;;  %v1090_v30 = vadd.f32 %v1082_v61, %v1051_v7  ;;  %v1887_v7 = vsel %vm474_vm8, %v1883_v6, %v4560_v27 }
 0x239   : > { %v1089_v36 = vadd.f32 %v1084_v51, %v1050_v37  ;;  %v1661_v37 = vrot.slane %v1639_v11, %v4246_v12  ;;  %v1892_v56 = vadd.f32 %v1887_v7, %v1853_v33  ;;  %v1338_v11 = vsel %vm474_vm8, %v4572_v63, %v4568_v14 }
 0x23a   : > { %v1112_v8 = vrot.slane %v1090_v30, %v4246_v12  ;;  %v1342_v63 = vadd.f32 %v1337_v4, %v1303_v52  ;;  %v4989_v4 = vld [vmem:[#allocation39_spill] sm:$0xff] }
 0x23b   : > { %v1098_v9 = vcombine.low %v1088_v20, %v1089_v36  ;;  %v1629_v53 = vpop.permute.xlu1 %1628  ;;  %v4590_v34 = vpop.permute.xlu0 %2173 }
 0x23c   : > { %v1632_v17 = vsel %vm512_vm9, %v1627_v54, %v1629_v53  ;;  %v1633_v28 = vsel %vm512_vm9, %v1629_v53, %v1631_v21  ;;  %v1854_v54 = vadd.f32 %v4546_v16, %v4502_v59  ;;  %v1886_v21 = vsel %vm474_vm8, %v1881_v45, %v1883_v6 }
 0x23d   : > { %v1105_v40 = vrot.slane %v1098_v9, %v4246_v12  ;;  %v1637_v13 = vadd.f32 %v1632_v17, %v1598_v48  ;;  %v1638_v5 = vadd.f32 %v1633_v28, %v1599_v39  ;;  %v1891_v31 = vadd.f32 %v1886_v21, %v1852_v43 }
 0x23e   : > { %v1893_v15 = vadd.f32 %v4560_v27, %v1854_v54  ;;  %v2140_v53 = vsel %vm436_vm7, %v4566_v44, %v4562_v58  ;;  %v2141_v44 = vsel %vm436_vm7, %v4562_v58, %v4570_v26 }
 0x23f   : > { %v1113_v50 = vcombine.low %v1105_v40, %v1112_v8  ;;  %v1647_v24 = vcombine.low %v1637_v13, %v1638_v5  ;;  %v1920_v46 = vpop.permute.xlu1 %1919  ;;  %v2178_v19 = vpop.permute.xlu0 %2177  ;;  %v2145_v49 = vadd.f32 %v2140_v53, %v4552_v22  ;;  %v2146_v5 = vadd.f32 %v2141_v44, %v4554_v60  ;;  %v4992_v44 = vld [vmem:[#allocation30_spill] sm:$0xff] }
 0x240   : > { %v1925_v62 = vsel %vm512_vm9, %v1920_v46, %v1922_v2 }
 0x241   : > { %v1654_v25 = vrot.slane %v1647_v24, %v4246_v12  ;;  %v1120_v61 = vrot.slane %v1113_v50, %v4246_v12  ;;  %v1930_v6 = vadd.f32 %v1925_v62, %v1891_v31 }
 0x243   : > { %v1662_v59 = vcombine.low %v1654_v25, %v1661_v37  ;;  %v1924_v16 = vpop.permute.xlu1 %1923  ;;  %1121 = vrot.lane.b32.xlu1 %v1120_v61, %s2785_s6  ;;  %v1373_v51 = vpop.permute.xlu0 %1372 }
 0x244   : > { %v1926_v45 = vsel %vm512_vm9, %v1922_v2, %v1924_v16  ;;  %v1932_v0 = vadd.f32 %v1924_v16, %v1893_v15  ;;  %v1299_v2 = vsel %vm436_vm7, %v4548_v57, %v4558_v10  ;;  %v1305_v57 = vadd.f32 %v4558_v10, %v4530_v38 }
 0x245   : > { %v1931_v55 = vadd.f32 %v1926_v45, %v1892_v56  ;;  %v1669_v41 = vrot.slane %v1662_v59, %v4246_v12  ;;  %v1304_v17 = vadd.f32 %v1299_v2, %v4540_v18  ;;  %v2147_v38 = vadd.f32 %v4570_v26, %v4544_v23 }
 0x246   : > { %v1954_v30 = vrot.slane %v1932_v0, %v4246_v12  ;;  %v1344_v8 = vadd.f32 %v4568_v14, %v1305_v57  ;;  %v4981_v59 = vstv %s3737_s18  ;;  %v4983_v0 = vld [vmem:[#allocation36_spill] sm:$0xff] }
 0x247   : > { %v1940_v20 = vcombine.low %v1930_v6, %v1931_v55  ;;  %v2176_v36 = vpop.permute.xlu1 %2175  ;;  %1670 = vrot.lane.b32.xlu0 %v1669_v41, %s2786_s16  ;;  %v2213_v39 = vpop.permute.xlu0 %2212  ;;  %v1343_v13 = vadd.f32 %v1338_v11, %v1304_v17  ;;  %v2186_v24 = vadd.f32 %v2178_v19, %v2147_v38  ;;  %v281_v16 = vmul.f32 %v4981_v59, %v4930_v42  ;;  %v4990_v11 = vld [vmem:[#allocation27_spill] sm:$0xff] }
 0x248   : > { %v2179_v18 = vsel %vm474_vm8, %v4590_v34, %v2176_v36  ;;  %v2180_v10 = vsel %vm474_vm8, %v2176_v36, %v2178_v19  ;;  %v4982_v6 = vstv %s3731_s27  ;;  %v4991_v17 = vld [vmem:[#allocation23_spill] sm:$0xff] }
 0x249   : > { %v1947_v27 = vrot.slane %v1940_v20, %v4246_v12  ;;  %v2184_v46 = vadd.f32 %v2179_v18, %v2145_v49  ;;  %v2185_v43 = vadd.f32 %v2180_v10, %v2146_v5  ;;  %v285_v45 = vrot.slane %v281_v16, 1 }
 0x24a   : > { %v278_v55 = vmul.f32 %v4982_v6, %v4930_v42  ;;  %v437_v42 = vsel %vm436_vm7, %v4990_v11, %v4989_v4  ;;  %v475_v57 = vsel %vm474_vm8, %v4991_v17, %v4967_v32 }
 0x24b   : > { %v1955_v48 = vcombine.low %v1947_v27, %v1954_v30  ;;  %v1371_v9 = vpop.permute.xlu1 %1370  ;;  %v2217_v29 = vpop.permute.xlu0 %2216  ;;  %v4985_v27 = vld [vmem:[#allocation37_spill] sm:$0xff]  ;;  %v4986_v30 = vld [vmem:[#allocation22_spill] sm:$0xff] }
 0x24c   : > { %v1376_v40 = vsel %vm512_vm9, %v1371_v9, %v1373_v51  ;;  %v2225_v7 = vadd.f32 %v2217_v29, %v2186_v24  ;;  %v289_v20 = vadd.f32 %v285_v45, %v278_v55  ;;  %v361_v47 = vsel %vm360_vm5, %v4986_v30, %v4985_v27  ;;  %v5002_v27 = vld [vmem:[#allocation47_spill] sm:$0xff] }
 0x24d   : > { %v1962_v28 = vrot.slane %v1955_v48, %v4246_v12  ;;  %v1381_v22 = vadd.f32 %v1376_v40, %v1342_v63  ;;  %v4987_v48 = vld [vmem:[#allocation38_spill] sm:$0xff]  ;;  %v513_v40 = vsel %vm512_vm9, %v4992_v44, %v4969_v1  ;;  %v4993_v24 = vmov 0 }
 0x24e   : > { %v2247_v19 = vrot.slane %v2225_v7, %v4246_v12  ;;  %v2310_v30 = vsub.s32 0, %v5002_v27 }
 0x24f   : > { %v1375_v35 = vpop.permute.xlu1 %1374  ;;  %1963 = vrot.lane.b32.xlu1 %v1962_v28, %s2787_s20  ;;  %v829_v38 = vpop.permute.xlu0 %828 }
 0x250   : > { %v1377_v58 = vsel %vm512_vm9, %v1373_v51, %v1375_v35  ;;  %v1383_v50 = vadd.f32 %v1375_v35, %v1344_v8  ;;  %v4984_v51 = vld [vmem:[#allocation21_spill] sm:$0xff]  ;;  %v274_v8 = vld [vmem:[%s4774_s1] sm:$0x3] }
 0x251   : > { %v1382_v14 = vadd.f32 %v1377_v58, %v1343_v13  ;;  %v323_v41 = vsel %vm322_vm4, %v4984_v51, %v4983_v0  ;;  %v798_v35 = vadd.s32 4294967294, %v274_v8  ;;  %v1091_v18 = vadd.s32 4294967295, %v274_v8 }
 0x252   : > { %v2281_v33 = vrot.slane %v1383_v50, %v4246_v12  ;;  %v327_v36 = vadd.f32 %v323_v41, %v289_v20  ;;  %v1933_v10 = vadd.s32 2, %v274_v8  ;;  %v519_v5 = vadd.s32 4294967293, %v274_v8 }
 0x253   : > { %v2267_v54 = vcombine.low %v1381_v22, %v1382_v14  ;;  %v2215_v21 = vpop.permute.xlu1 %2214  ;;  %vm799_vm10 = vcmp.ge.s32.totalorder %v798_v35, 0  ;;  %vm800_vm12 = vcmp.lt.s32.totalorder %v798_v35, 16  ;;  %vm1092_vm13 = vcmp.ge.s32.totalorder %v1091_v18, 0 }
 0x254   : > { %v2218_v23 = vsel %vm512_vm9, %v2213_v39, %v2215_v21  ;;  %v2219_v26 = vsel %vm512_vm9, %v2215_v21, %v2217_v29  ;;  %v365_v2 = vadd.f32 %v361_v47, %v327_v36  ;;  %v4988_v39 = vld [vmem:[#allocation24_spill] sm:$0xff]  ;;  %v1640_v1 = vadd.s32 1, %v274_v8  ;;  %vm4689_vm5 = vmand %vm799_vm10, %vm800_vm12 }
 0x255   : > { %v2274_v34 = vrot.slane %v2267_v54, %v4246_v12  ;;  %v2223_v60 = vadd.f32 %v2218_v23, %v2184_v46  ;;  %v2224_v37 = vadd.f32 %v2219_v26, %v2185_v43  ;;  %v399_v9 = vsel %vm398_vm6, %v4988_v39, %v4987_v48 }
 0x256   : > { %v403_v53 = vadd.f32 %v399_v9, %v365_v2  ;;  %v830_v29 = vrot.slane %v829_v38, 1  ;;  %vm1093_vm15 = vcmp.lt.s32.totalorder %v1091_v18, 16  ;;  %vm1935_vm1 = vcmp.lt.s32.totalorder %v1933_v10, 16 }
 0x257   : > { %v2282_v25 = vcombine.low %v2274_v34, %v2281_v33  ;;  %v2233_v61 = vcombine.low %v2223_v60, %v2224_v37  ;;  %vm520_vm3 = vcmp.ge.s32.totalorder %v519_v5, 0  ;;  %vm521_vm4 = vcmp.lt.s32.totalorder %v519_v5, 16  ;;  %vm4694_vm6 = vmand %vm1092_vm13, %vm1093_vm15 }
 0x258   : > { %v441_v52 = vadd.f32 %v437_v42, %v403_v53  ;;  %v4994_v24 = vsel %vm4689_vm5, 4294967295, %v4993_v24  ;;  %v4995_v43 = vmov 0  ;;  %vm1641_vm7 = vcmp.ge.s32.totalorder %v1640_v1, 0  ;;  %vm522_vm13 = vmand %vm520_vm3, %vm521_vm4  ;;  %v2642_v53 = vld [vmem:[%s2982_s7] sm:$0xff]  ;;  %s2690_s7 = sshll.u32 %s2790_s15, 4  ;;  %s2691_s7 = int_to_ptr.vmem [resolvable:$false] %s2690_s7 }
 0x259   : > { %v2240_v62 = vrot.slane %v2233_v61, %v4246_v12  ;;  %v2289_v15 = vrot.slane %v2282_v25, %v4246_v12  ;;  %v4996_v43 = vsel %vm4694_vm6, 4294967295, %v4995_v43  ;;  %vm1642_vm8 = vcmp.lt.s32.totalorder %v1640_v1, 16  ;;  %s2692_s9 = scalar_lea.vmem %s2691_s7, 256  ;;  %p2693_p0 = scmp.lt.s32.totalorder %s4726_s21, %s2691_s7 }
 0x25a   : > { %v479_v28 = vadd.f32 %v475_v57, %v441_v52  ;;  %vm1673_vm9 = vcmask 1014784   ;;  %v832_v21 = vsel %vm831_vm11, %v829_v38, %v830_v29  ;;  %vm4997_vm10 = vcmp.ge.s32.totalorder %v1933_v10, 0  ;;  %vm1643_vm5 = vmand %vm1641_vm7, %vm1642_vm8  ;;  %p2694_p3 = scmp.lt.s32.totalorder %s2692_s9, %s2686_s26 }
 0x25b   : > { %v2248_v31 = vcombine.low %v2240_v62, %v2247_v19  ;;  %2290 = vrot.lane.b32.xlu0 %v2289_v15, %s2788_s2  ;;  %vm4702_vm12 = vmand %vm4997_vm10, %vm1935_vm1  ;;  %vm5000_vm11 = vnez %v4994_v24  ;;  %vm2259_vm1 = vcmask 998400   ;;  %v2314_v47 = vsub.s32 1, %v5002_v27 }
 0x25c   : > { %v517_v49 = vadd.f32 %v513_v40, %v479_v28  ;;  %v834_v25 = vsel %vm5000_vm11, %v832_v21, 0.0  ;;  %p2695_p5 = por %p2694_p3, %p2693_p0 }
 0x25d   : > { %v2255_v56 = vrot.slane %v2248_v31, %v4246_v12 }
 0x25e   : > { %v525_v13 = vcombine.low %v517_v49, %v4334_v3  ;;  %v2226_v3 = vadd.s32 3, %v274_v8  ;;  %p2696_p11 = pnand %p2695_p5, %p2689_p12 }
 0x25f   : > { %2256 = vrot.lane.b32.xlu1 %v2255_v56, %s2789_s25 }
 0x260   : > { %v532_v32 = vrot.slane %v525_v13, %v4246_v12  ;;  %vm2227_vm15 = vcmp.ge.s32.totalorder %v2226_v3, 0  ;;  %vm2228_vm6 = vcmp.lt.s32.totalorder %v2226_v3, 16 }
 0x262   : > { %v539_v33 = vrot.slane %v532_v32, %v4246_v12 }
 0x264   : > { %v541_v12 = vsel %vm522_vm13, %v539_v33, 0.0 }
 0x265   : > { %v2263_v59 = vadd.f32 %v834_v25, %v541_v12 }
 0x2b5   : > { %v1122_v63 = vpop.permute.xlu1 %1121 }
 0x2b6   : > { %v1123_v14 = vrot.slane %v1122_v63, 1 }
 0x2b8   : > { %v1125_v7 = vsel %vm1124_vm14, %v1122_v63, %v1123_v14  ;;  %vm5001_vm14 = vnez %v4996_v43 }
 0x2b9   : > { %v1671_v22 = vpop.permute.xlu0 %1670  ;;  %v1127_v61 = vsel %vm5001_vm14, %v1125_v7, 0.0 }
 0x2ba   : > { %v1672_v46 = vrot.slane %v1671_v22, 1 }
 0x2bc   : > { %v1674_v60 = vsel %vm1673_vm9, %v1671_v22, %v1672_v46 }
 0x2bd   : > { %v1676_v56 = vsel %vm1643_vm5, %v1674_v60, 0.0 }
 0x2c1   : > { %v1964_v58 = vpop.permute.xlu1 %1963 }
 0x2c2   : > { %v1965_v50 = vrot.slane %v1964_v58, 1 }
 0x2c4   : > { %v1967_v26 = vsel %vm1966_vm2, %v1964_v58, %v1965_v50  ;;  %vm2229_vm2 = vmand %vm2227_vm15, %vm2228_vm6 }
 0x2c5   : > { %v1969_v19 = vsel %vm4702_vm12, %v1967_v26, 0.0 }
 0x2c6   : > { %v2297_v16 = vadd.f32 %v1969_v19, %v1676_v56 }
 0x2cd   : > { %v2291_v54 = vpop.permute.xlu0 %2290 }
 0x2ce   : > { %v2292_v34 = vrot.slane %v2291_v54, 1 }
 0x2d0   : > { %v2294_v37 = vsel %vm2293_vm0, %v2291_v54, %v2292_v34 }
 0x2d1   : > { %v2257_v62 = vpop.permute.xlu1 %2256  ;;  %v2296_v15 = vadd.f32 %v2294_v37, %v1127_v61 }
 0x2d2   : > { %v2258_v31 = vrot.slane %v2257_v62, 1 }
 0x2d3   : > { %v2298_v55 = vadd.f32 %v2296_v15, %v2263_v59 }
 0x2d4   : > { %v2260_v45 = vsel %vm2259_vm1, %v2257_v62, %v2258_v31 }
 0x2d5   : > { %v2262_v6 = vsel %vm2229_vm2, %v2260_v45, 0.0 }
 0x2d6   : > { %v2299_v0 = vadd.f32 %v2297_v16, %v2262_v6 }
 0x2d8   : > { %v2300_v51 = vadd.f32 %v2299_v0, %v2298_v55 }
 0x2da   : > { %v2542_v41 = vmul.f32 -1.442695, %v2300_v51 }
 0x2dc   : > { %2638 = vpow2.f32 %v2542_v41 }
 0x2e6   : > { %v2639_v20 = vpop.eup %2638 }
 0x2e7   : > { %v2304_v36 = vadd.f32 1.0, %v2639_v20 }
 0x2e9   : > { %2640 = vrcp.f32 %v2304_v36 }
 0x2f3   : > { %v2641_v2 = vpop.eup %2640 }
 0x2f4   : > { %v2311_v48 = vrot.slane %v2641_v2, %v2310_v30  ;;  %v2315_v39 = vrot.slane %v2641_v2, %v2314_v47 }
 0x2f6   : > { %v2316_v9 = vcombine.low %v2311_v48, %v2315_v39 }
 0x2f8   : > { %v2318_v4 = vmul.f32 %v2642_v53, %v2316_v9 }
 0x2fa   : > { %2319 = vst [vmem:[%s216_s8] sm:$0xff] %v2318_v4 }
 0x2fb   : > { %2699 = shalt.err (!%p2696_p11)
}
 0x2fc   : > { %s2700_s10 = scalar_lea.hbm %s4724_s14, 128  ;;  %s2704_s29 = scalar_lea.hbm %s4776_s3, 256 }
 0x2fd   : > { %p2701_p13 = scmp.ne.s32.totalorder %s4724_s14, %s2700_s10  ;;  %p2705_p6 = scmp.lt.u32.totalorder %s4724_s14, %s4776_s3 }
 0x2fe   : > { %p2706_p9 = scmp.lt.u32.totalorder %s2704_s29, %s2700_s10  ;;  %p2708_p4 = scmp.lt.u32.totalorder %s2700_s10, %s4724_s14 }
 0x2ff   : > { %p2702_p7 = pnand %p2701_p13, %p5004_p8 }
 0x300   : > { %p2707_p1 = por %p2706_p9, %p2705_p6 }
 0x301   : > { %p2703_p10 = pneg %p2702_p7 }
 0x302   : > { %p2709_p2 = por %p2708_p4, %p2707_p1 }
 0x304   : > { %p2710_p12 = pnand %p2709_p2, %p2703_p10 }
 0x306   : > { %2713 = shalt.err (!%p2710_p12)
}
 0x307   : > { %2556 = dma.vmem_to_hbm [thread:$0]  (%p5004_p8), %s4726_s21, 128, %s4724_s14, %s2321_s30  }
 0x308 PF: > { %s5005_s11 = sld [smem:[#allocation14_spill]]  ;;  %s2349_s6 = sand.u32 1, %s2752_s12  }
 0x309   : > { %p5006_p0 = scmp.ne.s32.totalorder %s4864_s23, 0  ;;  %s2350_s16 = scalar_lea.sflag [#allocation4], %s2349_s6 }
 0x30e   : > { %p5007_p3 = scmp.ge.s32.totalorder %s5005_s11, 2 }
 0x310   : > { %p2567_p5 = pnand %p5007_p3, %p5006_p0 }
 0x312   : > { %2747 = dma.done.wait (!%p2567_p5), %s2350_s16, 128  }
 0x313   : > { %2749 = vsyncadd (!%p2567_p5), %s2350_s16, 4294967168  ;;  %s20_s17 = sadd.s32 1, %s5005_s11   ;;  %s5008_s12 = sld [smem:[#allocation11_spill]] }
 0x314   : > { %p17_p11 = scmp.ge.s32.totalorder %s20_s17, 4   ;;  %s5009_s13 = sld [smem:[#allocation12_spill]] }
 0x315   : > { %s5010_s14 = sld [smem:[#allocation16_spill]]  ;;  %s5011_s15 = sld [smem:[#allocation13_spill]] }
 0x316   : > { %s5012_s16 = sld [smem:[#allocation15_spill]]  ;;  %19 = sbr.rel (!%p17_p11) target bundleno = 10 (0xa), region = 82 }
 0x31d   :  { %2355 = vsyncpa [#allocation3], 1 }
 0x31e   :  { %2357 = vsyncpa [#allocation3 + $0x1], 1 }
 0x31f   :  { %2358 = vsyncpa [#allocation4], 1 }
 0x320   :  { %2360 = vsyncpa [#allocation4 + $0x1], 1 }
 0x321   :  { %2361 = vsyncpa [#allocation5], 1 }
 0x322   :  { %2363 = vsyncpa [#allocation5 + $0x1], 1 }

</bundles_post_ra>
